<compile_context>
chip_gen: v7x
topology: tpu7x:2x2x1
jax: 0.10.0
libtpu: 0.0.40
codegen_flags: <defaults>
</compile_context>

<pallas_src>
import jax
import jax.numpy as jnp
from jax.experimental import pallas as pl
from jax.experimental.pallas import tpu as pltpu

C1 = 0.01 ** 2
C2 = 0.03 ** 2


def _ssim_kernel(x_ref, y_ref, o_ref, tmp_ref):
    # x_ref / y_ref: (B, H, W) unpadded planes (f32/bf16/f16); o_ref: f32.
    B, H, W = o_ref.shape
    f32 = jnp.float32

    x = x_ref[...].astype(f32)
    y = y_ref[...].astype(f32)

    # Hoisted products: 3 multiplies per pixel instead of per-tap multiplies.
    x2 = x * x
    y2 = y * y
    xy = x * y

    # Boundary rows come straight from the (VMEM-resident) input refs, so no
    # value-level gather/update machinery is needed for the reflection fixups.
    def row_x(r):
        return x_ref[:, r:r + 1, :].astype(f32)

    def row_y(r):
        return y_ref[:, r:r + 1, :].astype(f32)

    def box3(q, row):
        """Separable 3x3 box *sum* over the reflection-padded plane.

        Bulk of the plane: circular rolls (XLU slot, cheap) + plain adds.
        Reflection is then fixed by patching only rows 0/H-1 and cols 0/W-1
        via 1-sublane-row / 1-lane ref stores (no full-plane selects).
        """
        # ---- vertical 3-tap (sublane direction) ----
        up = pltpu.roll(q, 1, 1)          # up[i] = q[i-1]  (wraps at i = 0)
        dn = pltpu.roll(q, H - 1, 1)      # dn[i] = q[i+1]  (wraps at i = H-1)
        tmp_ref[...] = q + up + dn
        tmp_ref[:, 0:1, :] = row(0) + 2.0 * row(1)              # reflect -1 -> 1
        tmp_ref[:, H - 1:H, :] = row(H - 1) + 2.0 * row(H - 2)  # reflect H -> H-2
        rs = tmp_ref[...]                 # row sums, reflection-correct

        # ---- horizontal 3-tap (lane direction) ----
        lf = pltpu.roll(rs, 1, 2)         # lf[j] = rs[j-1] (wraps at j = 0)
        rt = pltpu.roll(rs, W - 1, 2)     # rt[j] = rs[j+1] (wraps at j = W-1)
        c0 = tmp_ref[:, :, 0:1]           # read boundary columns of rs before
        c1 = tmp_ref[:, :, 1:2]           # overwriting tmp_ref below
        cm1 = tmp_ref[:, :, W - 1:W]
        cm2 = tmp_ref[:, :, W - 2:W - 1]
        tmp_ref[...] = rs + lf + rt
        tmp_ref[:, :, 0:1] = c0 + 2.0 * c1                      # reflect -1 -> 1
        tmp_ref[:, :, W - 1:W] = cm1 + 2.0 * cm2                # reflect W -> W-2
        return tmp_ref[...]

    inv9 = f32(1.0 / 9.0)
    mu_x = box3(x, row_x) * inv9
    mu_y = box3(y, row_y) * inv9
    sigma_x = box3(x2, lambda r: row_x(r) * row_x(r)) * inv9 - mu_x * mu_x
    sigma_y = box3(y2, lambda r: row_y(r) * row_y(r)) * inv9 - mu_y * mu_y
    sigma_xy = box3(xy, lambda r: row_x(r) * row_y(r)) * inv9 - mu_x * mu_y

    ssim_n = (2.0 * mu_x * mu_y + C1) * (2.0 * sigma_xy + C2)
    ssim_d = (mu_x * mu_x + mu_y * mu_y + C1) * (sigma_x + sigma_y + C2)

    # ssim_d >= C1*C2 > 0. Approx reciprocal runs on the (idle) EUP; one Newton
    # step brings it to ~2^-24 relative error, well inside the 1e-5 tolerance.
    r = pl.reciprocal(ssim_d, approx=True)
    r = r * (2.0 - ssim_d * r)
    res = (1.0 - ssim_n * r) * 0.5
    o_ref[...] = jnp.clip(res, 0.0, 1.0).astype(o_ref.dtype)


def _vmem_capacity_bytes():
    """Physical VMEM per TensorCore; defensive fallback = v7x's 64 MiB."""
    try:
        info = pltpu.get_tpu_info()
        for name in ("vmem_capacity_bytes", "vmem_size_bytes", "vmem_bytes"):
            v = getattr(info, name, None)
            if v:
                return int(v)
    except Exception:
        pass
    return 64 * 1024 * 1024


def _choose_plane_batch(nc, h, w, budget_bytes):
    """Planes per grid step, sized to the per-generation scoped-VMEM budget."""
    plane_bytes = h * w * 4
    # 2 pipelined inputs x 2 buffers + output x 2 buffers + 1 scratch plane
    # + ~9 live f32 temporaries per plane inside the kernel body.
    live_factor = 16
    b = max(1, int(budget_bytes) // (plane_bytes * live_factor))
    b = min(b, nc)
    if nc >= 2:
        b = min(b, max(1, nc // 2))            # >= 2 grid steps (both v7x TCs busy)
        b0 = b
        while b > 1 and pl.cdiv(nc, b) % 2:    # prefer an even step count on v7x
            b -= 1
        if b <= b0 // 2:                       # ...but never at the cost of tiny blocks
            b = b0
    return max(1, b)


def ssim_pallas(x, y):
    """x, y: (N, C, H, W) float images. Returns (N, C, H, W) float32 SSIM loss map."""
    assert x.shape == y.shape and x.ndim == 4
    N, C, H, W = x.shape
    assert H >= 2 and W >= 2, "ReflectionPad2d(1) requires H, W >= 2"
    NC = N * C

    # Keep bf16/f16 inputs narrow for the HBM read (upcast happens in-kernel).
    if x.dtype in (jnp.bfloat16, jnp.float16):
        in_dtype = x.dtype
    else:
        in_dtype = jnp.float32
    xf = x.reshape(NC, H, W).astype(in_dtype)
    yf = y.reshape(NC, H, W).astype(in_dtype)

    cap = _vmem_capacity_bytes()
    vmem_limit = max(32 * 1024 * 1024, min((cap * 3) // 4, 96 * 1024 * 1024))
    B = _choose_plane_batch(NC, H, W, vmem_limit - 4 * 1024 * 1024)
    # Ragged last block is fine: its padded tail planes are computed on garbage
    # and simply not written back to valid output rows.
    grid = (pl.cdiv(NC, B),)

    out = pl.pallas_call(
        _ssim_kernel,
        out_shape=jax.ShapeDtypeStruct((NC, H, W), jnp.float32),
        grid=grid,
        in_specs=[
            pl.BlockSpec((B, H, W), lambda i: (i, 0, 0)),
            pl.BlockSpec((B, H, W), lambda i: (i, 0, 0)),
        ],
        out_specs=pl.BlockSpec((B, H, W), lambda i: (i, 0, 0)),
        scratch_shapes=[pltpu.VMEM((B, H, W), jnp.float32)],
        compiler_params=pltpu.CompilerParams(
            dimension_semantics=("parallel",),
            vmem_limit_bytes=int(vmem_limit),
        ),
    )(xf, yf)

    return out.reshape(N, C, H, W)


def ssim_reference(x, y):
    """Pure-JAX reference mirroring the PyTorch module exactly."""
    x = x.astype(jnp.float32)
    y = y.astype(jnp.float32)
    xp = jnp.pad(x, ((0, 0), (0, 0), (1, 1), (1, 1)), mode="reflect")
    yp = jnp.pad(y, ((0, 0), (0, 0), (1, 1), (1, 1)), mode="reflect")

    def pool(a):  # 3x3 avg pool, stride 1, valid
        _, _, Hp, Wp = a.shape
        H, W = Hp - 2, Wp - 2
        acc = jnp.zeros(a.shape[:2] + (H, W), jnp.float32)
        for dy in range(3):
            for dx in range(3):
                acc = acc + a[:, :, dy:dy + H, dx:dx + W]
        return acc / 9.0

    mu_x = pool(xp)
    mu_y = pool(yp)
    sigma_x = pool(xp * xp) - mu_x ** 2
    sigma_y = pool(yp * yp) - mu_y ** 2
    sigma_xy = pool(xp * yp) - mu_x * mu_y
    n = (2 * mu_x * mu_y + C1) * (2 * sigma_xy + C2)
    d = (mu_x ** 2 + mu_y ** 2 + C1) * (sigma_x + sigma_y + C2)
    return jnp.clip((1 - n / d) / 2, 0.0, 1.0)


if __name__ == "__main__":
    key = jax.random.PRNGKey(0)
    kx, ky = jax.random.split(key)
    # Small but lane-dense demo shape: W = 128 keeps output stores unmasked
    # (real monodepth planes, e.g. 192x640, are aligned the same way).
    N, C, H, W = 2, 4, 16, 128
    x = jax.random.uniform(kx, (N, C, H, W), dtype=jnp.float32)
    y = jax.random.uniform(ky, (N, C, H, W), dtype=jnp.float32)

    out = ssim_pallas(x, y)
    jax.block_until_ready(out)

    ref = ssim_reference(x, y)
    assert out.shape == (N, C, H, W)
    assert jnp.allclose(out, ref, atol=1e-5, rtol=1e-5), "mismatch vs reference"

    print("KERNEL_OK")
</pallas_src>

<mosaic_0001>
module attributes {stable_mosaic.version = 11 : i64} {
  func.func @_ssim_kernel(%arg0: i32, %arg1: memref<4x16x128xf32, #tpu.memory_space<vmem>>, %arg2: memref<4x16x128xf32, #tpu.memory_space<vmem>>, %arg3: memref<4x16x128xf32, #tpu.memory_space<vmem>>, %arg4: memref<4x16x128xf32, #tpu.memory_space<vmem>>) attributes {dimension_semantics = [#tpu.dimension_semantics<parallel>], iteration_bounds = array<i64: 2>, scalar_prefetch = 0 : i64, scratch_operands = 1 : i64, tpu.core_type = #tpu.core_type<tc>, window_params = [{transform_indices = @transform_0, window_bounds = array<i64: 4, 16, 128>}, {transform_indices = @transform_1, window_bounds = array<i64: 4, 16, 128>}, {transform_indices = @transform_2, window_bounds = array<i64: 4, 16, 128>}]} {
    %c0 = arith.constant 0 : index
    %c0_0 = arith.constant 0 : index
    %c0_1 = arith.constant 0 : index
    %0 = vector.load %arg1[%c0, %c0_0, %c0_1] : memref<4x16x128xf32, #tpu.memory_space<vmem>>, vector<4x16x128xf32>
    %c0_2 = arith.constant 0 : index
    %c0_3 = arith.constant 0 : index
    %c0_4 = arith.constant 0 : index
    %1 = vector.load %arg2[%c0_2, %c0_3, %c0_4] : memref<4x16x128xf32, #tpu.memory_space<vmem>>, vector<4x16x128xf32>
    %2 = arith.mulf %0, %0 : vector<4x16x128xf32>
    %3 = arith.mulf %1, %1 : vector<4x16x128xf32>
    %4 = arith.mulf %0, %1 : vector<4x16x128xf32>
    %c1_i32 = arith.constant 1 : i32
    %5 = tpu.dynamic_rotate %0 by %c1_i32 dim 1 : vector<4x16x128xf32>, i32 -> vector<4x16x128xf32>
    %c15_i32 = arith.constant 15 : i32
    %6 = tpu.dynamic_rotate %0 by %c15_i32 dim 1 : vector<4x16x128xf32>, i32 -> vector<4x16x128xf32>
    %7 = arith.addf %0, %5 : vector<4x16x128xf32>
    %8 = arith.addf %7, %6 : vector<4x16x128xf32>
    %c0_5 = arith.constant 0 : index
    %c0_6 = arith.constant 0 : index
    %c0_7 = arith.constant 0 : index
    %9 = vector.load %arg4[%c0_5, %c0_6, %c0_7] : memref<4x16x128xf32, #tpu.memory_space<vmem>>, vector<4x16x128xf32>
    tpu.vector_store %arg4[%c0_5, %c0_6, %c0_7], %8 {strides = array<i32>} : memref<4x16x128xf32, #tpu.memory_space<vmem>>, vector<4x16x128xf32>,
    %c0_8 = arith.constant 0 : index
    %c0_9 = arith.constant 0 : index
    %c0_10 = arith.constant 0 : index
    %10 = vector.load %arg1[%c0_8, %c0_9, %c0_10] : memref<4x16x128xf32, #tpu.memory_space<vmem>>, vector<4x1x128xf32>
    %c0_11 = arith.constant 0 : index
    %c1 = arith.constant 1 : index
    %c0_12 = arith.constant 0 : index
    %11 = vector.load %arg1[%c0_11, %c1, %c0_12] : memref<4x16x128xf32, #tpu.memory_space<vmem>>, vector<4x1x128xf32>
    %cst = arith.constant 2.000000e+00 : f32
    %12 = vector.broadcast %cst : f32 to vector<4x1x128xf32>
    %13 = arith.mulf %12, %11 : vector<4x1x128xf32>
    %14 = arith.addf %10, %13 : vector<4x1x128xf32>
    %c0_13 = arith.constant 0 : index
    %c0_14 = arith.constant 0 : index
    %c0_15 = arith.constant 0 : index
    %15 = vector.load %arg4[%c0_13, %c0_14, %c0_15] : memref<4x16x128xf32, #tpu.memory_space<vmem>>, vector<4x1x128xf32>
    tpu.vector_store %arg4[%c0_13, %c0_14, %c0_15], %14 {strides = array<i32>} : memref<4x16x128xf32, #tpu.memory_space<vmem>>, vector<4x1x128xf32>,
    %c0_16 = arith.constant 0 : index
    %c15 = arith.constant 15 : index
    %c0_17 = arith.constant 0 : index
    %16 = vector.load %arg1[%c0_16, %c15, %c0_17] : memref<4x16x128xf32, #tpu.memory_space<vmem>>, vector<4x1x128xf32>
    %c0_18 = arith.constant 0 : index
    %c14 = arith.constant 14 : index
    %c0_19 = arith.constant 0 : index
    %17 = vector.load %arg1[%c0_18, %c14, %c0_19] : memref<4x16x128xf32, #tpu.memory_space<vmem>>, vector<4x1x128xf32>
    %cst_20 = arith.constant 2.000000e+00 : f32
    %18 = vector.broadcast %cst_20 : f32 to vector<4x1x128xf32>
    %19 = arith.mulf %18, %17 : vector<4x1x128xf32>
    %20 = arith.addf %16, %19 : vector<4x1x128xf32>
    %c0_21 = arith.constant 0 : index
    %c15_22 = arith.constant 15 : index
    %c0_23 = arith.constant 0 : index
    %21 = vector.load %arg4[%c0_21, %c15_22, %c0_23] : memref<4x16x128xf32, #tpu.memory_space<vmem>>, vector<4x1x128xf32>
    tpu.vector_store %arg4[%c0_21, %c15_22, %c0_23], %20 {strides = array<i32>} : memref<4x16x128xf32, #tpu.memory_space<vmem>>, vector<4x1x128xf32>,
    %c0_24 = arith.constant 0 : index
    %c0_25 = arith.constant 0 : index
    %c0_26 = arith.constant 0 : index
    %22 = vector.load %arg4[%c0_24, %c0_25, %c0_26] : memref<4x16x128xf32, #tpu.memory_space<vmem>>, vector<4x16x128xf32>
    %c1_i32_27 = arith.constant 1 : i32
    %23 = tpu.dynamic_rotate %22 by %c1_i32_27 dim 2 : vector<4x16x128xf32>, i32 -> vector<4x16x128xf32>
    %c127_i32 = arith.constant 127 : i32
    %24 = tpu.dynamic_rotate %22 by %c127_i32 dim 2 : vector<4x16x128xf32>, i32 -> vector<4x16x128xf32>
    %c0_28 = arith.constant 0 : index
    %c0_29 = arith.constant 0 : index
    %c0_30 = arith.constant 0 : index
    %25 = vector.load %arg4[%c0_28, %c0_29, %c0_30] : memref<4x16x128xf32, #tpu.memory_space<vmem>>, vector<4x16x1xf32>
    %c0_31 = arith.constant 0 : index
    %c0_32 = arith.constant 0 : index
    %c1_33 = arith.constant 1 : index
    %26 = vector.load %arg4[%c0_31, %c0_32, %c1_33] : memref<4x16x128xf32, #tpu.memory_space<vmem>>, vector<4x16x1xf32>
    %c0_34 = arith.constant 0 : index
    %c0_35 = arith.constant 0 : index
    %c127 = arith.constant 127 : index
    %27 = vector.load %arg4[%c0_34, %c0_35, %c127] : memref<4x16x128xf32, #tpu.memory_space<vmem>>, vector<4x16x1xf32>
    %c0_36 = arith.constant 0 : index
    %c0_37 = arith.constant 0 : index
    %c126 = arith.constant 126 : index
    %28 = vector.load %arg4[%c0_36, %c0_37, %c126] : memref<4x16x128xf32, #tpu.memory_space<vmem>>, vector<4x16x1xf32>
    %29 = arith.addf %22, %23 : vector<4x16x128xf32>
    %30 = arith.addf %29, %24 : vector<4x16x128xf32>
    %c0_38 = arith.constant 0 : index
    %c0_39 = arith.constant 0 : index
    %c0_40 = arith.constant 0 : index
    %31 = vector.load %arg4[%c0_38, %c0_39, %c0_40] : memref<4x16x128xf32, #tpu.memory_space<vmem>>, vector<4x16x128xf32>
    tpu.vector_store %arg4[%c0_38, %c0_39, %c0_40], %30 {strides = array<i32>} : memref<4x16x128xf32, #tpu.memory_space<vmem>>, vector<4x16x128xf32>,
    %cst_41 = arith.constant 2.000000e+00 : f32
    %32 = vector.broadcast %cst_41 : f32 to vector<4x16x1xf32>
    %33 = arith.mulf %32, %26 : vector<4x16x1xf32>
    %34 = arith.addf %25, %33 : vector<4x16x1xf32>
    %c0_42 = arith.constant 0 : index
    %c0_43 = arith.constant 0 : index
    %c0_44 = arith.constant 0 : index
    %35 = vector.load %arg4[%c0_42, %c0_43, %c0_44] : memref<4x16x128xf32, #tpu.memory_space<vmem>>, vector<4x16x1xf32>
    tpu.vector_store %arg4[%c0_42, %c0_43, %c0_44], %34 {strides = array<i32>} : memref<4x16x128xf32, #tpu.memory_space<vmem>>, vector<4x16x1xf32>,
    %cst_45 = arith.constant 2.000000e+00 : f32
    %36 = vector.broadcast %cst_45 : f32 to vector<4x16x1xf32>
    %37 = arith.mulf %36, %28 : vector<4x16x1xf32>
    %38 = arith.addf %27, %37 : vector<4x16x1xf32>
    %c0_46 = arith.constant 0 : index
    %c0_47 = arith.constant 0 : index
    %c127_48 = arith.constant 127 : index
    %39 = vector.load %arg4[%c0_46, %c0_47, %c127_48] : memref<4x16x128xf32, #tpu.memory_space<vmem>>, vector<4x16x1xf32>
    tpu.vector_store %arg4[%c0_46, %c0_47, %c127_48], %38 {strides = array<i32>} : memref<4x16x128xf32, #tpu.memory_space<vmem>>, vector<4x16x1xf32>,
    %c0_49 = arith.constant 0 : index
    %c0_50 = arith.constant 0 : index
    %c0_51 = arith.constant 0 : index
    %40 = vector.load %arg4[%c0_49, %c0_50, %c0_51] : memref<4x16x128xf32, #tpu.memory_space<vmem>>, vector<4x16x128xf32>
    %cst_52 = arith.constant 0.111111112 : f32
    %41 = vector.broadcast %cst_52 : f32 to vector<4x16x128xf32>
    %42 = arith.mulf %40, %41 : vector<4x16x128xf32>
    %c1_i32_53 = arith.constant 1 : i32
    %43 = tpu.dynamic_rotate %1 by %c1_i32_53 dim 1 : vector<4x16x128xf32>, i32 -> vector<4x16x128xf32>
    %c15_i32_54 = arith.constant 15 : i32
    %44 = tpu.dynamic_rotate %1 by %c15_i32_54 dim 1 : vector<4x16x128xf32>, i32 -> vector<4x16x128xf32>
    %45 = arith.addf %1, %43 : vector<4x16x128xf32>
    %46 = arith.addf %45, %44 : vector<4x16x128xf32>
    %c0_55 = arith.constant 0 : index
    %c0_56 = arith.constant 0 : index
    %c0_57 = arith.constant 0 : index
    %47 = vector.load %arg4[%c0_55, %c0_56, %c0_57] : memref<4x16x128xf32, #tpu.memory_space<vmem>>, vector<4x16x128xf32>
    tpu.vector_store %arg4[%c0_55, %c0_56, %c0_57], %46 {strides = array<i32>} : memref<4x16x128xf32, #tpu.memory_space<vmem>>, vector<4x16x128xf32>,
    %c0_58 = arith.constant 0 : index
    %c0_59 = arith.constant 0 : index
    %c0_60 = arith.constant 0 : index
    %48 = vector.load %arg2[%c0_58, %c0_59, %c0_60] : memref<4x16x128xf32, #tpu.memory_space<vmem>>, vector<4x1x128xf32>
    %c0_61 = arith.constant 0 : index
    %c1_62 = arith.constant 1 : index
    %c0_63 = arith.constant 0 : index
    %49 = vector.load %arg2[%c0_61, %c1_62, %c0_63] : memref<4x16x128xf32, #tpu.memory_space<vmem>>, vector<4x1x128xf32>
    %cst_64 = arith.constant 2.000000e+00 : f32
    %50 = vector.broadcast %cst_64 : f32 to vector<4x1x128xf32>
    %51 = arith.mulf %50, %49 : vector<4x1x128xf32>
    %52 = arith.addf %48, %51 : vector<4x1x128xf32>
    %c0_65 = arith.constant 0 : index
    %c0_66 = arith.constant 0 : index
    %c0_67 = arith.constant 0 : index
    %53 = vector.load %arg4[%c0_65, %c0_66, %c0_67] : memref<4x16x128xf32, #tpu.memory_space<vmem>>, vector<4x1x128xf32>
    tpu.vector_store %arg4[%c0_65, %c0_66, %c0_67], %52 {strides = array<i32>} : memref<4x16x128xf32, #tpu.memory_space<vmem>>, vector<4x1x128xf32>,
    %c0_68 = arith.constant 0 : index
    %c15_69 = arith.constant 15 : index
    %c0_70 = arith.constant 0 : index
    %54 = vector.load %arg2[%c0_68, %c15_69, %c0_70] : memref<4x16x128xf32, #tpu.memory_space<vmem>>, vector<4x1x128xf32>
    %c0_71 = arith.constant 0 : index
    %c14_72 = arith.constant 14 : index
    %c0_73 = arith.constant 0 : index
    %55 = vector.load %arg2[%c0_71, %c14_72, %c0_73] : memref<4x16x128xf32, #tpu.memory_space<vmem>>, vector<4x1x128xf32>
    %cst_74 = arith.constant 2.000000e+00 : f32
    %56 = vector.broadcast %cst_74 : f32 to vector<4x1x128xf32>
    %57 = arith.mulf %56, %55 : vector<4x1x128xf32>
    %58 = arith.addf %54, %57 : vector<4x1x128xf32>
    %c0_75 = arith.constant 0 : index
    %c15_76 = arith.constant 15 : index
    %c0_77 = arith.constant 0 : index
    %59 = vector.load %arg4[%c0_75, %c15_76, %c0_77] : memref<4x16x128xf32, #tpu.memory_space<vmem>>, vector<4x1x128xf32>
    tpu.vector_store %arg4[%c0_75, %c15_76, %c0_77], %58 {strides = array<i32>} : memref<4x16x128xf32, #tpu.memory_space<vmem>>, vector<4x1x128xf32>,
    %c0_78 = arith.constant 0 : index
    %c0_79 = arith.constant 0 : index
    %c0_80 = arith.constant 0 : index
    %60 = vector.load %arg4[%c0_78, %c0_79, %c0_80] : memref<4x16x128xf32, #tpu.memory_space<vmem>>, vector<4x16x128xf32>
    %c1_i32_81 = arith.constant 1 : i32
    %61 = tpu.dynamic_rotate %60 by %c1_i32_81 dim 2 : vector<4x16x128xf32>, i32 -> vector<4x16x128xf32>
    %c127_i32_82 = arith.constant 127 : i32
    %62 = tpu.dynamic_rotate %60 by %c127_i32_82 dim 2 : vector<4x16x128xf32>, i32 -> vector<4x16x128xf32>
    %c0_83 = arith.constant 0 : index
    %c0_84 = arith.constant 0 : index
    %c0_85 = arith.constant 0 : index
    %63 = vector.load %arg4[%c0_83, %c0_84, %c0_85] : memref<4x16x128xf32, #tpu.memory_space<vmem>>, vector<4x16x1xf32>
    %c0_86 = arith.constant 0 : index
    %c0_87 = arith.constant 0 : index
    %c1_88 = arith.constant 1 : index
    %64 = vector.load %arg4[%c0_86, %c0_87, %c1_88] : memref<4x16x128xf32, #tpu.memory_space<vmem>>, vector<4x16x1xf32>
    %c0_89 = arith.constant 0 : index
    %c0_90 = arith.constant 0 : index
    %c127_91 = arith.constant 127 : index
    %65 = vector.load %arg4[%c0_89, %c0_90, %c127_91] : memref<4x16x128xf32, #tpu.memory_space<vmem>>, vector<4x16x1xf32>
    %c0_92 = arith.constant 0 : index
    %c0_93 = arith.constant 0 : index
    %c126_94 = arith.constant 126 : index
    %66 = vector.load %arg4[%c0_92, %c0_93, %c126_94] : memref<4x16x128xf32, #tpu.memory_space<vmem>>, vector<4x16x1xf32>
    %67 = arith.addf %60, %61 : vector<4x16x128xf32>
    %68 = arith.addf %67, %62 : vector<4x16x128xf32>
    %c0_95 = arith.constant 0 : index
    %c0_96 = arith.constant 0 : index
    %c0_97 = arith.constant 0 : index
    %69 = vector.load %arg4[%c0_95, %c0_96, %c0_97] : memref<4x16x128xf32, #tpu.memory_space<vmem>>, vector<4x16x128xf32>
    tpu.vector_store %arg4[%c0_95, %c0_96, %c0_97], %68 {strides = array<i32>} : memref<4x16x128xf32, #tpu.memory_space<vmem>>, vector<4x16x128xf32>,
    %cst_98 = arith.constant 2.000000e+00 : f32
    %70 = vector.broadcast %cst_98 : f32 to vector<4x16x1xf32>
    %71 = arith.mulf %70, %64 : vector<4x16x1xf32>
    %72 = arith.addf %63, %71 : vector<4x16x1xf32>
    %c0_99 = arith.constant 0 : index
    %c0_100 = arith.constant 0 : index
    %c0_101 = arith.constant 0 : index
    %73 = vector.load %arg4[%c0_99, %c0_100, %c0_101] : memref<4x16x128xf32, #tpu.memory_space<vmem>>, vector<4x16x1xf32>
    tpu.vector_store %arg4[%c0_99, %c0_100, %c0_101], %72 {strides = array<i32>} : memref<4x16x128xf32, #tpu.memory_space<vmem>>, vector<4x16x1xf32>,
    %cst_102 = arith.constant 2.000000e+00 : f32
    %74 = vector.broadcast %cst_102 : f32 to vector<4x16x1xf32>
    %75 = arith.mulf %74, %66 : vector<4x16x1xf32>
    %76 = arith.addf %65, %75 : vector<4x16x1xf32>
    %c0_103 = arith.constant 0 : index
    %c0_104 = arith.constant 0 : index
    %c127_105 = arith.constant 127 : index
    %77 = vector.load %arg4[%c0_103, %c0_104, %c127_105] : memref<4x16x128xf32, #tpu.memory_space<vmem>>, vector<4x16x1xf32>
    tpu.vector_store %arg4[%c0_103, %c0_104, %c127_105], %76 {strides = array<i32>} : memref<4x16x128xf32, #tpu.memory_space<vmem>>, vector<4x16x1xf32>,
    %c0_106 = arith.constant 0 : index
    %c0_107 = arith.constant 0 : index
    %c0_108 = arith.constant 0 : index
    %78 = vector.load %arg4[%c0_106, %c0_107, %c0_108] : memref<4x16x128xf32, #tpu.memory_space<vmem>>, vector<4x16x128xf32>
    %cst_109 = arith.constant 0.111111112 : f32
    %79 = vector.broadcast %cst_109 : f32 to vector<4x16x128xf32>
    %80 = arith.mulf %78, %79 : vector<4x16x128xf32>
    %c1_i32_110 = arith.constant 1 : i32
    %81 = tpu.dynamic_rotate %2 by %c1_i32_110 dim 1 : vector<4x16x128xf32>, i32 -> vector<4x16x128xf32>
    %c15_i32_111 = arith.constant 15 : i32
    %82 = tpu.dynamic_rotate %2 by %c15_i32_111 dim 1 : vector<4x16x128xf32>, i32 -> vector<4x16x128xf32>
    %83 = arith.addf %2, %81 : vector<4x16x128xf32>
    %84 = arith.addf %83, %82 : vector<4x16x128xf32>
    %c0_112 = arith.constant 0 : index
    %c0_113 = arith.constant 0 : index
    %c0_114 = arith.constant 0 : index
    %85 = vector.load %arg4[%c0_112, %c0_113, %c0_114] : memref<4x16x128xf32, #tpu.memory_space<vmem>>, vector<4x16x128xf32>
    tpu.vector_store %arg4[%c0_112, %c0_113, %c0_114], %84 {strides = array<i32>} : memref<4x16x128xf32, #tpu.memory_space<vmem>>, vector<4x16x128xf32>,
    %c0_115 = arith.constant 0 : index
    %c0_116 = arith.constant 0 : index
    %c0_117 = arith.constant 0 : index
    %86 = vector.load %arg1[%c0_115, %c0_116, %c0_117] : memref<4x16x128xf32, #tpu.memory_space<vmem>>, vector<4x1x128xf32>
    %c0_118 = arith.constant 0 : index
    %c0_119 = arith.constant 0 : index
    %c0_120 = arith.constant 0 : index
    %87 = vector.load %arg1[%c0_118, %c0_119, %c0_120] : memref<4x16x128xf32, #tpu.memory_space<vmem>>, vector<4x1x128xf32>
    %88 = arith.mulf %86, %87 : vector<4x1x128xf32>
    %c0_121 = arith.constant 0 : index
    %c1_122 = arith.constant 1 : index
    %c0_123 = arith.constant 0 : index
    %89 = vector.load %arg1[%c0_121, %c1_122, %c0_123] : memref<4x16x128xf32, #tpu.memory_space<vmem>>, vector<4x1x128xf32>
    %c0_124 = arith.constant 0 : index
    %c1_125 = arith.constant 1 : index
    %c0_126 = arith.constant 0 : index
    %90 = vector.load %arg1[%c0_124, %c1_125, %c0_126] : memref<4x16x128xf32, #tpu.memory_space<vmem>>, vector<4x1x128xf32>
    %91 = arith.mulf %89, %90 : vector<4x1x128xf32>
    %cst_127 = arith.constant 2.000000e+00 : f32
    %92 = vector.broadcast %cst_127 : f32 to vector<4x1x128xf32>
    %93 = arith.mulf %92, %91 : vector<4x1x128xf32>
    %94 = arith.addf %88, %93 : vector<4x1x128xf32>
    %c0_128 = arith.constant 0 : index
    %c0_129 = arith.constant 0 : index
    %c0_130 = arith.constant 0 : index
    %95 = vector.load %arg4[%c0_128, %c0_129, %c0_130] : memref<4x16x128xf32, #tpu.memory_space<vmem>>, vector<4x1x128xf32>
    tpu.vector_store %arg4[%c0_128, %c0_129, %c0_130], %94 {strides = array<i32>} : memref<4x16x128xf32, #tpu.memory_space<vmem>>, vector<4x1x128xf32>,
    %c0_131 = arith.constant 0 : index
    %c15_132 = arith.constant 15 : index
    %c0_133 = arith.constant 0 : index
    %96 = vector.load %arg1[%c0_131, %c15_132, %c0_133] : memref<4x16x128xf32, #tpu.memory_space<vmem>>, vector<4x1x128xf32>
    %c0_134 = arith.constant 0 : index
    %c15_135 = arith.constant 15 : index
    %c0_136 = arith.constant 0 : index
    %97 = vector.load %arg1[%c0_134, %c15_135, %c0_136] : memref<4x16x128xf32, #tpu.memory_space<vmem>>, vector<4x1x128xf32>
    %98 = arith.mulf %96, %97 : vector<4x1x128xf32>
    %c0_137 = arith.constant 0 : index
    %c14_138 = arith.constant 14 : index
    %c0_139 = arith.constant 0 : index
    %99 = vector.load %arg1[%c0_137, %c14_138, %c0_139] : memref<4x16x128xf32, #tpu.memory_space<vmem>>, vector<4x1x128xf32>
    %c0_140 = arith.constant 0 : index
    %c14_141 = arith.constant 14 : index
    %c0_142 = arith.constant 0 : index
    %100 = vector.load %arg1[%c0_140, %c14_141, %c0_142] : memref<4x16x128xf32, #tpu.memory_space<vmem>>, vector<4x1x128xf32>
    %101 = arith.mulf %99, %100 : vector<4x1x128xf32>
    %cst_143 = arith.constant 2.000000e+00 : f32
    %102 = vector.broadcast %cst_143 : f32 to vector<4x1x128xf32>
    %103 = arith.mulf %102, %101 : vector<4x1x128xf32>
    %104 = arith.addf %98, %103 : vector<4x1x128xf32>
    %c0_144 = arith.constant 0 : index
    %c15_145 = arith.constant 15 : index
    %c0_146 = arith.constant 0 : index
    %105 = vector.load %arg4[%c0_144, %c15_145, %c0_146] : memref<4x16x128xf32, #tpu.memory_space<vmem>>, vector<4x1x128xf32>
    tpu.vector_store %arg4[%c0_144, %c15_145, %c0_146], %104 {strides = array<i32>} : memref<4x16x128xf32, #tpu.memory_space<vmem>>, vector<4x1x128xf32>,
    %c0_147 = arith.constant 0 : index
    %c0_148 = arith.constant 0 : index
    %c0_149 = arith.constant 0 : index
    %106 = vector.load %arg4[%c0_147, %c0_148, %c0_149] : memref<4x16x128xf32, #tpu.memory_space<vmem>>, vector<4x16x128xf32>
    %c1_i32_150 = arith.constant 1 : i32
    %107 = tpu.dynamic_rotate %106 by %c1_i32_150 dim 2 : vector<4x16x128xf32>, i32 -> vector<4x16x128xf32>
    %c127_i32_151 = arith.constant 127 : i32
    %108 = tpu.dynamic_rotate %106 by %c127_i32_151 dim 2 : vector<4x16x128xf32>, i32 -> vector<4x16x128xf32>
    %c0_152 = arith.constant 0 : index
    %c0_153 = arith.constant 0 : index
    %c0_154 = arith.constant 0 : index
    %109 = vector.load %arg4[%c0_152, %c0_153, %c0_154] : memref<4x16x128xf32, #tpu.memory_space<vmem>>, vector<4x16x1xf32>
    %c0_155 = arith.constant 0 : index
    %c0_156 = arith.constant 0 : index
    %c1_157 = arith.constant 1 : index
    %110 = vector.load %arg4[%c0_155, %c0_156, %c1_157] : memref<4x16x128xf32, #tpu.memory_space<vmem>>, vector<4x16x1xf32>
    %c0_158 = arith.constant 0 : index
    %c0_159 = arith.constant 0 : index
    %c127_160 = arith.constant 127 : index
    %111 = vector.load %arg4[%c0_158, %c0_159, %c127_160] : memref<4x16x128xf32, #tpu.memory_space<vmem>>, vector<4x16x1xf32>
    %c0_161 = arith.constant 0 : index
    %c0_162 = arith.constant 0 : index
    %c126_163 = arith.constant 126 : index
    %112 = vector.load %arg4[%c0_161, %c0_162, %c126_163] : memref<4x16x128xf32, #tpu.memory_space<vmem>>, vector<4x16x1xf32>
    %113 = arith.addf %106, %107 : vector<4x16x128xf32>
    %114 = arith.addf %113, %108 : vector<4x16x128xf32>
    %c0_164 = arith.constant 0 : index
    %c0_165 = arith.constant 0 : index
    %c0_166 = arith.constant 0 : index
    %115 = vector.load %arg4[%c0_164, %c0_165, %c0_166] : memref<4x16x128xf32, #tpu.memory_space<vmem>>, vector<4x16x128xf32>
    tpu.vector_store %arg4[%c0_164, %c0_165, %c0_166], %114 {strides = array<i32>} : memref<4x16x128xf32, #tpu.memory_space<vmem>>, vector<4x16x128xf32>,
    %cst_167 = arith.constant 2.000000e+00 : f32
    %116 = vector.broadcast %cst_167 : f32 to vector<4x16x1xf32>
    %117 = arith.mulf %116, %110 : vector<4x16x1xf32>
    %118 = arith.addf %109, %117 : vector<4x16x1xf32>
    %c0_168 = arith.constant 0 : index
    %c0_169 = arith.constant 0 : index
    %c0_170 = arith.constant 0 : index
    %119 = vector.load %arg4[%c0_168, %c0_169, %c0_170] : memref<4x16x128xf32, #tpu.memory_space<vmem>>, vector<4x16x1xf32>
    tpu.vector_store %arg4[%c0_168, %c0_169, %c0_170], %118 {strides = array<i32>} : memref<4x16x128xf32, #tpu.memory_space<vmem>>, vector<4x16x1xf32>,
    %cst_171 = arith.constant 2.000000e+00 : f32
    %120 = vector.broadcast %cst_171 : f32 to vector<4x16x1xf32>
    %121 = arith.mulf %120, %112 : vector<4x16x1xf32>
    %122 = arith.addf %111, %121 : vector<4x16x1xf32>
    %c0_172 = arith.constant 0 : index
    %c0_173 = arith.constant 0 : index
    %c127_174 = arith.constant 127 : index
    %123 = vector.load %arg4[%c0_172, %c0_173, %c127_174] : memref<4x16x128xf32, #tpu.memory_space<vmem>>, vector<4x16x1xf32>
    tpu.vector_store %arg4[%c0_172, %c0_173, %c127_174], %122 {strides = array<i32>} : memref<4x16x128xf32, #tpu.memory_space<vmem>>, vector<4x16x1xf32>,
    %c0_175 = arith.constant 0 : index
    %c0_176 = arith.constant 0 : index
    %c0_177 = arith.constant 0 : index
    %124 = vector.load %arg4[%c0_175, %c0_176, %c0_177] : memref<4x16x128xf32, #tpu.memory_space<vmem>>, vector<4x16x128xf32>
    %cst_178 = arith.constant 0.111111112 : f32
    %125 = vector.broadcast %cst_178 : f32 to vector<4x16x128xf32>
    %126 = arith.mulf %124, %125 : vector<4x16x128xf32>
    %127 = arith.mulf %42, %42 : vector<4x16x128xf32>
    %128 = arith.subf %126, %127 : vector<4x16x128xf32>
    %c1_i32_179 = arith.constant 1 : i32
    %129 = tpu.dynamic_rotate %3 by %c1_i32_179 dim 1 : vector<4x16x128xf32>, i32 -> vector<4x16x128xf32>
    %c15_i32_180 = arith.constant 15 : i32
    %130 = tpu.dynamic_rotate %3 by %c15_i32_180 dim 1 : vector<4x16x128xf32>, i32 -> vector<4x16x128xf32>
    %131 = arith.addf %3, %129 : vector<4x16x128xf32>
    %132 = arith.addf %131, %130 : vector<4x16x128xf32>
    %c0_181 = arith.constant 0 : index
    %c0_182 = arith.constant 0 : index
    %c0_183 = arith.constant 0 : index
    %133 = vector.load %arg4[%c0_181, %c0_182, %c0_183] : memref<4x16x128xf32, #tpu.memory_space<vmem>>, vector<4x16x128xf32>
    tpu.vector_store %arg4[%c0_181, %c0_182, %c0_183], %132 {strides = array<i32>} : memref<4x16x128xf32, #tpu.memory_space<vmem>>, vector<4x16x128xf32>,
    %c0_184 = arith.constant 0 : index
    %c0_185 = arith.constant 0 : index
    %c0_186 = arith.constant 0 : index
    %134 = vector.load %arg2[%c0_184, %c0_185, %c0_186] : memref<4x16x128xf32, #tpu.memory_space<vmem>>, vector<4x1x128xf32>
    %c0_187 = arith.constant 0 : index
    %c0_188 = arith.constant 0 : index
    %c0_189 = arith.constant 0 : index
    %135 = vector.load %arg2[%c0_187, %c0_188, %c0_189] : memref<4x16x128xf32, #tpu.memory_space<vmem>>, vector<4x1x128xf32>
    %136 = arith.mulf %134, %135 : vector<4x1x128xf32>
    %c0_190 = arith.constant 0 : index
    %c1_191 = arith.constant 1 : index
    %c0_192 = arith.constant 0 : index
    %137 = vector.load %arg2[%c0_190, %c1_191, %c0_192] : memref<4x16x128xf32, #tpu.memory_space<vmem>>, vector<4x1x128xf32>
    %c0_193 = arith.constant 0 : index
    %c1_194 = arith.constant 1 : index
    %c0_195 = arith.constant 0 : index
    %138 = vector.load %arg2[%c0_193, %c1_194, %c0_195] : memref<4x16x128xf32, #tpu.memory_space<vmem>>, vector<4x1x128xf32>
    %139 = arith.mulf %137, %138 : vector<4x1x128xf32>
    %cst_196 = arith.constant 2.000000e+00 : f32
    %140 = vector.broadcast %cst_196 : f32 to vector<4x1x128xf32>
    %141 = arith.mulf %140, %139 : vector<4x1x128xf32>
    %142 = arith.addf %136, %141 : vector<4x1x128xf32>
    %c0_197 = arith.constant 0 : index
    %c0_198 = arith.constant 0 : index
    %c0_199 = arith.constant 0 : index
    %143 = vector.load %arg4[%c0_197, %c0_198, %c0_199] : memref<4x16x128xf32, #tpu.memory_space<vmem>>, vector<4x1x128xf32>
    tpu.vector_store %arg4[%c0_197, %c0_198, %c0_199], %142 {strides = array<i32>} : memref<4x16x128xf32, #tpu.memory_space<vmem>>, vector<4x1x128xf32>,
    %c0_200 = arith.constant 0 : index
    %c15_201 = arith.constant 15 : index
    %c0_202 = arith.constant 0 : index
    %144 = vector.load %arg2[%c0_200, %c15_201, %c0_202] : memref<4x16x128xf32, #tpu.memory_space<vmem>>, vector<4x1x128xf32>
    %c0_203 = arith.constant 0 : index
    %c15_204 = arith.constant 15 : index
    %c0_205 = arith.constant 0 : index
    %145 = vector.load %arg2[%c0_203, %c15_204, %c0_205] : memref<4x16x128xf32, #tpu.memory_space<vmem>>, vector<4x1x128xf32>
    %146 = arith.mulf %144, %145 : vector<4x1x128xf32>
    %c0_206 = arith.constant 0 : index
    %c14_207 = arith.constant 14 : index
    %c0_208 = arith.constant 0 : index
    %147 = vector.load %arg2[%c0_206, %c14_207, %c0_208] : memref<4x16x128xf32, #tpu.memory_space<vmem>>, vector<4x1x128xf32>
    %c0_209 = arith.constant 0 : index
    %c14_210 = arith.constant 14 : index
    %c0_211 = arith.constant 0 : index
    %148 = vector.load %arg2[%c0_209, %c14_210, %c0_211] : memref<4x16x128xf32, #tpu.memory_space<vmem>>, vector<4x1x128xf32>
    %149 = arith.mulf %147, %148 : vector<4x1x128xf32>
    %cst_212 = arith.constant 2.000000e+00 : f32
    %150 = vector.broadcast %cst_212 : f32 to vector<4x1x128xf32>
    %151 = arith.mulf %150, %149 : vector<4x1x128xf32>
    %152 = arith.addf %146, %151 : vector<4x1x128xf32>
    %c0_213 = arith.constant 0 : index
    %c15_214 = arith.constant 15 : index
    %c0_215 = arith.constant 0 : index
    %153 = vector.load %arg4[%c0_213, %c15_214, %c0_215] : memref<4x16x128xf32, #tpu.memory_space<vmem>>, vector<4x1x128xf32>
    tpu.vector_store %arg4[%c0_213, %c15_214, %c0_215], %152 {strides = array<i32>} : memref<4x16x128xf32, #tpu.memory_space<vmem>>, vector<4x1x128xf32>,
    %c0_216 = arith.constant 0 : index
    %c0_217 = arith.constant 0 : index
    %c0_218 = arith.constant 0 : index
    %154 = vector.load %arg4[%c0_216, %c0_217, %c0_218] : memref<4x16x128xf32, #tpu.memory_space<vmem>>, vector<4x16x128xf32>
    %c1_i32_219 = arith.constant 1 : i32
    %155 = tpu.dynamic_rotate %154 by %c1_i32_219 dim 2 : vector<4x16x128xf32>, i32 -> vector<4x16x128xf32>
    %c127_i32_220 = arith.constant 127 : i32
    %156 = tpu.dynamic_rotate %154 by %c127_i32_220 dim 2 : vector<4x16x128xf32>, i32 -> vector<4x16x128xf32>
    %c0_221 = arith.constant 0 : index
    %c0_222 = arith.constant 0 : index
    %c0_223 = arith.constant 0 : index
    %157 = vector.load %arg4[%c0_221, %c0_222, %c0_223] : memref<4x16x128xf32, #tpu.memory_space<vmem>>, vector<4x16x1xf32>
    %c0_224 = arith.constant 0 : index
    %c0_225 = arith.constant 0 : index
    %c1_226 = arith.constant 1 : index
    %158 = vector.load %arg4[%c0_224, %c0_225, %c1_226] : memref<4x16x128xf32, #tpu.memory_space<vmem>>, vector<4x16x1xf32>
    %c0_227 = arith.constant 0 : index
    %c0_228 = arith.constant 0 : index
    %c127_229 = arith.constant 127 : index
    %159 = vector.load %arg4[%c0_227, %c0_228, %c127_229] : memref<4x16x128xf32, #tpu.memory_space<vmem>>, vector<4x16x1xf32>
    %c0_230 = arith.constant 0 : index
    %c0_231 = arith.constant 0 : index
    %c126_232 = arith.constant 126 : index
    %160 = vector.load %arg4[%c0_230, %c0_231, %c126_232] : memref<4x16x128xf32, #tpu.memory_space<vmem>>, vector<4x16x1xf32>
    %161 = arith.addf %154, %155 : vector<4x16x128xf32>
    %162 = arith.addf %161, %156 : vector<4x16x128xf32>
    %c0_233 = arith.constant 0 : index
    %c0_234 = arith.constant 0 : index
    %c0_235 = arith.constant 0 : index
    %163 = vector.load %arg4[%c0_233, %c0_234, %c0_235] : memref<4x16x128xf32, #tpu.memory_space<vmem>>, vector<4x16x128xf32>
    tpu.vector_store %arg4[%c0_233, %c0_234, %c0_235], %162 {strides = array<i32>} : memref<4x16x128xf32, #tpu.memory_space<vmem>>, vector<4x16x128xf32>,
    %cst_236 = arith.constant 2.000000e+00 : f32
    %164 = vector.broadcast %cst_236 : f32 to vector<4x16x1xf32>
    %165 = arith.mulf %164, %158 : vector<4x16x1xf32>
    %166 = arith.addf %157, %165 : vector<4x16x1xf32>
    %c0_237 = arith.constant 0 : index
    %c0_238 = arith.constant 0 : index
    %c0_239 = arith.constant 0 : index
    %167 = vector.load %arg4[%c0_237, %c0_238, %c0_239] : memref<4x16x128xf32, #tpu.memory_space<vmem>>, vector<4x16x1xf32>
    tpu.vector_store %arg4[%c0_237, %c0_238, %c0_239], %166 {strides = array<i32>} : memref<4x16x128xf32, #tpu.memory_space<vmem>>, vector<4x16x1xf32>,
    %cst_240 = arith.constant 2.000000e+00 : f32
    %168 = vector.broadcast %cst_240 : f32 to vector<4x16x1xf32>
    %169 = arith.mulf %168, %160 : vector<4x16x1xf32>
    %170 = arith.addf %159, %169 : vector<4x16x1xf32>
    %c0_241 = arith.constant 0 : index
    %c0_242 = arith.constant 0 : index
    %c127_243 = arith.constant 127 : index
    %171 = vector.load %arg4[%c0_241, %c0_242, %c127_243] : memref<4x16x128xf32, #tpu.memory_space<vmem>>, vector<4x16x1xf32>
    tpu.vector_store %arg4[%c0_241, %c0_242, %c127_243], %170 {strides = array<i32>} : memref<4x16x128xf32, #tpu.memory_space<vmem>>, vector<4x16x1xf32>,
    %c0_244 = arith.constant 0 : index
    %c0_245 = arith.constant 0 : index
    %c0_246 = arith.constant 0 : index
    %172 = vector.load %arg4[%c0_244, %c0_245, %c0_246] : memref<4x16x128xf32, #tpu.memory_space<vmem>>, vector<4x16x128xf32>
    %cst_247 = arith.constant 0.111111112 : f32
    %173 = vector.broadcast %cst_247 : f32 to vector<4x16x128xf32>
    %174 = arith.mulf %172, %173 : vector<4x16x128xf32>
    %175 = arith.mulf %80, %80 : vector<4x16x128xf32>
    %176 = arith.subf %174, %175 : vector<4x16x128xf32>
    %c1_i32_248 = arith.constant 1 : i32
    %177 = tpu.dynamic_rotate %4 by %c1_i32_248 dim 1 : vector<4x16x128xf32>, i32 -> vector<4x16x128xf32>
    %c15_i32_249 = arith.constant 15 : i32
    %178 = tpu.dynamic_rotate %4 by %c15_i32_249 dim 1 : vector<4x16x128xf32>, i32 -> vector<4x16x128xf32>
    %179 = arith.addf %4, %177 : vector<4x16x128xf32>
    %180 = arith.addf %179, %178 : vector<4x16x128xf32>
    %c0_250 = arith.constant 0 : index
    %c0_251 = arith.constant 0 : index
    %c0_252 = arith.constant 0 : index
    %181 = vector.load %arg4[%c0_250, %c0_251, %c0_252] : memref<4x16x128xf32, #tpu.memory_space<vmem>>, vector<4x16x128xf32>
    tpu.vector_store %arg4[%c0_250, %c0_251, %c0_252], %180 {strides = array<i32>} : memref<4x16x128xf32, #tpu.memory_space<vmem>>, vector<4x16x128xf32>,
    %c0_253 = arith.constant 0 : index
    %c0_254 = arith.constant 0 : index
    %c0_255 = arith.constant 0 : index
    %182 = vector.load %arg1[%c0_253, %c0_254, %c0_255] : memref<4x16x128xf32, #tpu.memory_space<vmem>>, vector<4x1x128xf32>
    %c0_256 = arith.constant 0 : index
    %c0_257 = arith.constant 0 : index
    %c0_258 = arith.constant 0 : index
    %183 = vector.load %arg2[%c0_256, %c0_257, %c0_258] : memref<4x16x128xf32, #tpu.memory_space<vmem>>, vector<4x1x128xf32>
    %184 = arith.mulf %182, %183 : vector<4x1x128xf32>
    %c0_259 = arith.constant 0 : index
    %c1_260 = arith.constant 1 : index
    %c0_261 = arith.constant 0 : index
    %185 = vector.load %arg1[%c0_259, %c1_260, %c0_261] : memref<4x16x128xf32, #tpu.memory_space<vmem>>, vector<4x1x128xf32>
    %c0_262 = arith.constant 0 : index
    %c1_263 = arith.constant 1 : index
    %c0_264 = arith.constant 0 : index
    %186 = vector.load %arg2[%c0_262, %c1_263, %c0_264] : memref<4x16x128xf32, #tpu.memory_space<vmem>>, vector<4x1x128xf32>
    %187 = arith.mulf %185, %186 : vector<4x1x128xf32>
    %cst_265 = arith.constant 2.000000e+00 : f32
    %188 = vector.broadcast %cst_265 : f32 to vector<4x1x128xf32>
    %189 = arith.mulf %188, %187 : vector<4x1x128xf32>
    %190 = arith.addf %184, %189 : vector<4x1x128xf32>
    %c0_266 = arith.constant 0 : index
    %c0_267 = arith.constant 0 : index
    %c0_268 = arith.constant 0 : index
    %191 = vector.load %arg4[%c0_266, %c0_267, %c0_268] : memref<4x16x128xf32, #tpu.memory_space<vmem>>, vector<4x1x128xf32>
    tpu.vector_store %arg4[%c0_266, %c0_267, %c0_268], %190 {strides = array<i32>} : memref<4x16x128xf32, #tpu.memory_space<vmem>>, vector<4x1x128xf32>,
    %c0_269 = arith.constant 0 : index
    %c15_270 = arith.constant 15 : index
    %c0_271 = arith.constant 0 : index
    %192 = vector.load %arg1[%c0_269, %c15_270, %c0_271] : memref<4x16x128xf32, #tpu.memory_space<vmem>>, vector<4x1x128xf32>
    %c0_272 = arith.constant 0 : index
    %c15_273 = arith.constant 15 : index
    %c0_274 = arith.constant 0 : index
    %193 = vector.load %arg2[%c0_272, %c15_273, %c0_274] : memref<4x16x128xf32, #tpu.memory_space<vmem>>, vector<4x1x128xf32>
    %194 = arith.mulf %192, %193 : vector<4x1x128xf32>
    %c0_275 = arith.constant 0 : index
    %c14_276 = arith.constant 14 : index
    %c0_277 = arith.constant 0 : index
    %195 = vector.load %arg1[%c0_275, %c14_276, %c0_277] : memref<4x16x128xf32, #tpu.memory_space<vmem>>, vector<4x1x128xf32>
    %c0_278 = arith.constant 0 : index
    %c14_279 = arith.constant 14 : index
    %c0_280 = arith.constant 0 : index
    %196 = vector.load %arg2[%c0_278, %c14_279, %c0_280] : memref<4x16x128xf32, #tpu.memory_space<vmem>>, vector<4x1x128xf32>
    %197 = arith.mulf %195, %196 : vector<4x1x128xf32>
    %cst_281 = arith.constant 2.000000e+00 : f32
    %198 = vector.broadcast %cst_281 : f32 to vector<4x1x128xf32>
    %199 = arith.mulf %198, %197 : vector<4x1x128xf32>
    %200 = arith.addf %194, %199 : vector<4x1x128xf32>
    %c0_282 = arith.constant 0 : index
    %c15_283 = arith.constant 15 : index
    %c0_284 = arith.constant 0 : index
    %201 = vector.load %arg4[%c0_282, %c15_283, %c0_284] : memref<4x16x128xf32, #tpu.memory_space<vmem>>, vector<4x1x128xf32>
    tpu.vector_store %arg4[%c0_282, %c15_283, %c0_284], %200 {strides = array<i32>} : memref<4x16x128xf32, #tpu.memory_space<vmem>>, vector<4x1x128xf32>,
    %c0_285 = arith.constant 0 : index
    %c0_286 = arith.constant 0 : index
    %c0_287 = arith.constant 0 : index
    %202 = vector.load %arg4[%c0_285, %c0_286, %c0_287] : memref<4x16x128xf32, #tpu.memory_space<vmem>>, vector<4x16x128xf32>
    %c1_i32_288 = arith.constant 1 : i32
    %203 = tpu.dynamic_rotate %202 by %c1_i32_288 dim 2 : vector<4x16x128xf32>, i32 -> vector<4x16x128xf32>
    %c127_i32_289 = arith.constant 127 : i32
    %204 = tpu.dynamic_rotate %202 by %c127_i32_289 dim 2 : vector<4x16x128xf32>, i32 -> vector<4x16x128xf32>
    %c0_290 = arith.constant 0 : index
    %c0_291 = arith.constant 0 : index
    %c0_292 = arith.constant 0 : index
    %205 = vector.load %arg4[%c0_290, %c0_291, %c0_292] : memref<4x16x128xf32, #tpu.memory_space<vmem>>, vector<4x16x1xf32>
    %c0_293 = arith.constant 0 : index
    %c0_294 = arith.constant 0 : index
    %c1_295 = arith.constant 1 : index
    %206 = vector.load %arg4[%c0_293, %c0_294, %c1_295] : memref<4x16x128xf32, #tpu.memory_space<vmem>>, vector<4x16x1xf32>
    %c0_296 = arith.constant 0 : index
    %c0_297 = arith.constant 0 : index
    %c127_298 = arith.constant 127 : index
    %207 = vector.load %arg4[%c0_296, %c0_297, %c127_298] : memref<4x16x128xf32, #tpu.memory_space<vmem>>, vector<4x16x1xf32>
    %c0_299 = arith.constant 0 : index
    %c0_300 = arith.constant 0 : index
    %c126_301 = arith.constant 126 : index
    %208 = vector.load %arg4[%c0_299, %c0_300, %c126_301] : memref<4x16x128xf32, #tpu.memory_space<vmem>>, vector<4x16x1xf32>
    %209 = arith.addf %202, %203 : vector<4x16x128xf32>
    %210 = arith.addf %209, %204 : vector<4x16x128xf32>
    %c0_302 = arith.constant 0 : index
    %c0_303 = arith.constant 0 : index
    %c0_304 = arith.constant 0 : index
    %211 = vector.load %arg4[%c0_302, %c0_303, %c0_304] : memref<4x16x128xf32, #tpu.memory_space<vmem>>, vector<4x16x128xf32>
    tpu.vector_store %arg4[%c0_302, %c0_303, %c0_304], %210 {strides = array<i32>} : memref<4x16x128xf32, #tpu.memory_space<vmem>>, vector<4x16x128xf32>,
    %cst_305 = arith.constant 2.000000e+00 : f32
    %212 = vector.broadcast %cst_305 : f32 to vector<4x16x1xf32>
    %213 = arith.mulf %212, %206 : vector<4x16x1xf32>
    %214 = arith.addf %205, %213 : vector<4x16x1xf32>
    %c0_306 = arith.constant 0 : index
    %c0_307 = arith.constant 0 : index
    %c0_308 = arith.constant 0 : index
    %215 = vector.load %arg4[%c0_306, %c0_307, %c0_308] : memref<4x16x128xf32, #tpu.memory_space<vmem>>, vector<4x16x1xf32>
    tpu.vector_store %arg4[%c0_306, %c0_307, %c0_308], %214 {strides = array<i32>} : memref<4x16x128xf32, #tpu.memory_space<vmem>>, vector<4x16x1xf32>,
    %cst_309 = arith.constant 2.000000e+00 : f32
    %216 = vector.broadcast %cst_309 : f32 to vector<4x16x1xf32>
    %217 = arith.mulf %216, %208 : vector<4x16x1xf32>
    %218 = arith.addf %207, %217 : vector<4x16x1xf32>
    %c0_310 = arith.constant 0 : index
    %c0_311 = arith.constant 0 : index
    %c127_312 = arith.constant 127 : index
    %219 = vector.load %arg4[%c0_310, %c0_311, %c127_312] : memref<4x16x128xf32, #tpu.memory_space<vmem>>, vector<4x16x1xf32>
    tpu.vector_store %arg4[%c0_310, %c0_311, %c127_312], %218 {strides = array<i32>} : memref<4x16x128xf32, #tpu.memory_space<vmem>>, vector<4x16x1xf32>,
    %c0_313 = arith.constant 0 : index
    %c0_314 = arith.constant 0 : index
    %c0_315 = arith.constant 0 : index
    %220 = vector.load %arg4[%c0_313, %c0_314, %c0_315] : memref<4x16x128xf32, #tpu.memory_space<vmem>>, vector<4x16x128xf32>
    %cst_316 = arith.constant 0.111111112 : f32
    %221 = vector.broadcast %cst_316 : f32 to vector<4x16x128xf32>
    %222 = arith.mulf %220, %221 : vector<4x16x128xf32>
    %223 = arith.mulf %42, %80 : vector<4x16x128xf32>
    %224 = arith.subf %222, %223 : vector<4x16x128xf32>
    %cst_317 = arith.constant 2.000000e+00 : f32
    %225 = vector.broadcast %cst_317 : f32 to vector<4x16x128xf32>
    %226 = arith.mulf %225, %42 : vector<4x16x128xf32>
    %227 = arith.mulf %226, %80 : vector<4x16x128xf32>
    %cst_318 = arith.constant 9.99999974E-5 : f32
    %228 = vector.broadcast %cst_318 : f32 to vector<4x16x128xf32>
    %229 = arith.addf %227, %228 : vector<4x16x128xf32>
    %cst_319 = arith.constant 2.000000e+00 : f32
    %230 = vector.broadcast %cst_319 : f32 to vector<4x16x128xf32>
    %231 = arith.mulf %230, %224 : vector<4x16x128xf32>
    %cst_320 = arith.constant 8.99999984E-4 : f32
    %232 = vector.broadcast %cst_320 : f32 to vector<4x16x128xf32>
    %233 = arith.addf %231, %232 : vector<4x16x128xf32>
    %234 = arith.mulf %229, %233 : vector<4x16x128xf32>
    %235 = arith.mulf %42, %42 : vector<4x16x128xf32>
    %236 = arith.mulf %80, %80 : vector<4x16x128xf32>
    %237 = arith.addf %235, %236 : vector<4x16x128xf32>
    %cst_321 = arith.constant 9.99999974E-5 : f32
    %238 = vector.broadcast %cst_321 : f32 to vector<4x16x128xf32>
    %239 = arith.addf %237, %238 : vector<4x16x128xf32>
    %240 = arith.addf %128, %176 : vector<4x16x128xf32>
    %cst_322 = arith.constant 8.99999984E-4 : f32
    %241 = vector.broadcast %cst_322 : f32 to vector<4x16x128xf32>
    %242 = arith.addf %240, %241 : vector<4x16x128xf32>
    %243 = arith.mulf %239, %242 : vector<4x16x128xf32>
    %244 = tpu.reciprocal %243 {approx = true} : vector<4x16x128xf32> -> vector<4x16x128xf32>
    %245 = arith.mulf %243, %244 : vector<4x16x128xf32>
    %cst_323 = arith.constant 2.000000e+00 : f32
    %246 = vector.broadcast %cst_323 : f32 to vector<4x16x128xf32>
    %247 = arith.subf %246, %245 : vector<4x16x128xf32>
    %248 = arith.mulf %244, %247 : vector<4x16x128xf32>
    %249 = arith.mulf %234, %248 : vector<4x16x128xf32>
    %cst_324 = arith.constant 1.000000e+00 : f32
    %250 = vector.broadcast %cst_324 : f32 to vector<4x16x128xf32>
    %251 = arith.subf %250, %249 : vector<4x16x128xf32>
    %cst_325 = arith.constant 5.000000e-01 : f32
    %252 = vector.broadcast %cst_325 : f32 to vector<4x16x128xf32>
    %253 = arith.mulf %251, %252 : vector<4x16x128xf32>
    %cst_326 = arith.constant 0.000000e+00 : f32
    %cst_327 = arith.constant 1.000000e+00 : f32
    %254 = vector.broadcast %cst_326 : f32 to vector<4x16x128xf32>
    %255 = arith.maximumf %254, %253 : vector<4x16x128xf32>
    %256 = vector.broadcast %cst_327 : f32 to vector<4x16x128xf32>
    %257 = arith.minimumf %256, %255 : vector<4x16x128xf32>
    %c0_328 = arith.constant 0 : index
    %c0_329 = arith.constant 0 : index
    %c0_330 = arith.constant 0 : index
    %258 = vector.load %arg3[%c0_328, %c0_329, %c0_330] : memref<4x16x128xf32, #tpu.memory_space<vmem>>, vector<4x16x128xf32>
    tpu.vector_store %arg3[%c0_328, %c0_329, %c0_330], %257 {strides = array<i32>} : memref<4x16x128xf32, #tpu.memory_space<vmem>>, vector<4x16x128xf32>,
    return
  }
  func.func @transform_0(%arg0: i32) -> (i32, i32, i32) {
    %c0_i32 = arith.constant 0 : i32
    %c0_i32_0 = arith.constant 0 : i32
    %c0_i32_1 = arith.constant 0 : i32
    return %arg0, %c0_i32, %c0_i32_0 : i32, i32, i32
  }
  func.func @transform_1(%arg0: i32) -> (i32, i32, i32) {
    %c0_i32 = arith.constant 0 : i32
    %c0_i32_0 = arith.constant 0 : i32
    %c0_i32_1 = arith.constant 0 : i32
    return %arg0, %c0_i32, %c0_i32_0 : i32, i32, i32
  }
  func.func @transform_2(%arg0: i32) -> (i32, i32, i32) {
    %c0_i32 = arith.constant 0 : i32
    %c0_i32_0 = arith.constant 0 : i32
    %c0_i32_1 = arith.constant 0 : i32
    return %arg0, %c0_i32, %c0_i32_0 : i32, i32, i32
  }
}

</mosaic_0001>

<bundles_post_ra>
// kernel: tpu_custom_call.1
= control target key start
LH: loop header
LB: loop body
LE: loop exit
PB: predicated region body
PF: predicated region fallthrough
CT: control target
= control target key end

     0   :  { %7 = vsyncpa [#allocation4], 0  ;;  %s3977_s0 = inlined_call_operand.hbm [shape: f32[8,16,128], index: 0, kind: input, shape index: {}]   ;;  %s3978_s1 = inlined_call_operand.hbm [shape: f32[8,16,128], index: 1, kind: input, shape index: {}]   ;;  %s3979_s2 = inlined_call_operand.hbm [shape: f32[8,16,128], index: 2, kind: output, shape index: {}]  }
   0x1   :  { %9 = vsyncpa [#allocation4 + $0x1], 0 }
   0x2   :  { %10 = vsyncpa [#allocation7], 0 }
   0x3   :  { %12 = vsyncpa [#allocation7 + $0x1], 0 }
   0x4   :  { %13 = vsyncpa [#allocation5], 0 }
   0x5   :  { %15 = vsyncpa [#allocation5 + $0x1], 0  ;;  %s2276_s9 = smov 0   ;;  %s2278_s10 = smov 0  }
   0x6   :  { %s2280_s11 = smov 0   ;;  %s2282_s12 = smov 0  }
   0x7 LB: > { %s2297_s13 = sadd.s32 4294967295, %s2250_s12   ;;  %s2004_s14 = sadd.s32 4294967294, %s2250_s12   ;;  %s2250_s12 = sphi %s2282_s12, %s4077_s12   ;;  %s2246_s11 = sphi %s2280_s11, %s4076_s11   ;;  %s2242_s10 = sphi %s2278_s10, %s4075_s10   ;;  %s2238_s9 = sphi %s2276_s9, %s4074_s9  }
   0x8   : > { %s2301_s15 = sadd.s32 1, %s2250_s12   ;;  %s28_s16 = sadd.s32 1, %s2246_s11 }
   0x9   : > { %s25_s17 = ssub.s32 %s2250_s12, %s2301_s15  ;;  %p35_p0 = scmp.ne.s32.totalorder %s2246_s11, %s2242_s10 }
   0xa   : > { %p26_p1 = scmp.eq.s32.totalorder %s25_s17, 0  ;;  %p36_p2 = scmp.eq.s32.totalorder %s2250_s12, 0 }
   0xb   : > { %p41_p3 = scmp.ne.s32.totalorder %s2242_s10, %s2238_s9  ;;  %p42_p4 = scmp.eq.s32.totalorder %s2297_s13, 0 }
   0xc   : > { %s2313_s18 = scalar_select %p26_p1, %s2246_s11, %s28_s16  }
   0xd   : > { %p2315_p5 = por %p36_p2, %p35_p0  ;;  %p2319_p6 = por %p42_p4, %p41_p3 }
   0xe   : > { %p91_p7 = scmp.eq.s32.totalorder %s2297_s13, 1  ;;  %p97_p8 = scmp.eq.s32.totalorder %s2004_s14, 1 }
   0xf   : > { %s3993_s20 = scalar_select %p2319_p6, 1, 0 }
  0x10   : > { %p2048_p10 = scmp.lt.s32.totalorder %s2250_s12, 2  ;;  %p2326_p11 = por %p91_p7, %p35_p0 }
  0x11   : > { %p2330_p12 = por %p97_p8, %p41_p3  ;;  %s2335_s23 = sand.u32 1, %s2246_s11  }
  0x12   : > { %s3994_s21 = scalar_select %p2326_p11, 1, 0 }
  0x13   : > { %s3995_s22 = scalar_select %p2330_p12, 1, 0 }
  0x14   : > { %s2026_s24 = sshll.u32 %s2250_s12, 10  ;;  %s2007_s25 = sshll.u32 %s2335_s23, 6 }
  0x15   : > { %s2344_s28 = scalar_lea.hbm %s3977_s0, %s2026_s24  ;;  %s121_s29 = scalar_lea.vmem [#allocation3], %s2007_s25 }
  0x16   : > { %s129_s30 = sshll.u32 %s121_s29, 4  ;;  %p2350_p13 = pnand %p2048_p10, %p2315_p5  ;;  %s2354_s30 = int_to_ptr.vmem [resolvable:$true] %s129_s30 }
  0x17   : > { %s118_s4 = scalar_lea.sflag [#allocation4], %s2335_s23  ;;  %s2120_s5 = scalar_lea.hbm %s2344_s28, 1024 }
  0x18   : > { %p2121_p0 = scmp.ne.s32.totalorder %s2344_s28, %s2120_s5  ;;  %p2122_p1 = pneg %p2350_p13 }
  0x19   : > { %s2125_s8 = scalar_lea.hbm %s3977_s0, 2048  ;;  %p2126_p4 = scmp.lt.u32.totalorder %s2344_s28, %s3977_s0 }
  0x1a   : > { %p2123_p2 = pnand %p2122_p1, %p2121_p0  ;;  %p2127_p5 = scmp.lt.u32.totalorder %s2125_s8, %s2120_s5 }
  0x1b   : > { %p2129_p8 = scmp.lt.u32.totalorder %s2120_s5, %s2344_s28 }
  0x1c   : > { %p2124_p3 = pneg %p2123_p2  ;;  %p2128_p7 = por %p2127_p5, %p2126_p4 }
  0x1e   : > { %p2130_p10 = por %p2129_p8, %p2128_p7 }
  0x20   : > { %p2131_p9 = pnand %p2130_p10, %p2124_p3 }
  0x22   : > { %2134 = shalt.err (!%p2131_p9)
}
  0x23   : > { %s2135_s17 = scalar_lea.vmem %s2354_s30, 1024  ;;  %s2252_s19 = smov [#allocation3]  }
  0x24   : > { %p2136_p0 = scmp.ne.s32.totalorder %s2354_s30, %s2135_s17  ;;  %s2140_s26 = sshll.u32 %s2252_s19, 4  ;;  %s2141_s26 = int_to_ptr.vmem [resolvable:$false] %s2140_s26 }
  0x25   : > { %s2142_s27 = scalar_lea.vmem %s2141_s26, 2048  ;;  %p2143_p11 = scmp.lt.s32.totalorder %s2354_s30, %s2141_s26 }
  0x26   : > { %p2138_p2 = pnand %p2136_p0, %p2122_p1  ;;  %p2144_p4 = scmp.lt.s32.totalorder %s2142_s27, %s2135_s17 }
  0x28   : > { %p2139_p12 = pneg %p2138_p2  ;;  %p2145_p5 = por %p2144_p4, %p2143_p11 }
  0x2a   : > { %p2146_p7 = pnand %p2145_p5, %p2139_p12 }
  0x2c   : > { %2149 = shalt.err (!%p2146_p7)
}
  0x2d   : > { %s2253_s29 = smov 128   ;;  %s2254_s5 = smov 8  }
  0x2e   : > { %2040 = dma.hbm_to_vmem [thread:$0]  (!%p2350_p13), %s2344_s28, 1024, %s2354_s30, %s118_s4, %s2253_s29, %s2253_s29, %s2254_s5  }
  0x2f   : > { %p2015_p9 = scmp.ge.s32.totalorder %s2250_s12, 1  ;;  %p159_p11 = scmp.lt.s32.totalorder %s2250_s12, 3 }
  0x30   : > { %s2398_s14 = scalar_lea.hbm %s3978_s1, %s2026_s24  ;;  %s143_s16 = scalar_lea.vmem [#allocation6], %s2007_s25 }
  0x31   : > { %p2389_p12 = pnand %p2015_p9, %p159_p11  ;;  %s151_s17 = sshll.u32 %s143_s16, 4  ;;  %s2402_s17 = int_to_ptr.vmem [resolvable:$true] %s151_s17 }
  0x32   : > { %s140_s28 = scalar_lea.sflag [#allocation7], %s2335_s23  ;;  %s2150_s30 = scalar_lea.hbm %s2398_s14, 1024 }
  0x33   : > { %p2151_p3 = scmp.ne.s32.totalorder %s2398_s14, %s2150_s30  ;;  %s2155_s24 = scalar_lea.hbm %s3978_s1, 2048 }
  0x34   : > { %p2156_p0 = scmp.lt.u32.totalorder %s2398_s14, %s3978_s1  ;;  %p2157_p2 = scmp.lt.u32.totalorder %s2155_s24, %s2150_s30 }
  0x35   : > { %p2153_p8 = pnand %p2151_p3, %p2122_p1  ;;  %p2159_p5 = scmp.lt.u32.totalorder %s2150_s30, %s2398_s14 }
  0x36   : > { %p2158_p4 = por %p2157_p2, %p2156_p0 }
  0x37   : > { %p2154_p10 = pneg %p2153_p8 }
  0x38   : > { %p2160_p7 = por %p2159_p5, %p2158_p4 }
  0x3a   : > { %p2161_p9 = pnand %p2160_p7, %p2154_p10 }
  0x3c   : > { %2164 = shalt.err (!%p2161_p9)
}
  0x3d   : > { %s2165_s25 = scalar_lea.vmem %s2402_s17, 1024  ;;  %s2255_s7 = smov [#allocation6]  }
  0x3e   : > { %p2166_p11 = scmp.ne.s32.totalorder %s2402_s17, %s2165_s25  ;;  %s2170_s8 = sshll.u32 %s2255_s7, 4  ;;  %s2171_s8 = int_to_ptr.vmem [resolvable:$false] %s2170_s8 }
  0x3f   : > { %s2172_s16 = scalar_lea.vmem %s2171_s8, 2048  ;;  %p2173_p6 = scmp.lt.s32.totalorder %s2402_s17, %s2171_s8 }
  0x40   : > { %p2168_p3 = pnand %p2166_p11, %p2122_p1  ;;  %p2174_p0 = scmp.lt.s32.totalorder %s2172_s16, %s2165_s25 }
  0x42   : > { %p2169_p8 = pneg %p2168_p3  ;;  %p2175_p2 = por %p2174_p0, %p2173_p6 }
  0x44   : > { %p2176_p4 = pnand %p2175_p2, %p2169_p8 }
  0x46   : > { %2179 = shalt.err (!%p2176_p4)
}
  0x47   : > { %2043 = dma.hbm_to_vmem [thread:$0]  (!%p2350_p13), %s2398_s14, 1024, %s2402_s17, %s140_s28, %s2253_s29, %s2253_s29, %s2254_s5  }
  0x48   : > { %163 = sbr.rel (%p2389_p12) target bundleno = 1062 (0x426), region = 28 }
  0x4f   : > { %s2436_s30 = sand.u32 1, %s2242_s10   ;;  %p3998_p6 = scmp.ne.s32.totalorder %s3993_s20, 0 }
  0x50   : > { %s2439_s4 = sshll.u32 %s2436_s30, 6  ;;  %s166_s3 = scalar_lea.sflag [#allocation4], %s2436_s30 }
  0x51   : > { %s2443_s19 = scalar_lea.vmem [#allocation3], %s2439_s4 }
  0x52   : > { %2225 = dma.done.wait (%p3998_p6), %s166_s3, 1024  }
  0x53   : > { %2227 = vsyncadd (%p3998_p6), %s166_s3, 4294966272  ;;  %s175_s23 = scalar_lea.sflag [#allocation7], %s2436_s30  ;;  %s2451_s29 = scalar_lea.vmem [#allocation6], %s2439_s4 }
  0x54   : > { %2229 = dma.done.wait (%p3998_p6), %s175_s23, 1024  }
  0x55   : > { %2231 = vsyncadd (%p3998_p6), %s175_s23, 4294966272  ;;  %v255_v0 = vlaneseq  ;;  %v2460_v2 = vld [vmem:[%s2443_s19 + $0x10] sm:$0xff]  ;;  %v2463_v3 = vld [vmem:[%s2443_s19 + $0x18] sm:$0xff]  ;;  %s2256_s20 = smov 1   ;;  %s2257_s5 = smov 127   ;;  %vm459_vm2 = vcmask 7168  }
  0x56   : > { %v308_v4 = vld [vmem:[%s2443_s19 + $0x10] sm:$0x1]  ;;  %v248_v5 = vrot.slane %v2460_v2, 7  ;;  %v252_v6 = vrot.slane %v2463_v3, 7  ;;  %v267_v7 = vrot.slane %v2460_v2, 1  ;;  %v271_v8 = vrot.slane %v2463_v3, 1 }
  0x57   : > { %v2457_v1 = vshrl.u32 %v255_v0, 7  ;;  %v312_v9 = vld [vmem:[%s2443_s19 + $0x11] sm:$0x1]  ;;  %v2474_v11 = vld [vmem:[%s2443_s19] sm:$0xff]  ;;  %v2477_v12 = vld [vmem:[%s2443_s19 + $0x8] sm:$0xff]  ;;  %vm500_vm3 = vcmask 1048568  }
  0x58   : > { %v316_v10 = vmul.f32 2.0, %v312_v9  ;;  %v247_v15 = vrot.slane %v2474_v11, 7  ;;  %v251_v16 = vrot.slane %v2477_v12, 7  ;;  %v311_v17 = vld [vmem:[%s2443_s19 + $0x1] sm:$0x1]  ;;  %v266_v20 = vrot.slane %v2474_v11, 1 }
  0x59   : > { %vm257_vm0 = vcmp.lt.s32.totalorder %v2457_v1, 1  ;;  %vm274_vm1 = vcmp.lt.s32.totalorder %v2457_v1, 7  ;;  %v270_v21 = vrot.slane %v2477_v12, 1  ;;  %v307_v22 = vld [vmem:[%s2443_s19] sm:$0x1]  ;;  %v315_v25 = vmul.f32 2.0, %v311_v17 }
  0x5a   : > { %v263_v13 = vsel %vm257_vm0, %v252_v6, %v248_v5  ;;  %v276_v14 = vsel %vm274_vm1, %v267_v7, %v271_v8  ;;  %v320_v19 = vadd.f32 %v316_v10, %v308_v4  ;;  %v332_v23 = vld [vmem:[%s2443_s19 + $0x1e] sm:$0x1]  ;;  %v262_v24 = vsel %vm257_vm0, %v251_v16, %v247_v15  ;;  %v331_v28 = vld [vmem:[%s2443_s19 + $0xe] sm:$0x1]  ;;  %v328_v33 = vld [vmem:[%s2443_s19 + $0x1f] sm:$0x1] }
  0x5b   : > { %v285_v18 = vadd.f32 %v263_v13, %v2460_v2  ;;  %v259_v26 = vsel %vm257_vm0, %v248_v5, %v252_v6  ;;  %v280_v27 = vsel %vm274_vm1, %v271_v8, %v267_v7  ;;  %v275_v30 = vsel %vm274_vm1, %v266_v20, %v270_v21  ;;  %v2504_v34 = vld [vmem:[%s2443_s19 + $0x20] sm:$0xff]  ;;  %v2507_v35 = vld [vmem:[%s2443_s19 + $0x28] sm:$0xff]  ;;  %v2518_v47 = vld [vmem:[%s2443_s19 + $0x30] sm:$0xff]  ;;  %s3914_s6 = scalar_lea.vmem [#allocation8], %s2439_s4  ;;  %s2030_s14 = sshll.u32 %s2297_s13, 10 }
  0x5c   : > { %v283_v31 = vadd.f32 %v262_v24, %v2474_v11  ;;  %v286_v32 = vadd.f32 %v259_v26, %v2463_v3  ;;  %v319_v36 = vadd.f32 %v315_v25, %v307_v22  ;;  %v336_v37 = vmul.f32 2.0, %v332_v23  ;;  %v327_v40 = vld [vmem:[%s2443_s19 + $0xf] sm:$0x1]  ;;  %v333_v41 = vld [vmem:[%s2443_s19 + $0x2e] sm:$0x1]  ;;  %v2527_v58 = vld [vmem:[%s2443_s19 + $0x38] sm:$0xff]  ;;  %s3930_s26 = scalar_lea.hbm %s3979_s2, %s2030_s14 }
  0x5d   : > { %v293_v29 = vadd.f32 %v285_v18, %v276_v14  ;;  %v258_v38 = vsel %vm257_vm0, %v247_v15, %v251_v16  ;;  %v279_v39 = vsel %vm274_vm1, %v270_v21, %v266_v20  ;;  %v335_v45 = vmul.f32 2.0, %v331_v28  ;;  %v313_v46 = vld [vmem:[%s2443_s19 + $0x21] sm:$0x1]  ;;  %v329_v52 = vld [vmem:[%s2443_s19 + $0x2f] sm:$0x1]  ;;  %s1908_s17 = sshll.u32 %s3914_s6, 4  ;;  %s3932_s17 = int_to_ptr.vmem [resolvable:$true] %s1908_s17 }
  0x5e   : > { %v291_v42 = vadd.f32 %v283_v31, %v275_v30  ;;  %v294_v43 = vadd.f32 %v286_v32, %v280_v27  ;;  %v284_v44 = vadd.f32 %v258_v38, %v2477_v12  ;;  %v340_v48 = vadd.f32 %v336_v37, %v328_v33  ;;  %v309_v57 = vld [vmem:[%s2443_s19 + $0x20] sm:$0x1]  ;;  %v334_v63 = vld [vmem:[%s2443_s19 + $0x3e] sm:$0x1]  ;;  %v314_v0 = vld [vmem:[%s2443_s19 + $0x31] sm:$0x1] }
  0x5f   : > { %301 = vst [vmem:[#allocation2 + $0x10] sm:$0xff] %v293_v29  ;;  %v249_v49 = vrot.slane %v2504_v34, 7  ;;  %v253_v50 = vrot.slane %v2507_v35, 7  ;;  %v268_v51 = vrot.slane %v2504_v34, 1  ;;  %v339_v54 = vadd.f32 %v335_v45, %v327_v40  ;;  %v330_v16 = vld [vmem:[%s2443_s19 + $0x3f] sm:$0x1] }
  0x60   : > { %324 = vst [vmem:[#allocation2 + $0x10] sm:$0x1] %v320_v19  ;;  %299 = vst [vmem:[#allocation2] sm:$0xff] %v291_v42  ;;  %v292_v53 = vadd.f32 %v284_v44, %v279_v39  ;;  %v272_v55 = vrot.slane %v2507_v35, 1  ;;  %v337_v56 = vmul.f32 2.0, %v333_v41  ;;  %v317_v61 = vmul.f32 2.0, %v313_v46 }
  0x61   : > { %302 = vst [vmem:[#allocation2 + $0x18] sm:$0xff] %v294_v43  ;;  %323 = vst [vmem:[#allocation2] sm:$0x1] %v319_v36  ;;  %v260_v59 = vsel %vm257_vm0, %v249_v49, %v253_v50  ;;  %v264_v60 = vsel %vm257_vm0, %v253_v50, %v249_v49  ;;  %v250_v62 = vrot.slane %v2518_v47, 7  ;;  %v254_v10 = vrot.slane %v2527_v58, 7  ;;  %s1894_s27 = scalar_lea.sflag [#allocation5], %s2436_s30 }
  0x62   : > { %344 = vst [vmem:[#allocation2 + $0x1f] sm:$0x1] %v340_v48  ;;  %300 = vst [vmem:[#allocation2 + $0x8] sm:$0xff] %v292_v53  ;;  %v281_v4 = vsel %vm274_vm1, %v272_v55, %v268_v51  ;;  %v288_v5 = vadd.f32 %v260_v59, %v2507_v35  ;;  %v341_v6 = vadd.f32 %v337_v56, %v329_v52  ;;  %v269_v13 = vrot.slane %v2518_v47, 1  ;;  %v310_v22 = vld [vmem:[%s2443_s19 + $0x30] sm:$0x1] }
  0x63   : > { %v277_v7 = vsel %vm274_vm1, %v268_v51, %v272_v55  ;;  %343 = vst [vmem:[#allocation2 + $0xf] sm:$0x1] %v339_v54  ;;  %v287_v8 = vadd.f32 %v264_v60, %v2504_v34  ;;  %v321_v9 = vadd.f32 %v317_v61, %v309_v57  ;;  %v273_v15 = vrot.slane %v2527_v58, 1  ;;  %s2180_s25 = scalar_lea.vmem %s3932_s17, 1024  ;;  %p4071_p1 = scmp.ne.s32.totalorder %s3994_s21, 0 }
  0x64   : > { %v296_v14 = vadd.f32 %v288_v5, %v281_v4  ;;  %v338_v17 = vmul.f32 2.0, %v334_v63  ;;  %v318_v18 = vmul.f32 2.0, %v314_v0  ;;  %v261_v20 = vsel %vm257_vm0, %v250_v62, %v254_v10  ;;  %p2181_p13 = scmp.ne.s32.totalorder %s3932_s17, %s2180_s25  ;;  %s2258_s13 = smov [#allocation8]  }
  0x65   : > { %v295_v19 = vadd.f32 %v287_v8, %v277_v7  ;;  %v265_v21 = vsel %vm257_vm0, %v254_v10, %v250_v62  ;;  %v282_v24 = vsel %vm274_vm1, %v273_v15, %v269_v13  ;;  %v290_v25 = vadd.f32 %v261_v20, %v2527_v58  ;;  %s2184_s7 = sshll.u32 %s2258_s13, 4  ;;  %s2185_s7 = int_to_ptr.vmem [resolvable:$false] %s2184_s7 }
  0x66   : > { %304 = vst [vmem:[#allocation2 + $0x28] sm:$0xff] %v296_v14  ;;  %v278_v26 = vsel %vm274_vm1, %v269_v13, %v273_v15  ;;  %v342_v27 = vadd.f32 %v338_v17, %v330_v16  ;;  %v289_v28 = vadd.f32 %v265_v21, %v2518_v47  ;;  %v322_v32 = vadd.f32 %v318_v18, %v310_v22  ;;  %p2182_p12 = pnand %p2181_p13, %p4071_p1  ;;  %s2186_s8 = scalar_lea.vmem %s2185_s7, 2048 }
  0x67   : > { %v2551_v23 = vld [vmem:[#allocation2 + $0x10] sm:$0xff]  ;;  %345 = vst [vmem:[#allocation2 + $0x2f] sm:$0x1] %v341_v6  ;;  %303 = vst [vmem:[#allocation2 + $0x20] sm:$0xff] %v295_v19  ;;  %v298_v31 = vadd.f32 %v290_v25, %v282_v24  ;;  %p2187_p5 = scmp.lt.s32.totalorder %s3932_s17, %s2185_s7  ;;  %p2188_p7 = scmp.lt.s32.totalorder %s2186_s8, %s2180_s25 }
  0x68   : > { %359 = vrot.lane.b32.xlu1 %v2551_v23, %s2256_s20  ;;  %v2561_v29 = vld [vmem:[#allocation2] sm:$0xff]  ;;  %325 = vst [vmem:[#allocation2 + $0x20] sm:$0x1] %v321_v9  ;;  %v297_v33 = vadd.f32 %v289_v28, %v278_v26  ;;  %v413_v44 = vmul.f32 2.0, %v2551_v23  ;;  %p2183_p10 = pneg %p2182_p12 }
  0x69   : > { %v2563_v30 = vld [vmem:[#allocation2 + $0x18] sm:$0xff]  ;;  %355 = vrot.lane.b32.xlu0 %v2561_v29, %s2256_s20  ;;  %306 = vst [vmem:[#allocation2 + $0x38] sm:$0xff] %v298_v31  ;;  %v411_v42 = vmul.f32 2.0, %v2561_v29  ;;  %p2189_p9 = por %p2188_p7, %p2187_p5 }
  0x6a   : > { %v2567_v36 = vld [vmem:[#allocation2 + $0x8] sm:$0xff]  ;;  %346 = vst [vmem:[#allocation2 + $0x3f] sm:$0x1] %v342_v27  ;;  %305 = vst [vmem:[#allocation2 + $0x30] sm:$0xff] %v297_v33  ;;  %v414_v43 = vmul.f32 2.0, %v2563_v30 }
  0x6b   : > { %326 = vst [vmem:[#allocation2 + $0x30] sm:$0x1] %v322_v32  ;;  %v412_v41 = vmul.f32 2.0, %v2567_v36  ;;  %p2190_p11 = pnand %p2189_p9, %p2183_p10 }
  0x6c   : > { %361 = vrot.lane.b32.xlu1 %v2563_v30, %s2256_s20 }
  0x6d   : > { %357 = vrot.lane.b32.xlu0 %v2567_v36, %s2256_s20 }
  0x6e   : > { %v2573_v37 = vld [vmem:[#allocation2 + $0x28] sm:$0xff] }
  0x6f   : > { %v2577_v38 = vld [vmem:[#allocation2 + $0x20] sm:$0xff]  ;;  %v416_v45 = vmul.f32 2.0, %v2573_v37 }
  0x70   : > { %365 = vrot.lane.b32.xlu1 %v2573_v37, %s2256_s20  ;;  %v415_v46 = vmul.f32 2.0, %v2577_v38 }
  0x71   : > { %363 = vrot.lane.b32.xlu0 %v2577_v38, %s2256_s20  ;;  %v2581_v39 = vld [vmem:[#allocation2 + $0x38] sm:$0xff] }
  0x72   : > { %v2585_v40 = vld [vmem:[#allocation2 + $0x30] sm:$0xff]  ;;  %v418_v48 = vmul.f32 2.0, %v2581_v39 }
  0x73   : > { %v417_v49 = vmul.f32 2.0, %v2585_v40 }
  0x74   : > { %369 = vrot.lane.b32.xlu1 %v2581_v39, %s2256_s20 }
  0x75   : > { %367 = vrot.lane.b32.xlu0 %v2585_v40, %s2256_s20 }
  0x78   : > { %373 = vrot.lane.b32.xlu1 %v2567_v36, %s2257_s5 }
  0x79   : > { %371 = vrot.lane.b32.xlu0 %v2561_v29, %s2257_s5 }
  0x7c   : > { %377 = vrot.lane.b32.xlu1 %v2563_v30, %s2257_s5 }
  0x7d   : > { %375 = vrot.lane.b32.xlu0 %v2551_v23, %s2257_s5 }
  0x80   : > { %381 = vrot.lane.b32.xlu1 %v2573_v37, %s2257_s5 }
  0x81   : > { %379 = vrot.lane.b32.xlu0 %v2577_v38, %s2257_s5 }
  0x84   : > { %385 = vrot.lane.b32.xlu1 %v2581_v39, %s2257_s5 }
  0x85   : > { %383 = vrot.lane.b32.xlu0 %v2585_v40, %s2257_s5 }
  0x88   : > { %429 = vrot.lane.b32.xlu1 %v412_v41, %s2257_s5 }
  0x89   : > { %427 = vrot.lane.b32.xlu0 %v411_v42, %s2257_s5 }
  0x8c   : > { %433 = vrot.lane.b32.xlu1 %v414_v43, %s2257_s5 }
  0x8d   : > { %431 = vrot.lane.b32.xlu0 %v413_v44, %s2257_s5 }
  0x90   : > { %437 = vrot.lane.b32.xlu1 %v416_v45, %s2257_s5 }
  0x91   : > { %435 = vrot.lane.b32.xlu0 %v415_v46, %s2257_s5 }
  0x94   : > { %441 = vrot.lane.b32.xlu1 %v418_v48, %s2257_s5 }
  0x95   : > { %439 = vrot.lane.b32.xlu0 %v417_v49, %s2257_s5 }
  0x98   : > { %470 = vrot.lane.b32.xlu1 %v412_v41, %s2256_s20 }
  0x99   : > { %468 = vrot.lane.b32.xlu0 %v411_v42, %s2256_s20 }
  0x9c   : > { %474 = vrot.lane.b32.xlu1 %v414_v43, %s2256_s20  ;;  %v215_v43 = vld [vmem:[%s2451_s29] sm:$0xff] }
  0x9d   : > { %472 = vrot.lane.b32.xlu0 %v413_v44, %s2256_s20  ;;  %v216_v44 = vld [vmem:[%s2451_s29 + $0x8] sm:$0xff] }
  0xa0   : > { %478 = vrot.lane.b32.xlu1 %v416_v45, %s2256_s20 }
  0xa1   : > { %476 = vrot.lane.b32.xlu0 %v415_v46, %s2256_s20 }
  0xa4   : > { %482 = vrot.lane.b32.xlu1 %v418_v48, %s2256_s20 }
  0xa5   : > { %480 = vrot.lane.b32.xlu0 %v417_v49, %s2256_s20  ;;  %v525_v49 = vrot.slane %v215_v43, 7 }
  0xda   : > { %v360_v50 = vpop.permute.xlu1 %359 }
  0xdb   : > { %v356_v51 = vpop.permute.xlu0 %355  ;;  %v389_v6 = vadd.f32 %v360_v50, %v2551_v23  ;;  %v529_v50 = vrot.slane %v216_v44, 7 }
  0xdc   : > { %v387_v61 = vadd.f32 %v356_v51, %v2561_v29 }
  0xde   : > { %v362_v52 = vpop.permute.xlu1 %361 }
  0xdf   : > { %v358_v53 = vpop.permute.xlu0 %357  ;;  %v390_v0 = vadd.f32 %v362_v52, %v2563_v30  ;;  %v2651_v52 = vld [vmem:[%s2451_s29 + $0x10] sm:$0xff] }
  0xe0   : > { %v388_v59 = vadd.f32 %v358_v53, %v2567_v36  ;;  %v2654_v53 = vld [vmem:[%s2451_s29 + $0x18] sm:$0xff] }
  0xe2   : > { %v366_v54 = vpop.permute.xlu1 %365 }
  0xe3   : > { %v364_v55 = vpop.permute.xlu0 %363  ;;  %v392_v9 = vadd.f32 %v366_v54, %v2573_v37 }
  0xe4   : > { %v391_v14 = vadd.f32 %v364_v55, %v2577_v38 }
  0xe6   : > { %v370_v56 = vpop.permute.xlu1 %369 }
  0xe7   : > { %v368_v57 = vpop.permute.xlu0 %367  ;;  %v394_v17 = vadd.f32 %v370_v56, %v2581_v39  ;;  %v541_v56 = vrot.slane %v215_v43, 1 }
  0xe8   : > { %v393_v20 = vadd.f32 %v368_v57, %v2585_v40  ;;  %v545_v57 = vrot.slane %v216_v44, 1 }
  0xea   : > { %v374_v60 = vpop.permute.xlu1 %373 }
  0xeb   : > { %v396_v62 = vadd.f32 %v388_v59, %v374_v60  ;;  %v372_v63 = vpop.permute.xlu0 %371  ;;  %v533_v60 = vsel %vm257_vm0, %v525_v49, %v529_v50 }
  0xec   : > { %v395_v4 = vadd.f32 %v387_v61, %v372_v63  ;;  %v605_v61 = vld [vmem:[%s2451_s29 + $0xe] sm:$0x1]  ;;  %v530_v63 = vrot.slane %v2654_v53, 7 }
  0xed   : > { %404 = vst [vmem:[#allocation2 + $0x8] sm:$0xff] %v396_v62  ;;  %v526_v62 = vrot.slane %v2651_v52, 7 }
  0xee   : > { %v378_v5 = vpop.permute.xlu1 %377  ;;  %403 = vst [vmem:[#allocation2] sm:$0xff] %v395_v4 }
  0xef   : > { %v398_v7 = vadd.f32 %v390_v0, %v378_v5  ;;  %v376_v8 = vpop.permute.xlu0 %375  ;;  %v2668_v5 = vld [vmem:[%s2451_s29 + $0x20] sm:$0xff] }
  0xf0   : > { %v397_v10 = vadd.f32 %v389_v6, %v376_v8  ;;  %v2671_v6 = vld [vmem:[%s2451_s29 + $0x28] sm:$0xff]  ;;  %v585_v8 = vld [vmem:[%s2451_s29 + $0x1] sm:$0x1] }
  0xf1   : > { %406 = vst [vmem:[#allocation2 + $0x18] sm:$0xff] %v398_v7  ;;  %v537_v7 = vsel %vm257_vm0, %v529_v50, %v525_v49  ;;  %v543_v49 = vrot.slane %v2668_v5, 1  ;;  %v547_v50 = vrot.slane %v2671_v6, 1 }
  0xf2   : > { %v382_v13 = vpop.permute.xlu1 %381  ;;  %405 = vst [vmem:[#allocation2 + $0x10] sm:$0xff] %v397_v10  ;;  %v553_v10 = vsel %vm274_vm1, %v545_v57, %v541_v56 }
  0xf3   : > { %v400_v15 = vadd.f32 %v392_v9, %v382_v13  ;;  %v380_v16 = vpop.permute.xlu0 %379  ;;  %v558_v13 = vadd.f32 %v533_v60, %v216_v44 }
  0xf4   : > { %v399_v18 = vadd.f32 %v391_v14, %v380_v16  ;;  %v609_v14 = vmul.f32 2.0, %v605_v61  ;;  %v601_v16 = vld [vmem:[%s2451_s29 + $0xf] sm:$0x1] }
  0xf5   : > { %408 = vst [vmem:[#allocation2 + $0x28] sm:$0xff] %v400_v15 }
  0xf6   : > { %v386_v19 = vpop.permute.xlu1 %385  ;;  %407 = vst [vmem:[#allocation2 + $0x20] sm:$0xff] %v399_v18  ;;  %v534_v18 = vsel %vm257_vm0, %v526_v62, %v530_v63 }
  0xf7   : > { %v402_v21 = vadd.f32 %v394_v17, %v386_v19  ;;  %v384_v22 = vpop.permute.xlu0 %383  ;;  %v546_v17 = vrot.slane %v2654_v53, 1  ;;  %v606_v19 = vld [vmem:[%s2451_s29 + $0x1e] sm:$0x1]  ;;  %v560_v44 = vadd.f32 %v534_v18, %v2654_v53 }
  0xf8   : > { %v401_v24 = vadd.f32 %v393_v20, %v384_v22  ;;  %v531_v22 = vrot.slane %v2671_v6, 7 }
  0xf9   : > { %410 = vst [vmem:[#allocation2 + $0x38] sm:$0xff] %v402_v21  ;;  %v527_v21 = vrot.slane %v2668_v5, 7 }
  0xfa   : > { %v430_v25 = vpop.permute.xlu1 %429  ;;  %409 = vst [vmem:[#allocation2 + $0x30] sm:$0xff] %v401_v24  ;;  %v557_v24 = vadd.f32 %v537_v7, %v215_v43  ;;  %v586_v43 = vld [vmem:[%s2451_s29 + $0x11] sm:$0x1] }
  0xfb   : > { %v452_v26 = vadd.f32 %v430_v25, %v2567_v36  ;;  %v428_v27 = vpop.permute.xlu0 %427  ;;  %v589_v25 = vmul.f32 2.0, %v585_v8  ;;  %v582_v8 = vld [vmem:[%s2451_s29 + $0x10] sm:$0x1] }
  0xfc   : > { %v451_v28 = vadd.f32 %v428_v27, %v2561_v29  ;;  %v2693_v27 = vld [vmem:[%s2451_s29 + $0x30] sm:$0xff] }
  0xfd   : > { %461 = vst.msk [vmem:[#allocation2 + $0x8] sm:$0xff] %vm459_vm2, %v452_v26 }
  0xfe   : > { %v434_v31 = vpop.permute.xlu1 %433  ;;  %460 = vst.msk [vmem:[#allocation2] sm:$0xff] %vm459_vm2, %v451_v28  ;;  %v2696_v28 = vld [vmem:[%s2451_s29 + $0x38] sm:$0xff] }
  0xff   : > { %v454_v32 = vadd.f32 %v434_v31, %v2563_v30  ;;  %v432_v33 = vpop.permute.xlu0 %431  ;;  %v581_v31 = vld [vmem:[%s2451_s29] sm:$0x1] }
 0x100   : > { %v453_v41 = vadd.f32 %v432_v33, %v2551_v23  ;;  %v613_v33 = vadd.f32 %v609_v14, %v601_v16  ;;  %v544_v16 = vrot.slane %v2693_v27, 1 }
 0x101   : > { %463 = vst.msk [vmem:[#allocation2 + $0x18] sm:$0xff] %vm459_vm2, %v454_v32  ;;  %v566_v32 = vadd.f32 %v558_v13, %v553_v10  ;;  %v587_v10 = vld [vmem:[%s2451_s29 + $0x21] sm:$0x1] }
 0x102   : > { %v438_v42 = vpop.permute.xlu1 %437  ;;  %462 = vst.msk [vmem:[#allocation2 + $0x10] sm:$0xff] %vm459_vm2, %v453_v41  ;;  %v538_v41 = vsel %vm257_vm0, %v530_v63, %v526_v62  ;;  %v590_v63 = vmul.f32 2.0, %v586_v43 }
 0x103   : > { %v456_v45 = vadd.f32 %v438_v42, %v2573_v37  ;;  %v436_v46 = vpop.permute.xlu0 %435 }
 0x104   : > { %v455_v48 = vadd.f32 %v436_v46, %v2577_v38  ;;  %v602_v46 = vld [vmem:[%s2451_s29 + $0x1f] sm:$0x1] }
 0x105   : > { %465 = vst.msk [vmem:[#allocation2 + $0x28] sm:$0xff] %vm459_vm2, %v456_v45 }
 0x106   : > { %v442_v51 = vpop.permute.xlu1 %441  ;;  %464 = vst.msk [vmem:[#allocation2 + $0x20] sm:$0xff] %vm459_vm2, %v455_v48  ;;  %v610_v48 = vmul.f32 2.0, %v606_v19  ;;  %v603_v19 = vld [vmem:[%s2451_s29 + $0x2f] sm:$0x1] }
 0x107   : > { %v458_v54 = vadd.f32 %v442_v51, %v2581_v39  ;;  %v440_v55 = vpop.permute.xlu0 %439  ;;  %v535_v51 = vsel %vm257_vm0, %v527_v21, %v531_v22 }
 0x108   : > { %v457_v59 = vadd.f32 %v440_v55, %v2585_v40  ;;  %v528_v55 = vrot.slane %v2693_v27, 7 }
 0x109   : > { %467 = vst.msk [vmem:[#allocation2 + $0x38] sm:$0xff] %vm459_vm2, %v458_v54  ;;  %v607_v54 = vld [vmem:[%s2451_s29 + $0x2e] sm:$0x1] }
 0x10a   : > { %v471_v0 = vpop.permute.xlu1 %470  ;;  %466 = vst.msk [vmem:[#allocation2 + $0x30] sm:$0xff] %vm459_vm2, %v457_v59  ;;  %v559_v59 = vadd.f32 %v538_v41, %v2651_v52  ;;  %v611_v13 = vmul.f32 2.0, %v607_v54 }
 0x10b   : > { %v493_v4 = vadd.f32 %v471_v0, %v2567_v36  ;;  %v469_v9 = vpop.permute.xlu0 %468  ;;  %v542_v36 = vrot.slane %v2651_v52, 1 }
 0x10c   : > { %v492_v15 = vadd.f32 %v469_v9, %v2561_v29  ;;  %v549_v29 = vsel %vm274_vm1, %v541_v56, %v545_v57  ;;  %v593_v57 = vadd.f32 %v589_v25, %v581_v31  ;;  %v614_v9 = vadd.f32 %v610_v48, %v602_v46 }
 0x10d   : > { %502 = vst.msk [vmem:[#allocation2 + $0x8] sm:$0xff] %vm500_vm3, %v493_v4  ;;  %v565_v56 = vadd.f32 %v557_v24, %v549_v29  ;;  %v550_v62 = vsel %vm274_vm1, %v542_v36, %v546_v17  ;;  %v539_v4 = vsel %vm257_vm0, %v531_v22, %v527_v21  ;;  %v594_v22 = vadd.f32 %v590_v63, %v582_v8 }
 0x10e   : > { %v475_v20 = vpop.permute.xlu1 %474  ;;  %501 = vst.msk [vmem:[#allocation2] sm:$0xff] %vm500_vm3, %v492_v15  ;;  %v555_v15 = vsel %vm274_vm1, %v547_v50, %v543_v49  ;;  %v561_v18 = vadd.f32 %v539_v4, %v2668_v5  ;;  %v551_v24 = vsel %vm274_vm1, %v543_v49, %v547_v50  ;;  %v591_v25 = vmul.f32 2.0, %v587_v10  ;;  %v583_v5 = vld [vmem:[%s2451_s29 + $0x20] sm:$0x1] }
 0x10f   : > { %v495_v26 = vadd.f32 %v475_v20, %v2563_v30  ;;  %v473_v42 = vpop.permute.xlu0 %472  ;;  %v554_v30 = vsel %vm274_vm1, %v546_v17, %v542_v36  ;;  %v548_v36 = vrot.slane %v2696_v28, 1  ;;  %v608_v20 = vld [vmem:[%s2451_s29 + $0x3e] sm:$0x1] }
 0x110   : > { %v494_v45 = vadd.f32 %v473_v42, %v2551_v23  ;;  %v532_v23 = vrot.slane %v2696_v28, 7  ;;  %v568_v0 = vadd.f32 %v560_v44, %v554_v30  ;;  %v615_v44 = vadd.f32 %v611_v13, %v603_v19 }
 0x111   : > { %504 = vst.msk [vmem:[#allocation2 + $0x18] sm:$0xff] %vm500_vm3, %v495_v26  ;;  %v556_v43 = vsel %vm274_vm1, %v548_v36, %v544_v16  ;;  %v569_v30 = vadd.f32 %v561_v18, %v551_v24  ;;  %v552_v49 = vsel %vm274_vm1, %v544_v16, %v548_v36 }
 0x112   : > { %v479_v53 = vpop.permute.xlu1 %478  ;;  %503 = vst.msk [vmem:[#allocation2 + $0x10] sm:$0xff] %vm500_vm3, %v494_v45  ;;  %v536_v17 = vsel %vm257_vm0, %v528_v55, %v532_v23  ;;  %v540_v26 = vsel %vm257_vm0, %v532_v23, %v528_v55  ;;  %v612_v45 = vmul.f32 2.0, %v608_v20 }
 0x113   : > { %v497_v60 = vadd.f32 %v479_v53, %v2573_v37  ;;  %v477_v7 = vpop.permute.xlu0 %476  ;;  %v562_v37 = vadd.f32 %v535_v51, %v2671_v6  ;;  %v567_v6 = vadd.f32 %v559_v59, %v550_v62  ;;  %v563_v46 = vadd.f32 %v540_v26, %v2693_v27  ;;  %v584_v51 = vld [vmem:[%s2451_s29 + $0x30] sm:$0x1] }
 0x114   : > { %v2718_v61 = vld [vmem:[#allocation2 + $0x8] sm:$0xff]  ;;  %v496_v52 = vadd.f32 %v477_v7, %v2577_v38 }
 0x115   : > { %574 = vst [vmem:[#allocation2 + $0x8] sm:$0xff] %v566_v32  ;;  %506 = vst.msk [vmem:[#allocation2 + $0x28] sm:$0xff] %vm500_vm3, %v497_v60  ;;  %v2729_v14 = vld [vmem:[#allocation2] sm:$0xff]  ;;  %v570_v32 = vadd.f32 %v562_v37, %v555_v15  ;;  %v571_v23 = vadd.f32 %v563_v46, %v552_v49 }
 0x116   : > { %617 = vst [vmem:[#allocation2 + $0xf] sm:$0x1] %v613_v33  ;;  %v483_v38 = vpop.permute.xlu1 %482  ;;  %573 = vst [vmem:[#allocation2] sm:$0xff] %v565_v56  ;;  %v588_v33 = vld [vmem:[%s2451_s29 + $0x31] sm:$0x1] }
 0x117   : > { %505 = vst.msk [vmem:[#allocation2 + $0x20] sm:$0xff] %vm500_vm3, %v496_v52  ;;  %v499_v21 = vadd.f32 %v483_v38, %v2581_v39  ;;  %597 = vst [vmem:[#allocation2] sm:$0x1] %v593_v57  ;;  %v481_v31 = vpop.permute.xlu0 %480  ;;  %v564_v39 = vadd.f32 %v536_v17, %v2696_v28  ;;  %v595_v28 = vadd.f32 %v591_v25, %v583_v5  ;;  %v592_v50 = vmul.f32 2.0, %v588_v33 }
 0x118   : > { %v2742_v29 = vld [vmem:[#allocation2 + $0x18] sm:$0xff]  ;;  %v498_v41 = vadd.f32 %v481_v31, %v2585_v40 }
 0x119   : > { %576 = vst [vmem:[#allocation2 + $0x18] sm:$0xff] %v568_v0  ;;  %508 = vst.msk [vmem:[#allocation2 + $0x38] sm:$0xff] %vm500_vm3, %v499_v21  ;;  %v2753_v42 = vld [vmem:[#allocation2 + $0x10] sm:$0xff]  ;;  %v604_v40 = vld [vmem:[%s2451_s29 + $0x3f] sm:$0x1]  ;;  %v572_v54 = vadd.f32 %v564_v39, %v556_v43  ;;  %v596_v57 = vadd.f32 %v592_v50, %v584_v51 }
 0x11a   : > { %618 = vst [vmem:[#allocation2 + $0x1f] sm:$0x1] %v614_v9  ;;  %575 = vst [vmem:[#allocation2 + $0x10] sm:$0xff] %v567_v6  ;;  %v616_v27 = vadd.f32 %v612_v45, %v604_v40 }
 0x11b   : > { %507 = vst.msk [vmem:[#allocation2 + $0x30] sm:$0xff] %vm500_vm3, %v498_v41  ;;  %598 = vst [vmem:[#allocation2 + $0x10] sm:$0x1] %v594_v22 }
 0x11c   : > { %v2760_v48 = vld [vmem:[#allocation2 + $0x28] sm:$0xff] }
 0x11d   : > { %578 = vst [vmem:[#allocation2 + $0x28] sm:$0xff] %v570_v32  ;;  %v2765_v53 = vld [vmem:[#allocation2 + $0x8] sm:$0xff] }
 0x11e   : > { %v2767_v55 = vld [vmem:[#allocation2 + $0x20] sm:$0xff]  ;;  %619 = vst [vmem:[#allocation2 + $0x2f] sm:$0x1] %v615_v44  ;;  %631 = vrot.lane.b32.xlu1 %v2765_v53, %s2256_s20  ;;  %v686_v9 = vmul.f32 2.0, %v2765_v53 }
 0x11f   : > { %577 = vst [vmem:[#allocation2 + $0x20] sm:$0xff] %v569_v30  ;;  %v2771_v56 = vld [vmem:[#allocation2] sm:$0xff] }
 0x120   : > { %599 = vst [vmem:[#allocation2 + $0x20] sm:$0x1] %v595_v28  ;;  %v2773_v59 = vld [vmem:[#allocation2 + $0x38] sm:$0xff]  ;;  %629 = vrot.lane.b32.xlu0 %v2771_v56, %s2256_s20  ;;  %v685_v10 = vmul.f32 2.0, %v2771_v56 }
 0x121   : > { %580 = vst [vmem:[#allocation2 + $0x38] sm:$0xff] %v572_v54  ;;  %v2777_v60 = vld [vmem:[#allocation2 + $0x18] sm:$0xff] }
 0x122   : > { %v2779_v62 = vld [vmem:[#allocation2 + $0x30] sm:$0xff]  ;;  %620 = vst [vmem:[#allocation2 + $0x3f] sm:$0x1] %v616_v27  ;;  %635 = vrot.lane.b32.xlu1 %v2777_v60, %s2256_s20  ;;  %v688_v52 = vmul.f32 2.0, %v2777_v60 }
 0x123   : > { %579 = vst [vmem:[#allocation2 + $0x30] sm:$0xff] %v571_v23  ;;  %v2783_v63 = vld [vmem:[#allocation2 + $0x10] sm:$0xff] }
 0x124   : > { %600 = vst [vmem:[#allocation2 + $0x30] sm:$0x1] %v596_v57  ;;  %633 = vrot.lane.b32.xlu0 %v2783_v63, %s2256_s20  ;;  %v687_v37 = vmul.f32 2.0, %v2783_v63 }
 0x125   : > { %v2787_v0 = vld [vmem:[#allocation2 + $0x28] sm:$0xff] }
 0x126   : > { %639 = vrot.lane.b32.xlu1 %v2787_v0, %s2256_s20  ;;  %v690_v13 = vmul.f32 2.0, %v2787_v0 }
 0x127   : > { %v2791_v4 = vld [vmem:[#allocation2 + $0x20] sm:$0xff] }
 0x128   : > { %637 = vrot.lane.b32.xlu0 %v2791_v4, %s2256_s20  ;;  %v689_v15 = vmul.f32 2.0, %v2791_v4 }
 0x129   : > { %v2795_v7 = vld [vmem:[#allocation2 + $0x38] sm:$0xff] }
 0x12a   : > { %643 = vrot.lane.b32.xlu1 %v2795_v7, %s2256_s20  ;;  %v692_v16 = vmul.f32 2.0, %v2795_v7 }
 0x12b   : > { %v2799_v8 = vld [vmem:[#allocation2 + $0x30] sm:$0xff] }
 0x12c   : > { %641 = vrot.lane.b32.xlu0 %v2799_v8, %s2256_s20  ;;  %v691_v36 = vmul.f32 2.0, %v2799_v8 }
 0x12e   : > { %647 = vrot.lane.b32.xlu1 %v2765_v53, %s2257_s5 }
 0x130   : > { %645 = vrot.lane.b32.xlu0 %v2771_v56, %s2257_s5 }
 0x132   : > { %651 = vrot.lane.b32.xlu1 %v2777_v60, %s2257_s5 }
 0x134   : > { %649 = vrot.lane.b32.xlu0 %v2783_v63, %s2257_s5 }
 0x136   : > { %655 = vrot.lane.b32.xlu1 %v2787_v0, %s2257_s5 }
 0x138   : > { %653 = vrot.lane.b32.xlu0 %v2791_v4, %s2257_s5 }
 0x13a   : > { %659 = vrot.lane.b32.xlu1 %v2795_v7, %s2257_s5 }
 0x13c   : > { %657 = vrot.lane.b32.xlu0 %v2799_v8, %s2257_s5 }
 0x13e   : > { %703 = vrot.lane.b32.xlu1 %v686_v9, %s2257_s5 }
 0x140   : > { %701 = vrot.lane.b32.xlu0 %v685_v10, %s2257_s5 }
 0x142   : > { %707 = vrot.lane.b32.xlu1 %v688_v52, %s2257_s5 }
 0x144   : > { %705 = vrot.lane.b32.xlu0 %v687_v37, %s2257_s5 }
 0x146   : > { %711 = vrot.lane.b32.xlu1 %v690_v13, %s2257_s5 }
 0x148   : > { %709 = vrot.lane.b32.xlu0 %v689_v15, %s2257_s5 }
 0x14a   : > { %715 = vrot.lane.b32.xlu1 %v692_v16, %s2257_s5 }
 0x14c   : > { %713 = vrot.lane.b32.xlu0 %v691_v36, %s2257_s5 }
 0x14e   : > { %743 = vrot.lane.b32.xlu1 %v686_v9, %s2256_s20 }
 0x150   : > { %741 = vrot.lane.b32.xlu0 %v685_v10, %s2256_s20  ;;  %v2852_v10 = vmul.f32 0.11111111, %v2718_v61 }
 0x152   : > { %747 = vrot.lane.b32.xlu1 %v688_v52, %s2256_s20 }
 0x154   : > { %745 = vrot.lane.b32.xlu0 %v687_v37, %s2256_s20  ;;  %v2856_v37 = vmul.f32 %v2477_v12, %v2477_v12 }
 0x156   : > { %751 = vrot.lane.b32.xlu1 %v690_v13, %s2256_s20  ;;  %v223_v13 = vmul.f32 %v2474_v11, %v2474_v11  ;;  %v2874_v11 = vmul.f32 2.0, %v2852_v10 }
 0x158   : > { %749 = vrot.lane.b32.xlu0 %v689_v15, %s2256_s20  ;;  %v2861_v15 = vmul.f32 0.11111111, %v2729_v14 }
 0x15a   : > { %755 = vrot.lane.b32.xlu1 %v692_v16, %s2256_s20 }
 0x15c   : > { %753 = vrot.lane.b32.xlu0 %v691_v36, %s2256_s20  ;;  %v2865_v36 = vmul.f32 0.11111111, %v2742_v29  ;;  %v2879_v29 = vmul.f32 %v2852_v10, %v2852_v10 }
 0x190   : > { %v632_v17 = vpop.permute.xlu1 %631 }
 0x191   : > { %v662_v24 = vadd.f32 %v632_v17, %v2765_v53  ;;  %v2868_v17 = vmul.f32 0.11111111, %v2753_v42  ;;  %v2882_v42 = vmul.f32 2.0, %v2861_v15 }
 0x192   : > { %v630_v38 = vpop.permute.xlu0 %629 }
 0x193   : > { %v661_v26 = vadd.f32 %v630_v38, %v2771_v56  ;;  %v861_v38 = vld [vmem:[%s2443_s19 + $0x1] sm:$0x1] }
 0x194   : > { %v636_v6 = vpop.permute.xlu1 %635 }
 0x195   : > { %v664_v32 = vadd.f32 %v636_v6, %v2777_v60  ;;  %v801_v6 = vrot.slane %v2856_v37, 7 }
 0x196   : > { %v634_v18 = vpop.permute.xlu0 %633 }
 0x197   : > { %v663_v39 = vadd.f32 %v634_v18, %v2783_v63  ;;  %v797_v18 = vrot.slane %v223_v13, 7 }
 0x198   : > { %v640_v19 = vpop.permute.xlu1 %639 }
 0x199   : > { %v666_v45 = vadd.f32 %v640_v19, %v2787_v0  ;;  %v2885_v19 = vmul.f32 0.11111111, %v2760_v48  ;;  %v2903_v48 = vmul.f32 %v2463_v3, %v2463_v3  ;;  %v817_v3 = vrot.slane %v2856_v37, 1 }
 0x19a   : > { %v638_v20 = vpop.permute.xlu0 %637 }
 0x19b   : > { %v665_v40 = vadd.f32 %v638_v20, %v2791_v4 }
 0x19c   : > { %v644_v21 = vpop.permute.xlu1 %643 }
 0x19d   : > { %v668_v50 = vadd.f32 %v644_v21, %v2795_v7  ;;  %v889_v21 = vld [vmem:[%s2443_s19 + $0xe] sm:$0x1] }
 0x19e   : > { %v642_v22 = vpop.permute.xlu0 %641 }
 0x19f   : > { %v667_v27 = vadd.f32 %v642_v22, %v2799_v8  ;;  %v2892_v22 = vmul.f32 %v2861_v15, %v2861_v15 }
 0x1a0   : > { %v648_v25 = vpop.permute.xlu1 %647 }
 0x1a1   : > { %v670_v31 = vadd.f32 %v662_v24, %v648_v25  ;;  %v2895_v24 = vmul.f32 2.0, %v2865_v36 }
 0x1a2   : > { %v646_v5 = vpop.permute.xlu0 %645 }
 0x1a3   : > { %v669_v33 = vadd.f32 %v661_v26, %v646_v5  ;;  %678 = vst [vmem:[#allocation2 + $0x8] sm:$0xff] %v670_v31  ;;  %v865_v26 = vmul.f32 %v861_v38, %v861_v38  ;;  %v2899_v31 = vmul.f32 %v2460_v2, %v2460_v2  ;;  %v2906_v5 = vmul.f32 2.0, %v2868_v17 }
 0x1a4   : > { %v652_v41 = vpop.permute.xlu1 %651  ;;  %v2917_v2 = vmul.f32 %v2865_v36, %v2865_v36 }
 0x1a5   : > { %677 = vst [vmem:[#allocation2] sm:$0xff] %v669_v33  ;;  %v672_v44 = vadd.f32 %v664_v32, %v652_v41  ;;  %v853_v33 = vld [vmem:[%s2443_s19] sm:$0x1]  ;;  %v2913_v41 = vmul.f32 %v2868_v17, %v2868_v17 }
 0x1a6   : > { %v650_v43 = vpop.permute.xlu0 %649 }
 0x1a7   : > { %v671_v30 = vadd.f32 %v663_v39, %v650_v43  ;;  %680 = vst [vmem:[#allocation2 + $0x18] sm:$0xff] %v672_v44  ;;  %v809_v44 = vsel %vm257_vm0, %v801_v6, %v797_v18  ;;  %v813_v43 = vrot.slane %v223_v13, 1 }
 0x1a8   : > { %v656_v46 = vpop.permute.xlu1 %655 }
 0x1a9   : > { %679 = vst [vmem:[#allocation2 + $0x10] sm:$0xff] %v671_v30  ;;  %v674_v28 = vadd.f32 %v666_v45, %v656_v46  ;;  %v893_v45 = vmul.f32 %v889_v21, %v889_v21  ;;  %v2923_v30 = vmul.f32 0.11111111, %v2767_v55  ;;  %v2926_v46 = vmul.f32 2.0, %v2885_v19 }
 0x1aa   : > { %v654_v49 = vpop.permute.xlu0 %653 }
 0x1ab   : > { %v673_v51 = vadd.f32 %v665_v40, %v654_v49  ;;  %682 = vst [vmem:[#allocation2 + $0x28] sm:$0xff] %v674_v28  ;;  %v881_v28 = vld [vmem:[%s2443_s19 + $0xf] sm:$0x1]  ;;  %v805_v49 = vsel %vm257_vm0, %v797_v18, %v801_v6  ;;  %v897_v38 = vmul.f32 2.0, %v893_v45  ;;  %v818_v6 = vrot.slane %v2903_v48, 1 }
 0x1ac   : > { %v660_v54 = vpop.permute.xlu1 %659  ;;  %v862_v18 = vld [vmem:[%s2443_s19 + $0x11] sm:$0x1] }
 0x1ad   : > { %681 = vst [vmem:[#allocation2 + $0x20] sm:$0xff] %v673_v51  ;;  %v676_v23 = vadd.f32 %v668_v50, %v660_v54  ;;  %v857_v51 = vmul.f32 %v853_v33, %v853_v33  ;;  %v869_v54 = vmul.f32 2.0, %v865_v26  ;;  %v890_v26 = vld [vmem:[%s2443_s19 + $0x1e] sm:$0x1] }
 0x1ae   : > { %v658_v57 = vpop.permute.xlu0 %657 }
 0x1af   : > { %v675_v9 = vadd.f32 %v667_v27, %v658_v57  ;;  %684 = vst [vmem:[#allocation2 + $0x38] sm:$0xff] %v676_v23  ;;  %v798_v27 = vrot.slane %v2899_v31, 7  ;;  %v802_v23 = vrot.slane %v2903_v48, 7  ;;  %v829_v57 = vadd.f32 %v809_v44, %v223_v13 }
 0x1b0   : > { %v704_v52 = vpop.permute.xlu1 %703 }
 0x1b1   : > { %683 = vst [vmem:[#allocation2 + $0x30] sm:$0xff] %v675_v9  ;;  %v726_v16 = vadd.f32 %v704_v52, %v2765_v53  ;;  %v2939_v9 = vmul.f32 %v2504_v34, %v2504_v34  ;;  %v2943_v52 = vmul.f32 %v2507_v35, %v2507_v35  ;;  %v825_v34 = vsel %vm274_vm1, %v817_v3, %v813_v43 }
 0x1b2   : > { %v702_v61 = vpop.permute.xlu0 %701  ;;  %v814_v35 = vrot.slane %v2899_v31, 1 }
 0x1b3   : > { %v725_v12 = vadd.f32 %v702_v61, %v2771_v56  ;;  %734 = vst.msk [vmem:[#allocation2 + $0x8] sm:$0xff] %vm459_vm2, %v726_v16  ;;  %v821_v61 = vsel %vm274_vm1, %v813_v43, %v817_v3  ;;  %v799_v3 = vrot.slane %v2939_v9, 7  ;;  %v803_v44 = vrot.slane %v2943_v52, 7  ;;  %v863_v43 = vld [vmem:[%s2443_s19 + $0x21] sm:$0x1] }
 0x1b4   : > { %v708_v14 = vpop.permute.xlu1 %707 }
 0x1b5   : > { %733 = vst.msk [vmem:[#allocation2] sm:$0xff] %vm459_vm2, %v725_v12  ;;  %v728_v20 = vadd.f32 %v708_v14, %v2777_v60  ;;  %v885_v12 = vmul.f32 %v881_v28, %v881_v28  ;;  %v830_v14 = vadd.f32 %v805_v49, %v2856_v37  ;;  %v810_v37 = vsel %vm257_vm0, %v802_v23, %v798_v27 }
 0x1b6   : > { %v706_v25 = vpop.permute.xlu0 %705  ;;  %v866_v49 = vmul.f32 %v862_v18, %v862_v18  ;;  %v2999_v18 = vmul.f32 %v2527_v58, %v2527_v58 }
 0x1b7   : > { %v727_v32 = vadd.f32 %v706_v25, %v2783_v63  ;;  %736 = vst.msk [vmem:[#allocation2 + $0x18] sm:$0xff] %vm459_vm2, %v728_v20  ;;  %v2956_v20 = vmul.f32 0.11111111, %v2773_v59  ;;  %v2958_v25 = vadd.f32 %v869_v54, %v857_v51  ;;  %v854_v59 = vld [vmem:[%s2443_s19 + $0x10] sm:$0x1]  ;;  %v2975_v45 = vadd.f32 %v897_v38, %v885_v12 }
 0x1b8   : > { %v712_v39 = vpop.permute.xlu1 %711  ;;  %v838_v28 = vadd.f32 %v830_v14, %v825_v34  ;;  %v822_v54 = vsel %vm274_vm1, %v814_v35, %v818_v6  ;;  %v858_v12 = vmul.f32 %v854_v59, %v854_v59  ;;  %v882_v38 = vld [vmem:[%s2443_s19 + $0x1f] sm:$0x1]  ;;  %v815_v14 = vrot.slane %v2939_v9, 1  ;;  %v855_v34 = vld [vmem:[%s2443_s19 + $0x20] sm:$0x1] }
 0x1b9   : > { %735 = vst.msk [vmem:[#allocation2 + $0x10] sm:$0xff] %vm459_vm2, %v727_v32  ;;  %v730_v40 = vadd.f32 %v712_v39, %v2787_v0  ;;  %v2965_v32 = vmul.f32 %v2885_v19, %v2885_v19  ;;  %v2969_v39 = vadd.f32 %v829_v57, %v821_v61  ;;  %v894_v57 = vmul.f32 %v890_v26, %v890_v26 }
 0x1ba   : > { %v710_v50 = vpop.permute.xlu0 %709  ;;  %v807_v26 = vsel %vm257_vm0, %v799_v3, %v803_v44 }
 0x1bb   : > { %v729_v55 = vadd.f32 %v710_v50, %v2791_v4  ;;  %738 = vst.msk [vmem:[#allocation2 + $0x28] sm:$0xff] %vm459_vm2, %v730_v40  ;;  %v806_v50 = vsel %vm257_vm0, %v798_v27, %v802_v23  ;;  %v867_v27 = vmul.f32 %v863_v43, %v863_v43  ;;  %v886_v43 = vmul.f32 %v882_v38, %v882_v38 }
 0x1bc   : > { %v716_v16 = vpop.permute.xlu1 %715  ;;  %v832_v59 = vadd.f32 %v806_v50, %v2903_v48  ;;  %v834_v48 = vadd.f32 %v807_v26, %v2943_v52 }
 0x1bd   : > { %737 = vst.msk [vmem:[#allocation2 + $0x20] sm:$0xff] %vm459_vm2, %v729_v55  ;;  %v732_v13 = vadd.f32 %v716_v16, %v2795_v7  ;;  %v831_v55 = vadd.f32 %v810_v37, %v2899_v31  ;;  %v891_v16 = vld [vmem:[%s2443_s19 + $0x2e] sm:$0x1]  ;;  %v2995_v31 = vmul.f32 %v2518_v47, %v2518_v47  ;;  %v826_v37 = vsel %vm274_vm1, %v818_v6, %v814_v35 }
 0x1be   : > { %v714_v21 = vpop.permute.xlu0 %713  ;;  %v898_v47 = vmul.f32 2.0, %v894_v57  ;;  %v859_v6 = vmul.f32 %v855_v34, %v855_v34  ;;  %v892_v34 = vld [vmem:[%s2443_s19 + $0x3e] sm:$0x1] }
 0x1bf   : > { %v731_v33 = vadd.f32 %v714_v21, %v2799_v8  ;;  %740 = vst.msk [vmem:[#allocation2 + $0x38] sm:$0xff] %vm459_vm2, %v732_v13  ;;  %v819_v13 = vrot.slane %v2943_v52, 1  ;;  %v870_v21 = vmul.f32 2.0, %v866_v49  ;;  %v839_v50 = vadd.f32 %v831_v55, %v822_v54  ;;  %v856_v52 = vld [vmem:[%s2443_s19 + $0x30] sm:$0x1] }
 0x1c0   : > { %v744_v40 = vpop.permute.xlu1 %743 }
 0x1c1   : > { %739 = vst.msk [vmem:[#allocation2 + $0x30] sm:$0xff] %vm459_vm2, %v731_v33  ;;  %v766_v51 = vadd.f32 %v744_v40, %v2765_v53  ;;  %v811_v53 = vsel %vm257_vm0, %v803_v44, %v799_v3  ;;  %v895_v33 = vmul.f32 %v891_v16, %v891_v16  ;;  %v823_v49 = vsel %vm274_vm1, %v815_v14, %v819_v13 }
 0x1c2   : > { %v742_v61 = vpop.permute.xlu0 %741  ;;  %v833_v35 = vadd.f32 %v811_v53, %v2939_v9  ;;  %v800_v44 = vrot.slane %v2995_v31, 7  ;;  %v827_v57 = vsel %vm274_vm1, %v819_v13, %v815_v14  ;;  %v816_v14 = vrot.slane %v2995_v31, 1 }
 0x1c3   : > { %v765_v23 = vadd.f32 %v742_v61, %v2771_v56  ;;  %774 = vst.msk [vmem:[#allocation2 + $0x8] sm:$0xff] %vm500_vm3, %v766_v51  ;;  %v883_v51 = vld [vmem:[%s2443_s19 + $0x2f] sm:$0x1]  ;;  %v871_v61 = vmul.f32 2.0, %v867_v27  ;;  %v899_v9 = vmul.f32 2.0, %v895_v33  ;;  %v874_v27 = vadd.f32 %v870_v21, %v858_v12 }
 0x1c4   : > { %v748_v56 = vpop.permute.xlu1 %747  ;;  %v887_v16 = vmul.f32 %v883_v51, %v883_v51  ;;  %v3023_v26 = vadd.f32 %v833_v35, %v823_v49  ;;  %v820_v12 = vrot.slane %v2999_v18, 1  ;;  %v884_v51 = vld [vmem:[%s2443_s19 + $0x3f] sm:$0x1] }
 0x1c5   : > { %773 = vst.msk [vmem:[#allocation2] sm:$0xff] %vm500_vm3, %v765_v23  ;;  %v768_v40 = vadd.f32 %v748_v56, %v2777_v60  ;;  %v804_v60 = vrot.slane %v2999_v18, 7  ;;  %v902_v23 = vadd.f32 %v898_v47, %v886_v43  ;;  %v3025_v54 = vadd.f32 %v871_v61, %v859_v6 }
 0x1c6   : > { %v746_v58 = vpop.permute.xlu0 %745  ;;  %v903_v43 = vadd.f32 %v899_v9, %v887_v16 }
 0x1c7   : > { %v767_v3 = vadd.f32 %v746_v58, %v2783_v63  ;;  %776 = vst.msk [vmem:[#allocation2 + $0x18] sm:$0xff] %vm500_vm3, %v768_v40  ;;  %v840_v63 = vadd.f32 %v832_v59, %v826_v37  ;;  %v842_v37 = vadd.f32 %v834_v48, %v827_v57  ;;  %v808_v33 = vsel %vm257_vm0, %v800_v44, %v804_v60 }
 0x1c8   : > { %v752_v38 = vpop.permute.xlu1 %751  ;;  %v812_v47 = vsel %vm257_vm0, %v804_v60, %v800_v44  ;;  %v3037_v40 = vmul.f32 %v856_v52, %v856_v52  ;;  %v828_v48 = vsel %vm274_vm1, %v820_v12, %v816_v14 }
 0x1c9   : > { %775 = vst.msk [vmem:[#allocation2 + $0x10] sm:$0xff] %vm500_vm3, %v767_v3  ;;  %v770_v53 = vadd.f32 %v752_v38, %v2787_v0  ;;  %v864_v0 = vld [vmem:[%s2443_s19 + $0x31] sm:$0x1] }
 0x1ca   : > { %v782_v56 = vld [vmem:[#allocation2 + $0x8] sm:$0xff]  ;;  %v750_v55 = vpop.permute.xlu0 %749  ;;  %v868_v61 = vmul.f32 %v864_v0, %v864_v0 }
 0x1cb   : > { %v790_v13 = vmul.f32 0.11111111, %v782_v56  ;;  %846 = vst [vmem:[#allocation2 + $0x8] sm:$0xff] %v838_v28  ;;  %v769_v21 = vadd.f32 %v750_v55, %v2791_v4  ;;  %778 = vst.msk [vmem:[#allocation2 + $0x28] sm:$0xff] %vm500_vm3, %v770_v53  ;;  %v896_v28 = vmul.f32 %v892_v34, %v892_v34 }
 0x1cc   : > { %v781_v59 = vld [vmem:[#allocation2] sm:$0xff]  ;;  %905 = vst [vmem:[#allocation2 + $0xf] sm:$0x1] %v2975_v45  ;;  %v756_v58 = vpop.permute.xlu1 %755  ;;  %v872_v53 = vmul.f32 2.0, %v868_v61 }
 0x1cd   : > { %v789_v4 = vmul.f32 0.11111111, %v781_v59  ;;  %845 = vst [vmem:[#allocation2] sm:$0xff] %v2969_v39  ;;  %v3042_v49 = vmul.f32 %v790_v13, %v2852_v10  ;;  %v3045_v35 = vmul.f32 %v2874_v11, %v790_v13  ;;  %777 = vst.msk [vmem:[#allocation2 + $0x20] sm:$0xff] %vm500_vm3, %v769_v21  ;;  %v772_v45 = vadd.f32 %v756_v58, %v2795_v7 }
 0x1ce   : > { %877 = vst [vmem:[#allocation2] sm:$0x1] %v2958_v25  ;;  %v784_v6 = vld [vmem:[#allocation2 + $0x18] sm:$0xff]  ;;  %v754_v3 = vpop.permute.xlu0 %753  ;;  %v836_v39 = vadd.f32 %v808_v33, %v2999_v18  ;;  %v3053_v44 = vmul.f32 %v790_v13, %v790_v13  ;;  %v888_v7 = vmul.f32 %v884_v51, %v884_v51  ;;  %v900_v16 = vmul.f32 2.0, %v896_v28 }
 0x1cf   : > { %3999 = vst [vmem:[#allocation12_spill] sm:$0xff] %v3042_v49  ;;  %4000 = vst [vmem:[#allocation13_spill] sm:$0xff] %v3045_v35  ;;  %v3056_v10 = vmul.f32 %v789_v4, %v2861_v15  ;;  %v3059_v11 = vmul.f32 %v2882_v42, %v789_v4  ;;  %v792_v60 = vmul.f32 0.11111111, %v784_v6  ;;  %v771_v57 = vadd.f32 %v754_v3, %v2799_v8 }
 0x1d0   : > { %848 = vst [vmem:[#allocation2 + $0x18] sm:$0xff] %v840_v63  ;;  %780 = vst.msk [vmem:[#allocation2 + $0x38] sm:$0xff] %vm500_vm3, %v772_v45  ;;  %v783_v25 = vld [vmem:[#allocation2 + $0x10] sm:$0xff]  ;;  %v3063_v9 = vmul.f32 %v789_v4, %v789_v4  ;;  %v3067_v18 = vadd.f32 %v3053_v44, %v2879_v29  ;;  %v824_v63 = vsel %vm274_vm1, %v816_v14, %v820_v12  ;;  %v1732_v33 = vmul.f32 2.0, %v2956_v20 }
 0x1d1   : > { %4001 = vst [vmem:[#allocation14_spill] sm:$0xff] %v3056_v10  ;;  %4002 = vst [vmem:[#allocation15_spill] sm:$0xff] %v3059_v11  ;;  %v791_v15 = vmul.f32 0.11111111, %v783_v25  ;;  %v3070_v42 = vmul.f32 %v792_v60, %v2865_v36  ;;  %v3073_v38 = vmul.f32 %v2895_v24, %v792_v60  ;;  %v904_v14 = vadd.f32 %v900_v16, %v888_v7  ;;  %v3303_v11 = vld [vmem:[%s2451_s29 + $0x20] sm:$0xff] }
 0x1d2   : > { %906 = vst [vmem:[#allocation2 + $0x1f] sm:$0x1] %v902_v23  ;;  %847 = vst [vmem:[#allocation2 + $0x10] sm:$0xff] %v839_v50  ;;  %v786_v8 = vld [vmem:[#allocation2 + $0x28] sm:$0xff]  ;;  %v835_v23 = vadd.f32 %v812_v47, %v2995_v31  ;;  %v3081_v52 = vadd.f32 %v3063_v9, %v2892_v22  ;;  %v3083_v50 = vmul.f32 %v792_v60, %v792_v60  ;;  %v1729_v31 = vmul.f32 2.0, %v2923_v30 }
 0x1d3   : > { %4003 = vst [vmem:[#allocation16_spill] sm:$0xff] %v3070_v42  ;;  %4004 = vst [vmem:[#allocation17_spill] sm:$0xff] %v3073_v38  ;;  %v3086_v36 = vmul.f32 %v791_v15, %v2868_v17  ;;  %v3089_v24 = vmul.f32 %v2906_v5, %v791_v15  ;;  %v794_v34 = vmul.f32 0.11111111, %v786_v8  ;;  %v3091_v56 = vld [vmem:[#allocation2 + $0x8] sm:$0xff]  ;;  %v3096_v12 = vmul.f32 %v791_v15, %v791_v15 }
 0x1d4   : > { %878 = vst [vmem:[#allocation2 + $0x10] sm:$0x1] %v874_v27  ;;  %779 = vst.msk [vmem:[#allocation2 + $0x30] sm:$0xff] %vm500_vm3, %v771_v57  ;;  %v844_v27 = vadd.f32 %v836_v39, %v828_v48  ;;  %v785_v55 = vld [vmem:[#allocation2 + $0x20] sm:$0xff]  ;;  %919 = vrot.lane.b32.xlu1 %v3091_v56, %s2256_s20  ;;  %v3100_v17 = vadd.f32 %v3083_v50, %v2917_v2  ;;  %v523_v5 = vmul.f32 0.11111111, %v2779_v62 }
 0x1d5   : > { %4005 = vst [vmem:[#allocation18_spill] sm:$0xff] %v3086_v36  ;;  %4006 = vst [vmem:[#allocation19_spill] sm:$0xff] %v3089_v24  ;;  %v793_v13 = vmul.f32 0.11111111, %v785_v55  ;;  %v3105_v21 = vmul.f32 %v794_v34, %v2885_v19  ;;  %v3110_v0 = vld [vmem:[#allocation2] sm:$0xff]  ;;  %v843_v59 = vadd.f32 %v835_v23, %v824_v63  ;;  %v3118_v62 = vadd.f32 %v3096_v12, %v2913_v41 }
 0x1d6   : > { %850 = vst [vmem:[#allocation2 + $0x28] sm:$0xff] %v842_v37  ;;  %4007 = vst [vmem:[#allocation20_spill] sm:$0xff] %v3096_v12  ;;  %v3108_v37 = vmul.f32 %v2926_v46, %v794_v34  ;;  %917 = vrot.lane.b32.xlu0 %v3110_v0, %s2256_s20  ;;  %v3120_v19 = vmul.f32 %v794_v34, %v794_v34  ;;  %v876_v47 = vadd.f32 %v872_v53, %v3037_v40  ;;  %v1185_v24 = vld [vmem:[%s2451_s29 + $0xf] sm:$0x1] }
 0x1d7   : > { %907 = vst [vmem:[#allocation2 + $0x2f] sm:$0x1] %v903_v43  ;;  %4008 = vst [vmem:[#allocation21_spill] sm:$0xff] %v3100_v17  ;;  %v788_v43 = vld [vmem:[#allocation2 + $0x38] sm:$0xff]  ;;  %v3123_v46 = vmul.f32 %v793_v13, %v2923_v30  ;;  %v3134_v28 = vmul.f32 %v2923_v30, %v2923_v30  ;;  %v3136_v58 = vmul.f32 %v793_v13, %v793_v13  ;;  %v1731_v48 = vmul.f32 2.0, %v523_v5 }
 0x1d8   : > { %849 = vst [vmem:[#allocation2 + $0x20] sm:$0xff] %v3023_v26  ;;  %4009 = vst [vmem:[#allocation22_spill] sm:$0xff] %v3105_v21  ;;  %v3125_v26 = vmul.f32 %v1729_v31, %v793_v13  ;;  %v796_v51 = vmul.f32 0.11111111, %v788_v43  ;;  %v3140_v4 = vadd.f32 %v3120_v19, %v2965_v32  ;;  %v3151_v3 = vmul.f32 %v2956_v20, %v2956_v20 }
 0x1d9   : > { %4010 = vst [vmem:[#allocation23_spill] sm:$0xff] %v3108_v37  ;;  %879 = vst [vmem:[#allocation2 + $0x20] sm:$0x1] %v3025_v54  ;;  %v3128_v54 = vld [vmem:[#allocation2 + $0x18] sm:$0xff]  ;;  %v3159_v60 = vadd.f32 %v3136_v58, %v3134_v28  ;;  %v3175_v15 = vmul.f32 %v523_v5, %v523_v5  ;;  %v974_v34 = vmul.f32 2.0, %v3091_v56 }
 0x1da   : > { %4011 = vst [vmem:[#allocation24_spill] sm:$0xff] %v3118_v62  ;;  %4012 = vst [vmem:[#allocation25_spill] sm:$0xff] %v3120_v19  ;;  %923 = vrot.lane.b32.xlu1 %v3128_v54, %s2256_s20  ;;  %v3143_v40 = vmul.f32 %v796_v51, %v2956_v20  ;;  %v3145_v6 = vmul.f32 %v1732_v33, %v796_v51  ;;  %v3153_v30 = vmul.f32 %v796_v51, %v796_v51  ;;  %v1166_v37 = vld [vmem:[%s2451_s29 + $0x11] sm:$0x1] }
 0x1db   : > { %4013 = vst [vmem:[#allocation26_spill] sm:$0xff] %v3123_v46  ;;  %4014 = vst [vmem:[#allocation27_spill] sm:$0xff] %v3125_v26  ;;  %v787_v45 = vld [vmem:[#allocation2 + $0x30] sm:$0xff]  ;;  %v976_v31 = vmul.f32 2.0, %v3128_v54 }
 0x1dc   : > { %852 = vst [vmem:[#allocation2 + $0x38] sm:$0xff] %v844_v27  ;;  %4015 = vst [vmem:[#allocation28_spill] sm:$0xff] %v3134_v28  ;;  %v3147_v61 = vld [vmem:[#allocation2 + $0x10] sm:$0xff]  ;;  %v795_v39 = vmul.f32 0.11111111, %v787_v45  ;;  %v3165_v25 = vadd.f32 %v3153_v30, %v3151_v3  ;;  %v973_v27 = vmul.f32 2.0, %v3110_v0 }
 0x1dd   : > { %908 = vst [vmem:[#allocation2 + $0x3f] sm:$0x1] %v904_v14  ;;  %4016 = vst [vmem:[#allocation29_spill] sm:$0xff] %v3136_v58  ;;  %921 = vrot.lane.b32.xlu0 %v3147_v61, %s2256_s20  ;;  %v975_v55 = vmul.f32 2.0, %v3147_v61 }
 0x1de   : > { %4017 = vst [vmem:[#allocation30_spill] sm:$0xff] %v3140_v4  ;;  %4018 = vst [vmem:[#allocation31_spill] sm:$0xff] %v3143_v40  ;;  %v3161_v7 = vld [vmem:[#allocation2 + $0x28] sm:$0xff]  ;;  %v3167_v20 = vmul.f32 %v795_v39, %v523_v5  ;;  %v3169_v57 = vmul.f32 %v1731_v48, %v795_v39  ;;  %v3177_v63 = vmul.f32 %v795_v39, %v795_v39 }
 0x1df   : > { %4019 = vst [vmem:[#allocation32_spill] sm:$0xff] %v3145_v6  ;;  %4020 = vst [vmem:[#allocation33_spill] sm:$0xff] %v3151_v3  ;;  %927 = vrot.lane.b32.xlu1 %v3161_v7, %s2256_s20  ;;  %v978_v14 = vmul.f32 2.0, %v3161_v7 }
 0x1e0   : > { %4021 = vst [vmem:[#allocation34_spill] sm:$0xff] %v3153_v30  ;;  %851 = vst [vmem:[#allocation2 + $0x30] sm:$0xff] %v843_v59  ;;  %v3173_v16 = vld [vmem:[#allocation2 + $0x20] sm:$0xff]  ;;  %v3185_v23 = vadd.f32 %v3177_v63, %v3175_v15  ;;  %v1189_v30 = vmul.f32 %v1185_v24, %v1185_v24 }
 0x1e1   : > { %4022 = vst [vmem:[#allocation35_spill] sm:$0xff] %v3159_v60  ;;  %880 = vst [vmem:[#allocation2 + $0x30] sm:$0x1] %v876_v47  ;;  %925 = vrot.lane.b32.xlu0 %v3173_v16, %s2256_s20  ;;  %v977_v5 = vmul.f32 2.0, %v3173_v16 }
 0x1e2   : > { %4023 = vst [vmem:[#allocation36_spill] sm:$0xff] %v3165_v25  ;;  %4024 = vst [vmem:[#allocation37_spill] sm:$0xff] %v3167_v20 }
 0x1e3   : > { %4025 = vst [vmem:[#allocation38_spill] sm:$0xff] %v3169_v57  ;;  %4026 = vst [vmem:[#allocation39_spill] sm:$0xff] %v3175_v15  ;;  %v1463_v15 = vld [vmem:[%s2443_s19 + $0x20] sm:$0x1] }
 0x1e4   : > { %4027 = vst [vmem:[#allocation40_spill] sm:$0xff] %v3177_v63  ;;  %v3181_v8 = vld [vmem:[#allocation2 + $0x38] sm:$0xff]  ;;  %4028 = vst [vmem:[#allocation41_spill] sm:$0xff] %v3185_v23  ;;  %v1158_v63 = vld [vmem:[%s2451_s29 + $0x10] sm:$0x1] }
 0x1e5   : > { %931 = vrot.lane.b32.xlu1 %v3181_v8, %s2256_s20  ;;  %v980_v13 = vmul.f32 2.0, %v3181_v8  ;;  %v1162_v24 = vmul.f32 %v1158_v63, %v1158_v63 }
 0x1e8   : > { %v3189_v53 = vld [vmem:[#allocation2 + $0x30] sm:$0xff] }
 0x1e9   : > { %929 = vrot.lane.b32.xlu0 %v3189_v53, %s2256_s20  ;;  %935 = vrot.lane.b32.xlu1 %v3091_v56, %s2257_s5  ;;  %v979_v33 = vmul.f32 2.0, %v3189_v53 }
 0x1ed   : > { %933 = vrot.lane.b32.xlu0 %v3110_v0, %s2257_s5  ;;  %939 = vrot.lane.b32.xlu1 %v3128_v54, %s2257_s5 }
 0x1f1   : > { %937 = vrot.lane.b32.xlu0 %v3147_v61, %s2257_s5  ;;  %943 = vrot.lane.b32.xlu1 %v3161_v7, %s2257_s5 }
 0x1f5   : > { %941 = vrot.lane.b32.xlu0 %v3173_v16, %s2257_s5  ;;  %947 = vrot.lane.b32.xlu1 %v3181_v8, %s2257_s5 }
 0x1f9   : > { %945 = vrot.lane.b32.xlu0 %v3189_v53, %s2257_s5  ;;  %991 = vrot.lane.b32.xlu1 %v974_v34, %s2257_s5 }
 0x1fd   : > { %989 = vrot.lane.b32.xlu0 %v973_v27, %s2257_s5  ;;  %995 = vrot.lane.b32.xlu1 %v976_v31, %s2257_s5 }
 0x201   : > { %993 = vrot.lane.b32.xlu0 %v975_v55, %s2257_s5  ;;  %999 = vrot.lane.b32.xlu1 %v978_v14, %s2257_s5 }
 0x205   : > { %997 = vrot.lane.b32.xlu0 %v977_v5, %s2257_s5  ;;  %1003 = vrot.lane.b32.xlu1 %v980_v13, %s2257_s5 }
 0x209   : > { %1001 = vrot.lane.b32.xlu0 %v979_v33, %s2257_s5  ;;  %1031 = vrot.lane.b32.xlu1 %v974_v34, %s2256_s20 }
 0x20d   : > { %1029 = vrot.lane.b32.xlu0 %v973_v27, %s2256_s20  ;;  %1035 = vrot.lane.b32.xlu1 %v976_v31, %s2256_s20 }
 0x211   : > { %1033 = vrot.lane.b32.xlu0 %v975_v55, %s2256_s20  ;;  %1039 = vrot.lane.b32.xlu1 %v978_v14, %s2256_s20 }
 0x215   : > { %1037 = vrot.lane.b32.xlu0 %v977_v5, %s2256_s20  ;;  %1043 = vrot.lane.b32.xlu1 %v980_v13, %s2256_s20 }
 0x219   : > { %1041 = vrot.lane.b32.xlu0 %v979_v33, %s2256_s20 }
 0x246   : > { %v920_v59 = vpop.permute.xlu1 %919 }
 0x247   : > { %v950_v34 = vadd.f32 %v920_v59, %v3091_v56 }
 0x248   : > { %v918_v43 = vpop.permute.xlu0 %917 }
 0x249   : > { %v949_v14 = vadd.f32 %v918_v43, %v3110_v0 }
 0x24c   : > { %v924_v47 = vpop.permute.xlu1 %923 }
 0x24d   : > { %v952_v5 = vadd.f32 %v924_v47, %v3128_v54 }
 0x24f   : > { %v922_v51 = vpop.permute.xlu0 %921 }
 0x250   : > { %v951_v46 = vadd.f32 %v922_v51, %v3147_v61 }
 0x251   : > { %v928_v45 = vpop.permute.xlu1 %927 }
 0x252   : > { %v954_v21 = vadd.f32 %v928_v45, %v3161_v7 }
 0x253   : > { %v926_v48 = vpop.permute.xlu0 %925 }
 0x254   : > { %v953_v43 = vadd.f32 %v926_v48, %v3173_v16 }
 0x257   : > { %v932_v39 = vpop.permute.xlu1 %931 }
 0x258   : > { %v956_v47 = vadd.f32 %v932_v39, %v3181_v8 }
 0x25b   : > { %v930_v27 = vpop.permute.xlu0 %929  ;;  %v936_v31 = vpop.permute.xlu1 %935 }
 0x25c   : > { %v958_v55 = vadd.f32 %v950_v34, %v936_v31 }
 0x25e   : > { %966 = vst [vmem:[#allocation2 + $0x8] sm:$0xff] %v958_v55  ;;  %v955_v55 = vadd.f32 %v930_v27, %v3189_v53 }
 0x25f   : > { %v934_v20 = vpop.permute.xlu0 %933  ;;  %v940_v33 = vpop.permute.xlu1 %939 }
 0x260   : > { %v957_v13 = vadd.f32 %v949_v14, %v934_v20  ;;  %v960_v40 = vadd.f32 %v952_v5, %v940_v33 }
 0x262   : > { %965 = vst [vmem:[#allocation2] sm:$0xff] %v957_v13  ;;  %968 = vst [vmem:[#allocation2 + $0x18] sm:$0xff] %v960_v40 }
 0x263   : > { %v938_v36 = vpop.permute.xlu0 %937  ;;  %v944_v42 = vpop.permute.xlu1 %943 }
 0x264   : > { %v959_v59 = vadd.f32 %v951_v46, %v938_v36  ;;  %v962_v10 = vadd.f32 %v954_v21, %v944_v42  ;;  %v3243_v46 = vld [vmem:[%s2451_s29] sm:$0xff] }
 0x265   : > { %v3247_v40 = vmul.f32 %v3243_v46, %v3243_v46 }
 0x266   : > { %967 = vst [vmem:[#allocation2 + $0x10] sm:$0xff] %v959_v59  ;;  %970 = vst [vmem:[#allocation2 + $0x28] sm:$0xff] %v962_v10  ;;  %v3250_v10 = vld [vmem:[%s2451_s29 + $0x8] sm:$0xff]  ;;  %v1165_v59 = vld [vmem:[%s2451_s29 + $0x1] sm:$0x1] }
 0x267   : > { %v942_v20 = vpop.permute.xlu0 %941  ;;  %v948_v31 = vpop.permute.xlu1 %947  ;;  %v232_v48 = vmul.f32 %v3250_v10, %v3250_v10  ;;  %v1101_v13 = vrot.slane %v3247_v40, 7 }
 0x268   : > { %v961_v34 = vadd.f32 %v953_v43, %v942_v20  ;;  %v964_v51 = vadd.f32 %v956_v47, %v948_v31  ;;  %v3262_v47 = vld [vmem:[%s2451_s29 + $0x10] sm:$0xff] }
 0x269   : > { %v1105_v33 = vrot.slane %v232_v48, 7  ;;  %v3266_v20 = vmul.f32 %v3262_v47, %v3262_v47 }
 0x26a   : > { %969 = vst [vmem:[#allocation2 + $0x20] sm:$0xff] %v961_v34  ;;  %972 = vst [vmem:[#allocation2 + $0x38] sm:$0xff] %v964_v51  ;;  %v3269_v34 = vld [vmem:[%s2451_s29 + $0x18] sm:$0xff] }
 0x26b   : > { %v946_v45 = vpop.permute.xlu0 %945  ;;  %v992_v42 = vpop.permute.xlu1 %991  ;;  %v3273_v31 = vmul.f32 %v3269_v34, %v3269_v34  ;;  %v1109_v38 = vsel %vm257_vm0, %v1101_v13, %v1105_v33  ;;  %v1118_v35 = vrot.slane %v3266_v20, 1 }
 0x26c   : > { %v963_v36 = vadd.f32 %v955_v55, %v946_v45  ;;  %v1014_v21 = vadd.f32 %v992_v42, %v3091_v56  ;;  %v1169_v45 = vmul.f32 %v1165_v59, %v1165_v59  ;;  %v1113_v42 = vsel %vm257_vm0, %v1105_v33, %v1101_v13  ;;  %v3310_v33 = vld [vmem:[%s2451_s29 + $0x28] sm:$0xff] }
 0x26d   : > { %v1106_v59 = vrot.slane %v3273_v31, 7  ;;  %v1133_v6 = vadd.f32 %v1113_v42, %v3247_v40  ;;  %v3307_v13 = vmul.f32 %v3303_v11, %v3303_v11 }
 0x26e   : > { %971 = vst [vmem:[#allocation2 + $0x30] sm:$0xff] %v963_v36  ;;  %1022 = vst.msk [vmem:[#allocation2 + $0x8] sm:$0xff] %vm459_vm2, %v1014_v21  ;;  %v1117_v21 = vrot.slane %v3247_v40, 1  ;;  %v1173_v26 = vmul.f32 2.0, %v1169_v45  ;;  %v1122_v40 = vrot.slane %v3273_v31, 1 }
 0x26f   : > { %v990_v39 = vpop.permute.xlu0 %989  ;;  %v996_v14 = vpop.permute.xlu1 %995  ;;  %v1194_v45 = vld [vmem:[%s2451_s29 + $0x1e] sm:$0x1] }
 0x270   : > { %v1013_v27 = vadd.f32 %v990_v39, %v3110_v0  ;;  %v1016_v5 = vadd.f32 %v996_v14, %v3128_v54  ;;  %v1121_v39 = vrot.slane %v232_v48, 1  ;;  %v1198_v58 = vmul.f32 %v1194_v45, %v1194_v45  ;;  %v3338_v45 = vld [vmem:[%s2451_s29 + $0x30] sm:$0xff] }
 0x272   : > { %1021 = vst.msk [vmem:[#allocation2] sm:$0xff] %vm459_vm2, %v1013_v27  ;;  %1024 = vst.msk [vmem:[#allocation2 + $0x18] sm:$0xff] %vm459_vm2, %v1016_v5  ;;  %v1157_v27 = vld [vmem:[%s2451_s29] sm:$0x1]  ;;  %v1193_v5 = vld [vmem:[%s2451_s29 + $0xe] sm:$0x1]  ;;  %v1129_v60 = vsel %vm274_vm1, %v1121_v39, %v1117_v21 }
 0x273   : > { %v994_v43 = vpop.permute.xlu0 %993  ;;  %v1000_v55 = vpop.permute.xlu1 %999  ;;  %v1161_v49 = vmul.f32 %v1157_v27, %v1157_v27  ;;  %v1170_v27 = vmul.f32 %v1166_v37, %v1166_v37  ;;  %v1134_v37 = vadd.f32 %v1109_v38, %v232_v48 }
 0x274   : > { %v1015_v51 = vadd.f32 %v994_v43, %v3147_v61  ;;  %v1018_v36 = vadd.f32 %v1000_v55, %v3161_v7  ;;  %v1102_v43 = vrot.slane %v3266_v20, 7 }
 0x275   : > { %v3319_v23 = vadd.f32 %v1173_v26, %v1161_v49  ;;  %v1186_v26 = vld [vmem:[%s2451_s29 + $0x1f] sm:$0x1] }
 0x276   : > { %1023 = vst.msk [vmem:[#allocation2 + $0x10] sm:$0xff] %vm459_vm2, %v1015_v51  ;;  %1026 = vst.msk [vmem:[#allocation2 + $0x28] sm:$0xff] %vm459_vm2, %v1018_v36  ;;  %v1125_v36 = vsel %vm274_vm1, %v1117_v21, %v1121_v39  ;;  %v1110_v38 = vsel %vm257_vm0, %v1102_v43, %v1106_v59  ;;  %v1195_v39 = vld [vmem:[%s2451_s29 + $0x2e] sm:$0x1] }
 0x277   : > { %v998_v14 = vpop.permute.xlu0 %997  ;;  %v1004_v57 = vpop.permute.xlu1 %1003  ;;  %v1199_v19 = vmul.f32 %v1195_v39, %v1195_v39 }
 0x278   : > { %v1017_v55 = vadd.f32 %v998_v14, %v3173_v16  ;;  %v1020_v51 = vadd.f32 %v1004_v57, %v3181_v8  ;;  %v1197_v14 = vmul.f32 %v1193_v5, %v1193_v5  ;;  %v1114_v57 = vsel %vm257_vm0, %v1106_v59, %v1102_v43 }
 0x279   : > { %v3314_v5 = vmul.f32 %v3310_v33, %v3310_v33  ;;  %v1135_v49 = vadd.f32 %v1114_v57, %v3266_v20  ;;  %v3342_v43 = vmul.f32 %v3338_v45, %v3338_v45  ;;  %v1136_v59 = vadd.f32 %v1110_v38, %v3273_v31  ;;  %v1167_v57 = vld [vmem:[%s2451_s29 + $0x21] sm:$0x1] }
 0x27a   : > { %1025 = vst.msk [vmem:[#allocation2 + $0x20] sm:$0xff] %vm459_vm2, %v1017_v55  ;;  %1028 = vst.msk [vmem:[#allocation2 + $0x38] sm:$0xff] %vm459_vm2, %v1020_v51  ;;  %v3317_v51 = vadd.f32 %v1133_v6, %v1125_v36  ;;  %v1201_v62 = vmul.f32 2.0, %v1197_v14  ;;  %v1126_v6 = vsel %vm274_vm1, %v1118_v35, %v1122_v40  ;;  %v1142_v14 = vadd.f32 %v1134_v37, %v1129_v60 }
 0x27b   : > { %v1002_v42 = vpop.permute.xlu0 %1001  ;;  %v1032_v25 = vpop.permute.xlu1 %1031  ;;  %v1107_v21 = vrot.slane %v3314_v5, 7  ;;  %v1130_v37 = vsel %vm274_vm1, %v1122_v40, %v1118_v35  ;;  %v1104_v40 = vrot.slane %v3342_v43, 7 }
 0x27c   : > { %v1019_v55 = vadd.f32 %v1002_v42, %v3189_v53  ;;  %v1054_v4 = vadd.f32 %v1032_v25, %v3091_v56  ;;  %v1174_v56 = vmul.f32 2.0, %v1170_v27  ;;  %v1103_v25 = vrot.slane %v3307_v13, 7 }
 0x27d   : > { %v1190_v42 = vmul.f32 %v1186_v26, %v1186_v26  ;;  %v1205_v27 = vadd.f32 %v1201_v62, %v1189_v30  ;;  %v1187_v30 = vld [vmem:[%s2451_s29 + $0x2f] sm:$0x1]  ;;  %v1144_v26 = vadd.f32 %v1136_v59, %v1130_v37 }
 0x27e   : > { %1027 = vst.msk [vmem:[#allocation2 + $0x30] sm:$0xff] %vm459_vm2, %v1019_v55  ;;  %v3355_v55 = vadd.f32 %v1135_v49, %v1126_v6  ;;  %v3360_v17 = vadd.f32 %v1174_v56, %v1162_v24  ;;  %v1111_v62 = vsel %vm257_vm0, %v1103_v25, %v1107_v21  ;;  %v1171_v49 = vmul.f32 %v1167_v57, %v1167_v57 }
 0x27f   : > { %v1030_v48 = vpop.permute.xlu0 %1029  ;;  %1062 = vst.msk [vmem:[#allocation2 + $0x8] sm:$0xff] %vm500_vm3, %v1054_v4  ;;  %v1036_v20 = vpop.permute.xlu1 %1035  ;;  %v3345_v4 = vld [vmem:[%s2451_s29 + $0x38] sm:$0xff]  ;;  %v1191_v57 = vmul.f32 %v1187_v30, %v1187_v30 }
 0x280   : > { %v1053_v36 = vadd.f32 %v1030_v48, %v3110_v0  ;;  %v3349_v63 = vmul.f32 %v3345_v4, %v3345_v4  ;;  %v1202_v0 = vmul.f32 2.0, %v1198_v58  ;;  %v1056_v60 = vadd.f32 %v1036_v20, %v3128_v54  ;;  %v1159_v48 = vld [vmem:[%s2451_s29 + $0x20] sm:$0x1] }
 0x281   : > { %v1119_v58 = vrot.slane %v3307_v13, 1  ;;  %v1123_v54 = vrot.slane %v3314_v5, 1  ;;  %v1163_v56 = vmul.f32 %v1159_v48, %v1159_v48 }
 0x282   : > { %1061 = vst.msk [vmem:[#allocation2] sm:$0xff] %vm500_vm3, %v1053_v36  ;;  %1064 = vst.msk [vmem:[#allocation2 + $0x18] sm:$0xff] %vm500_vm3, %v1056_v60  ;;  %v1108_v38 = vrot.slane %v3349_v63, 7  ;;  %v1206_v24 = vadd.f32 %v1202_v0, %v1190_v42  ;;  %v1196_v36 = vld [vmem:[%s2451_s29 + $0x3e] sm:$0x1]  ;;  %v1115_v60 = vsel %vm257_vm0, %v1107_v21, %v1103_v25  ;;  %v1120_v42 = vrot.slane %v3342_v43, 1 }
 0x283   : > { %v1034_v31 = vpop.permute.xlu0 %1033  ;;  %v1040_v35 = vpop.permute.xlu1 %1039  ;;  %v1124_v0 = vrot.slane %v3349_v63, 1  ;;  %v1175_v25 = vmul.f32 2.0, %v1171_v49  ;;  %v1168_v21 = vld [vmem:[%s2451_s29 + $0x31] sm:$0x1]  ;;  %v1127_v30 = vsel %vm274_vm1, %v1119_v58, %v1123_v54 }
 0x284   : > { %v1055_v6 = vadd.f32 %v1034_v31, %v3147_v61  ;;  %v1058_v39 = vadd.f32 %v1040_v35, %v3161_v7  ;;  %v1138_v61 = vadd.f32 %v1111_v62, %v3314_v5  ;;  %v1203_v31 = vmul.f32 2.0, %v1199_v19  ;;  %v1515_v62 = vld [vmem:[%s2451_s29 + $0x2e] sm:$0x1] }
 0x285   : > { %v1131_v7 = vsel %vm274_vm1, %v1123_v54, %v1119_v58  ;;  %v1112_v19 = vsel %vm257_vm0, %v1104_v40, %v1108_v38  ;;  %v1172_v54 = vmul.f32 %v1168_v21, %v1168_v21 }
 0x286   : > { %v1070_v20 = vld [vmem:[#allocation2 + $0x8] sm:$0xff]  ;;  %1063 = vst.msk [vmem:[#allocation2 + $0x10] sm:$0xff] %vm500_vm3, %v1055_v6  ;;  %1066 = vst.msk [vmem:[#allocation2 + $0x28] sm:$0xff] %vm500_vm3, %v1058_v39  ;;  %v1137_v6 = vadd.f32 %v1115_v60, %v3307_v13  ;;  %v1146_v39 = vadd.f32 %v1138_v61, %v1131_v7  ;;  %v1160_v13 = vld [vmem:[%s2451_s29 + $0x30] sm:$0x1]  ;;  %v1132_v60 = vsel %vm274_vm1, %v1124_v0, %v1120_v42 }
 0x287   : > { %v3377_v12 = vmul.f32 0.11111111, %v1070_v20  ;;  %1150 = vst [vmem:[#allocation2 + $0x8] sm:$0xff] %v1142_v14  ;;  %v1038_v59 = vpop.permute.xlu0 %1037  ;;  %v1200_v14 = vmul.f32 %v1196_v36, %v1196_v36  ;;  %v1044_v37 = vpop.permute.xlu1 %1043  ;;  %v1207_v36 = vadd.f32 %v1203_v31, %v1191_v57  ;;  %v1116_v20 = vsel %vm257_vm0, %v1108_v38, %v1104_v40 }
 0x288   : > { %1209 = vst [vmem:[#allocation2 + $0xf] sm:$0x1] %v1205_v27  ;;  %v1057_v5 = vadd.f32 %v1038_v59, %v3173_v16  ;;  %v1188_v27 = vld [vmem:[%s2451_s29 + $0x3f] sm:$0x1]  ;;  %v1060_v49 = vadd.f32 %v1044_v37, %v3181_v8  ;;  %v1179_v31 = vadd.f32 %v1175_v25, %v1163_v56  ;;  %v1164_v21 = vmul.f32 %v1160_v13, %v1160_v13 }
 0x289   : > { %v1069_v48 = vld [vmem:[#allocation2] sm:$0xff]  ;;  %v1072_v35 = vld [vmem:[#allocation2 + $0x18] sm:$0xff]  ;;  %v1204_v38 = vmul.f32 2.0, %v1200_v14  ;;  %v1176_v56 = vmul.f32 2.0, %v1172_v54 }
 0x28a   : > { %v3395_v16 = vmul.f32 0.11111111, %v1069_v48  ;;  %1149 = vst [vmem:[#allocation2] sm:$0xff] %v3317_v51  ;;  %1065 = vst.msk [vmem:[#allocation2 + $0x20] sm:$0xff] %vm500_vm3, %v1057_v5  ;;  %v3402_v58 = vmul.f32 0.11111111, %v1072_v35  ;;  %v1140_v51 = vadd.f32 %v1112_v19, %v3349_v63  ;;  %v1145_v63 = vadd.f32 %v1137_v6, %v1127_v30 }
 0x28b   : > { %1181 = vst [vmem:[#allocation2] sm:$0x1] %v3319_v23  ;;  %1152 = vst [vmem:[#allocation2 + $0x18] sm:$0xff] %v1144_v26  ;;  %v1042_v8 = vpop.permute.xlu0 %1041  ;;  %v1192_v23 = vmul.f32 %v1188_v27, %v1188_v27  ;;  %v1139_v5 = vadd.f32 %v1116_v20, %v3342_v43  ;;  %v1180_v30 = vadd.f32 %v1176_v56, %v1164_v21 }
 0x28c   : > { %1068 = vst.msk [vmem:[#allocation2 + $0x38] sm:$0xff] %vm500_vm3, %v1060_v49  ;;  %1210 = vst [vmem:[#allocation2 + $0x1f] sm:$0x1] %v1206_v24  ;;  %v1059_v40 = vadd.f32 %v1042_v8, %v3189_v53  ;;  %v1128_v24 = vsel %vm274_vm1, %v1120_v42, %v1124_v0  ;;  %v1148_v25 = vadd.f32 %v1140_v51, %v1132_v60 }
 0x28d   : > { %v1071_v57 = vld [vmem:[#allocation2 + $0x10] sm:$0xff]  ;;  %v1074_v7 = vld [vmem:[#allocation2 + $0x28] sm:$0xff]  ;;  %v1208_v43 = vadd.f32 %v1204_v38, %v1192_v23  ;;  %v1147_v42 = vadd.f32 %v1139_v5, %v1128_v24  ;;  %v4033_v1 = vsub.f32 %v3402_v58, %v2917_v2 }
 0x28e   : > { %v3414_v59 = vmul.f32 0.11111111, %v1071_v57  ;;  %1151 = vst [vmem:[#allocation2 + $0x10] sm:$0xff] %v3355_v55  ;;  %1067 = vst.msk [vmem:[#allocation2 + $0x30] sm:$0xff] %vm500_vm3, %v1059_v40  ;;  %v3420_v53 = vmul.f32 0.11111111, %v1074_v7 }
 0x28f   : > { %1182 = vst [vmem:[#allocation2 + $0x10] sm:$0x1] %v3360_v17  ;;  %1154 = vst [vmem:[#allocation2 + $0x28] sm:$0xff] %v1146_v39  ;;  %v3424_v19 = vld [vmem:[#allocation2 + $0x8] sm:$0xff]  ;;  %v1478_v55 = vld [vmem:[%s2451_s29 + $0x11] sm:$0x1] }
 0x290   : > { %1211 = vst [vmem:[#allocation2 + $0x2f] sm:$0x1] %v1207_v36  ;;  %1223 = vrot.lane.b32.xlu1 %v3424_v19, %s2256_s20  ;;  %v1278_v40 = vmul.f32 2.0, %v3424_v19  ;;  %v4036_v58 = vld [vmem:[#allocation25_spill] sm:$0xff] }
 0x291   : > { %v1073_v14 = vld [vmem:[#allocation2 + $0x20] sm:$0xff] }
 0x292   : > { %v3432_v37 = vmul.f32 0.11111111, %v1073_v14  ;;  %1153 = vst [vmem:[#allocation2 + $0x20] sm:$0xff] %v1145_v63  ;;  %v3434_v48 = vld [vmem:[#allocation2] sm:$0xff] }
 0x293   : > { %v1076_v0 = vld [vmem:[#allocation2 + $0x38] sm:$0xff]  ;;  %1183 = vst [vmem:[#allocation2 + $0x20] sm:$0x1] %v1179_v31  ;;  %1221 = vrot.lane.b32.xlu0 %v3434_v48, %s2256_s20  ;;  %v1277_v23 = vmul.f32 2.0, %v3434_v48 }
 0x294   : > { %v3436_v6 = vmul.f32 0.11111111, %v1076_v0  ;;  %1156 = vst [vmem:[#allocation2 + $0x38] sm:$0xff] %v1148_v25  ;;  %v3440_v27 = vld [vmem:[#allocation2 + $0x18] sm:$0xff] }
 0x295   : > { %1212 = vst [vmem:[#allocation2 + $0x3f] sm:$0x1] %v1208_v43  ;;  %1227 = vrot.lane.b32.xlu1 %v3440_v27, %s2256_s20  ;;  %v1075_v35 = vld [vmem:[#allocation2 + $0x30] sm:$0xff]  ;;  %v1280_v38 = vmul.f32 2.0, %v3440_v27 }
 0x296   : > { %4029 = vst [vmem:[#allocation42_spill] sm:$0xff] %v3436_v6  ;;  %v3448_v36 = vmul.f32 0.11111111, %v1075_v35  ;;  %1155 = vst [vmem:[#allocation2 + $0x30] sm:$0xff] %v1147_v42  ;;  %v3450_v20 = vld [vmem:[#allocation2 + $0x10] sm:$0xff] }
 0x297   : > { %1184 = vst [vmem:[#allocation2 + $0x30] sm:$0x1] %v1180_v30  ;;  %1225 = vrot.lane.b32.xlu0 %v3450_v20, %s2256_s20  ;;  %v3454_v13 = vld [vmem:[#allocation2 + $0x28] sm:$0xff]  ;;  %v1279_v57 = vmul.f32 2.0, %v3450_v20  ;;  %v2118_v6 = vld [vmem:[%s2443_s19 + $0x30] sm:$0xff] }
 0x298   : > { %4030 = vst [vmem:[#allocation43_spill] sm:$0xff] %v3448_v36  ;;  %v1282_v31 = vmul.f32 2.0, %v3454_v13  ;;  %v1467_v36 = vld [vmem:[%s2451_s29 + $0x20] sm:$0x1]  ;;  %v3617_v28 = vmul.f32 %v2118_v6, %v3338_v45 }
 0x299   : > { %1231 = vrot.lane.b32.xlu1 %v3454_v13, %s2256_s20 }
 0x29a   : > { %v3460_v8 = vld [vmem:[#allocation2 + $0x20] sm:$0xff] }
 0x29b   : > { %1229 = vrot.lane.b32.xlu0 %v3460_v8, %s2256_s20  ;;  %v1281_v63 = vmul.f32 2.0, %v3460_v8 }
 0x29c   : > { %v3464_v60 = vld [vmem:[#allocation2 + $0x38] sm:$0xff] }
 0x29d   : > { %1235 = vrot.lane.b32.xlu1 %v3464_v60, %s2256_s20  ;;  %v1284_v7 = vmul.f32 2.0, %v3464_v60 }
 0x29e   : > { %v3468_v51 = vld [vmem:[#allocation2 + $0x30] sm:$0xff] }
 0x29f   : > { %1233 = vrot.lane.b32.xlu0 %v3468_v51, %s2256_s20  ;;  %v1283_v5 = vmul.f32 2.0, %v3468_v51 }
 0x2a1   : > { %1239 = vrot.lane.b32.xlu1 %v3424_v19, %s2257_s5 }
 0x2a3   : > { %1237 = vrot.lane.b32.xlu0 %v3434_v48, %s2257_s5 }
 0x2a5   : > { %1243 = vrot.lane.b32.xlu1 %v3440_v27, %s2257_s5 }
 0x2a7   : > { %1241 = vrot.lane.b32.xlu0 %v3450_v20, %s2257_s5 }
 0x2a9   : > { %1247 = vrot.lane.b32.xlu1 %v3454_v13, %s2257_s5 }
 0x2ab   : > { %1245 = vrot.lane.b32.xlu0 %v3460_v8, %s2257_s5 }
 0x2ad   : > { %1251 = vrot.lane.b32.xlu1 %v3464_v60, %s2257_s5 }
 0x2af   : > { %1249 = vrot.lane.b32.xlu0 %v3468_v51, %s2257_s5 }
 0x2b1   : > { %1295 = vrot.lane.b32.xlu1 %v1278_v40, %s2257_s5 }
 0x2b3   : > { %1293 = vrot.lane.b32.xlu0 %v1277_v23, %s2257_s5 }
 0x2b5   : > { %1299 = vrot.lane.b32.xlu1 %v1280_v38, %s2257_s5 }
 0x2b7   : > { %1297 = vrot.lane.b32.xlu0 %v1279_v57, %s2257_s5 }
 0x2b9   : > { %1303 = vrot.lane.b32.xlu1 %v1282_v31, %s2257_s5 }
 0x2bb   : > { %1301 = vrot.lane.b32.xlu0 %v1281_v63, %s2257_s5 }
 0x2bd   : > { %1307 = vrot.lane.b32.xlu1 %v1284_v7, %s2257_s5 }
 0x2bf   : > { %1305 = vrot.lane.b32.xlu0 %v1283_v5, %s2257_s5 }
 0x2c1   : > { %1335 = vrot.lane.b32.xlu1 %v1278_v40, %s2256_s20 }
 0x2c3   : > { %1333 = vrot.lane.b32.xlu0 %v1277_v23, %s2256_s20 }
 0x2c5   : > { %1339 = vrot.lane.b32.xlu1 %v1280_v38, %s2256_s20 }
 0x2c7   : > { %1337 = vrot.lane.b32.xlu0 %v1279_v57, %s2256_s20 }
 0x2c9   : > { %1343 = vrot.lane.b32.xlu1 %v1282_v31, %s2256_s20 }
 0x2cb   : > { %1341 = vrot.lane.b32.xlu0 %v1281_v63, %s2256_s20 }
 0x2cd   : > { %1347 = vrot.lane.b32.xlu1 %v1284_v7, %s2256_s20 }
 0x2cf   : > { %1345 = vrot.lane.b32.xlu0 %v1283_v5, %s2256_s20 }
 0x302   : > { %v1224_v21 = vpop.permute.xlu1 %1223 }
 0x303   : > { %v1254_v0 = vadd.f32 %v1224_v21, %v3424_v19 }
 0x305   : > { %v1222_v24 = vpop.permute.xlu0 %1221 }
 0x306   : > { %v1253_v23 = vadd.f32 %v1222_v24, %v3434_v48 }
 0x307   : > { %v1228_v56 = vpop.permute.xlu1 %1227 }
 0x308   : > { %v1256_v38 = vadd.f32 %v1228_v56, %v3440_v27 }
 0x309   : > { %v1226_v25 = vpop.permute.xlu0 %1225 }
 0x30a   : > { %v1255_v5 = vadd.f32 %v1226_v25, %v3450_v20 }
 0x30b   : > { %v1232_v43 = vpop.permute.xlu1 %1231 }
 0x30c   : > { %v1258_v54 = vadd.f32 %v1232_v43, %v3454_v13 }
 0x30d   : > { %v1230_v14 = vpop.permute.xlu0 %1229 }
 0x30e   : > { %v1257_v24 = vadd.f32 %v1230_v14, %v3460_v8 }
 0x30f   : > { %v1236_v42 = vpop.permute.xlu1 %1235 }
 0x310   : > { %v1260_v56 = vadd.f32 %v1236_v42, %v3464_v60  ;;  %v2113_v42 = vld [vmem:[%s2443_s19 + $0x8] sm:$0xff] }
 0x311   : > { %v1234_v30 = vpop.permute.xlu0 %1233 }
 0x313   : > { %v1240_v35 = vpop.permute.xlu1 %1239 }
 0x314   : > { %v1262_v40 = vadd.f32 %v1254_v0, %v1240_v35 }
 0x315   : > { %v1238_v57 = vpop.permute.xlu0 %1237 }
 0x316   : > { %1270 = vst [vmem:[#allocation2 + $0x8] sm:$0xff] %v1262_v40  ;;  %v1261_v31 = vadd.f32 %v1253_v23, %v1238_v57  ;;  %v240_v57 = vmul.f32 %v2113_v42, %v3250_v10  ;;  %v1509_v10 = vld [vmem:[%s2443_s19 + $0xe] sm:$0x1]  ;;  %v2114_v42 = vld [vmem:[%s2443_s19 + $0x10] sm:$0xff] }
 0x317   : > { %v1244_v63 = vpop.permute.xlu1 %1243 }
 0x318   : > { %v1264_v7 = vadd.f32 %v1256_v38, %v1244_v63  ;;  %1269 = vst [vmem:[#allocation2] sm:$0xff] %v1261_v31  ;;  %v1259_v38 = vadd.f32 %v1234_v30, %v3468_v51 }
 0x319   : > { %v1242_v39 = vpop.permute.xlu0 %1241 }
 0x31a   : > { %1272 = vst [vmem:[#allocation2 + $0x18] sm:$0xff] %v1264_v7  ;;  %v1263_v21 = vadd.f32 %v1255_v5, %v1242_v39 }
 0x31b   : > { %v1248_v49 = vpop.permute.xlu1 %1247 }
 0x31c   : > { %v1266_v0 = vadd.f32 %v1258_v54, %v1248_v49  ;;  %1271 = vst [vmem:[#allocation2 + $0x10] sm:$0xff] %v1263_v21  ;;  %v2112_v54 = vld [vmem:[%s2443_s19] sm:$0xff]  ;;  %v1409_v21 = vrot.slane %v240_v57, 7 }
 0x31d   : > { %v1246_v35 = vpop.permute.xlu0 %1245  ;;  %v239_v14 = vmul.f32 %v2112_v54, %v3243_v46  ;;  %v1477_v46 = vld [vmem:[%s2451_s29 + $0x1] sm:$0x1]  ;;  %v1465_v54 = vld [vmem:[%s2451_s29] sm:$0x1] }
 0x31e   : > { %1274 = vst [vmem:[#allocation2 + $0x28] sm:$0xff] %v1266_v0  ;;  %v1265_v40 = vadd.f32 %v1257_v24, %v1246_v35  ;;  %v1473_v0 = vld [vmem:[%s2443_s19 + $0x1] sm:$0x1] }
 0x31f   : > { %v1252_v23 = vpop.permute.xlu1 %1251  ;;  %v1405_v5 = vrot.slane %v239_v14, 7 }
 0x320   : > { %v1268_v25 = vadd.f32 %v1260_v56, %v1252_v23  ;;  %1273 = vst [vmem:[#allocation2 + $0x20] sm:$0xff] %v1265_v40  ;;  %v1513_v56 = vld [vmem:[%s2451_s29 + $0xe] sm:$0x1]  ;;  %v1421_v40 = vrot.slane %v239_v14, 1  ;;  %v1425_v23 = vrot.slane %v240_v57, 1 }
 0x321   : > { %v1250_v43 = vpop.permute.xlu0 %1249 }
 0x322   : > { %1276 = vst [vmem:[#allocation2 + $0x38] sm:$0xff] %v1268_v25  ;;  %v1267_v39 = vadd.f32 %v1259_v38, %v1250_v43  ;;  %v1481_v25 = vmul.f32 %v1477_v46, %v1473_v0  ;;  %v1413_v0 = vsel %vm257_vm0, %v1405_v5, %v1409_v21  ;;  %v1517_v46 = vmul.f32 %v1513_v56, %v1509_v10 }
 0x323   : > { %v1296_v49 = vpop.permute.xlu1 %1295 }
 0x324   : > { %v1318_v31 = vadd.f32 %v1296_v49, %v3424_v19  ;;  %1275 = vst [vmem:[#allocation2 + $0x30] sm:$0xff] %v1267_v39  ;;  %v1417_v39 = vsel %vm257_vm0, %v1409_v21, %v1405_v5  ;;  %v1461_v49 = vld [vmem:[%s2443_s19] sm:$0x1]  ;;  %v1438_v21 = vadd.f32 %v1413_v0, %v240_v57  ;;  %v2117_v0 = vld [vmem:[%s2443_s19 + $0x28] sm:$0xff] }
 0x325   : > { %v1294_v63 = vpop.permute.xlu0 %1293 }
 0x326   : > { %1326 = vst.msk [vmem:[#allocation2 + $0x8] sm:$0xff] %vm459_vm2, %v1318_v31  ;;  %v1317_v30 = vadd.f32 %v1294_v63, %v3434_v48  ;;  %v3541_v31 = vmul.f32 %v2114_v42, %v3262_v47  ;;  %v2115_v63 = vld [vmem:[%s2443_s19 + $0x18] sm:$0xff]  ;;  %v1429_v47 = vsel %vm274_vm1, %v1421_v40, %v1425_v23  ;;  %v1469_v42 = vmul.f32 %v1465_v54, %v1461_v49  ;;  %v2116_v49 = vld [vmem:[%s2443_s19 + $0x20] sm:$0xff] }
 0x327   : > { %v1300_v7 = vpop.permute.xlu1 %1299  ;;  %v3569_v54 = vmul.f32 %v2116_v49, %v3303_v11  ;;  %v1462_v49 = vld [vmem:[%s2443_s19 + $0x10] sm:$0x1] }
 0x328   : > { %v1320_v24 = vadd.f32 %v1300_v7, %v3440_v27  ;;  %1325 = vst.msk [vmem:[#allocation2] sm:$0xff] %vm459_vm2, %v1317_v30  ;;  %v3545_v30 = vmul.f32 %v2115_v63, %v3269_v34  ;;  %v1437_v34 = vadd.f32 %v1417_v39, %v239_v14  ;;  %v1406_v10 = vrot.slane %v3541_v31, 7 }
 0x329   : > { %v1298_v35 = vpop.permute.xlu0 %1297  ;;  %v1433_v14 = vsel %vm274_vm1, %v1425_v23, %v1421_v40  ;;  %v3577_v40 = vadd.f32 0.0001, %v3067_v18 }
 0x32a   : > { %1328 = vst.msk [vmem:[#allocation2 + $0x18] sm:$0xff] %vm459_vm2, %v1320_v24  ;;  %v1319_v38 = vadd.f32 %v1298_v35, %v3450_v20  ;;  %v1497_v24 = vld [vmem:[%s2443_s19 + $0xf] sm:$0x1]  ;;  %v1410_v56 = vrot.slane %v3545_v30, 7  ;;  %v1426_v57 = vrot.slane %v3545_v30, 1  ;;  %v3582_v11 = vadd.f32 %v1437_v34, %v1429_v47 }
 0x32b   : > { %v1304_v43 = vpop.permute.xlu1 %1303  ;;  %v1501_v35 = vld [vmem:[%s2451_s29 + $0xf] sm:$0x1]  ;;  %v3590_v18 = vadd.f32 %v1438_v21, %v1433_v14  ;;  %v1475_v47 = vld [vmem:[%s2443_s19 + $0x21] sm:$0x1]  ;;  %v1502_v21 = vld [vmem:[%s2451_s29 + $0x1f] sm:$0x1] }
 0x32c   : > { %v1322_v7 = vadd.f32 %v1304_v43, %v3454_v13  ;;  %1327 = vst.msk [vmem:[#allocation2 + $0x10] sm:$0xff] %vm459_vm2, %v1319_v38  ;;  %v1485_v43 = vmul.f32 2.0, %v1481_v25  ;;  %v1474_v38 = vld [vmem:[%s2443_s19 + $0x11] sm:$0x1]  ;;  %v1505_v39 = vmul.f32 %v1501_v35, %v1497_v24  ;;  %v1521_v25 = vmul.f32 2.0, %v1517_v46 }
 0x32d   : > { %v1302_v17 = vpop.permute.xlu0 %1301  ;;  %v1482_v23 = vmul.f32 %v1478_v55, %v1474_v38  ;;  %v1510_v46 = vld [vmem:[%s2443_s19 + $0x1e] sm:$0x1]  ;;  %v1479_v34 = vld [vmem:[%s2451_s29 + $0x21] sm:$0x1] }
 0x32e   : > { %1330 = vst.msk [vmem:[#allocation2 + $0x28] sm:$0xff] %vm459_vm2, %v1322_v7  ;;  %v1321_v63 = vadd.f32 %v1302_v17, %v3460_v8  ;;  %v1422_v17 = vrot.slane %v3541_v31, 1  ;;  %v1514_v24 = vld [vmem:[%s2451_s29 + $0x1e] sm:$0x1]  ;;  %v3592_v61 = vadd.f32 %v1521_v25, %v1505_v39  ;;  %v1483_v3 = vmul.f32 %v1479_v34, %v1475_v47  ;;  %v1499_v47 = vld [vmem:[%s2443_s19 + $0x2f] sm:$0x1] }
 0x32f   : > { %v1308_v5 = vpop.permute.xlu1 %1307  ;;  %v1518_v38 = vmul.f32 %v1514_v24, %v1510_v46  ;;  %v1486_v25 = vmul.f32 2.0, %v1482_v23  ;;  %v1503_v34 = vld [vmem:[%s2451_s29 + $0x2f] sm:$0x1] }
 0x330   : > { %v1324_v7 = vadd.f32 %v1308_v5, %v3464_v60  ;;  %1329 = vst.msk [vmem:[#allocation2 + $0x20] sm:$0xff] %vm459_vm2, %v1321_v63  ;;  %v3573_v5 = vmul.f32 %v2117_v0, %v3310_v33  ;;  %v3584_v63 = vadd.f32 %v1485_v43, %v1469_v42  ;;  %v1466_v0 = vld [vmem:[%s2451_s29 + $0x10] sm:$0x1]  ;;  %v1430_v42 = vsel %vm274_vm1, %v1422_v17, %v1426_v57  ;;  %v1498_v43 = vld [vmem:[%s2443_s19 + $0x1f] sm:$0x1] }
 0x331   : > { %v1306_v26 = vpop.permute.xlu0 %1305  ;;  %v1470_v39 = vmul.f32 %v1466_v0, %v1462_v49 }
 0x332   : > { %1332 = vst.msk [vmem:[#allocation2 + $0x38] sm:$0xff] %vm459_vm2, %v1324_v7  ;;  %v1323_v35 = vadd.f32 %v1306_v26, %v3468_v51  ;;  %v1418_v7 = vsel %vm257_vm0, %v1410_v56, %v1406_v10  ;;  %v1414_v26 = vsel %vm257_vm0, %v1406_v10, %v1410_v56  ;;  %v1411_v14 = vrot.slane %v3573_v5, 7 }
 0x333   : > { %v1336_v33 = vpop.permute.xlu1 %1335  ;;  %v1439_v56 = vadd.f32 %v1418_v7, %v3541_v31  ;;  %v1440_v23 = vadd.f32 %v1414_v26, %v3545_v30  ;;  %v1427_v45 = vrot.slane %v3573_v5, 1  ;;  %v3634_v30 = vadd.f32 %v1486_v25, %v1470_v39  ;;  %v1512_v39 = vld [vmem:[%s2443_s19 + $0x3e] sm:$0x1] }
 0x334   : > { %v1358_v55 = vadd.f32 %v1336_v33, %v3424_v19  ;;  %1331 = vst.msk [vmem:[#allocation2 + $0x30] sm:$0xff] %vm459_vm2, %v1323_v35  ;;  %v1407_v19 = vrot.slane %v3569_v54, 7  ;;  %v1434_v35 = vsel %vm274_vm1, %v1426_v57, %v1422_v17  ;;  %v1511_v33 = vld [vmem:[%s2443_s19 + $0x2e] sm:$0x1]  ;;  %v1506_v17 = vmul.f32 %v1502_v21, %v1498_v43 }
 0x335   : > { %v1334_v10 = vpop.permute.xlu0 %1333  ;;  %v1519_v6 = vmul.f32 %v1515_v62, %v1511_v33  ;;  %v3632_v49 = vadd.f32 %v1439_v56, %v1430_v42  ;;  %v1471_v26 = vmul.f32 %v1467_v36, %v1463_v15  ;;  %v1487_v21 = vmul.f32 2.0, %v1483_v3  ;;  %v1516_v15 = vld [vmem:[%s2451_s29 + $0x3e] sm:$0x1] }
 0x336   : > { %1366 = vst.msk [vmem:[#allocation2 + $0x8] sm:$0xff] %vm500_vm3, %v1358_v55  ;;  %v1357_v46 = vadd.f32 %v1334_v10, %v3434_v48  ;;  %v2119_v55 = vld [vmem:[%s2443_s19 + $0x38] sm:$0xff]  ;;  %v1423_v48 = vrot.slane %v3569_v54, 1  ;;  %v1419_v7 = vsel %vm257_vm0, %v1411_v14, %v1407_v19  ;;  %v1408_v62 = vrot.slane %v3617_v28, 7 }
 0x337   : > { %v1340_v24 = vpop.permute.xlu1 %1339  ;;  %v3621_v31 = vmul.f32 %v2119_v55, %v3345_v4  ;;  %v1415_v4 = vsel %vm257_vm0, %v1407_v19, %v1411_v14  ;;  %v1448_v19 = vadd.f32 %v1440_v23, %v1434_v35  ;;  %v1441_v14 = vadd.f32 %v1419_v7, %v3569_v54  ;;  %v1476_v54 = vld [vmem:[%s2443_s19 + $0x31] sm:$0x1] }
 0x338   : > { %v1360_v57 = vadd.f32 %v1340_v24, %v3440_v27  ;;  %1365 = vst.msk [vmem:[#allocation2] sm:$0xff] %vm500_vm3, %v1357_v46  ;;  %v1522_v27 = vmul.f32 2.0, %v1518_v38  ;;  %v1442_v56 = vadd.f32 %v1415_v4, %v3573_v5  ;;  %v1431_v3 = vsel %vm274_vm1, %v1423_v48, %v1427_v45  ;;  %v1480_v55 = vld [vmem:[%s2451_s29 + $0x31] sm:$0x1] }
 0x339   : > { %v1338_v0 = vpop.permute.xlu0 %1337  ;;  %v1412_v42 = vrot.slane %v3621_v31, 7  ;;  %v1507_v25 = vmul.f32 %v1503_v34, %v1499_v47  ;;  %v1523_v35 = vmul.f32 2.0, %v1519_v6  ;;  %v1424_v46 = vrot.slane %v3617_v28, 1  ;;  %v1504_v47 = vld [vmem:[%s2451_s29 + $0x3f] sm:$0x1] }
 0x33a   : > { %1368 = vst.msk [vmem:[#allocation2 + $0x18] sm:$0xff] %vm500_vm3, %v1360_v57  ;;  %v1359_v43 = vadd.f32 %v1338_v0, %v3450_v20  ;;  %v1435_v20 = vsel %vm274_vm1, %v1427_v45, %v1423_v48  ;;  %v1428_v24 = vrot.slane %v3621_v31, 1  ;;  %v3659_v23 = vadd.f32 %v1487_v21, %v1471_v26  ;;  %v1464_v48 = vld [vmem:[%s2443_s19 + $0x30] sm:$0x1] }
 0x33b   : > { %v1344_v10 = vpop.permute.xlu1 %1343  ;;  %v1449_v6 = vadd.f32 %v1441_v14, %v1431_v3  ;;  %v1450_v0 = vadd.f32 %v1442_v56, %v1435_v20  ;;  %v1527_v34 = vadd.f32 %v1523_v35, %v1507_v25  ;;  %v1468_v21 = vld [vmem:[%s2451_s29 + $0x30] sm:$0x1] }
 0x33c   : > { %v1362_v38 = vadd.f32 %v1344_v10, %v3454_v13  ;;  %1367 = vst.msk [vmem:[#allocation2 + $0x10] sm:$0xff] %vm500_vm3, %v1359_v43  ;;  %v1526_v13 = vadd.f32 %v1522_v27, %v1506_v17  ;;  %v1520_v17 = vmul.f32 %v1516_v15, %v1512_v39  ;;  %v1500_v27 = vld [vmem:[%s2443_s19 + $0x3f] sm:$0x1]  ;;  %v1420_v43 = vsel %vm257_vm0, %v1412_v42, %v1408_v62 }
 0x33d   : > { %v1374_v36 = vld [vmem:[#allocation2 + $0x8] sm:$0xff]  ;;  %v1342_v5 = vpop.permute.xlu0 %1341  ;;  %v1484_v10 = vmul.f32 %v1480_v55, %v1476_v54 }
 0x33e   : > { %v1382_v33 = vmul.f32 0.11111111, %v1374_v36  ;;  %1454 = vst [vmem:[#allocation2 + $0x8] sm:$0xff] %v3590_v18  ;;  %1370 = vst.msk [vmem:[#allocation2 + $0x28] sm:$0xff] %vm500_vm3, %v1362_v38  ;;  %v1361_v57 = vadd.f32 %v1342_v5, %v3460_v8  ;;  %v1416_v18 = vsel %vm257_vm0, %v1408_v62, %v1412_v42  ;;  %v1524_v39 = vmul.f32 2.0, %v1520_v17 }
 0x33f   : > { %1529 = vst [vmem:[#allocation2 + $0xf] sm:$0x1] %v3592_v61  ;;  %v1348_v7 = vpop.permute.xlu1 %1347  ;;  %v1373_v45 = vld [vmem:[#allocation2] sm:$0xff]  ;;  %v1444_v38 = vadd.f32 %v1416_v18, %v3621_v31  ;;  %v1472_v36 = vmul.f32 %v1468_v21, %v1464_v48  ;;  %v4032_v31 = vsub.f32 %v3395_v16, %v2892_v22  ;;  %v1488_v25 = vmul.f32 2.0, %v1484_v10 }
 0x340   : > { %v1398_v4 = vsub.f32 %v1382_v33, %v3053_v44  ;;  %v1364_v61 = vadd.f32 %v1348_v7, %v3464_v60  ;;  %v1381_v26 = vmul.f32 0.11111111, %v1373_v45  ;;  %1453 = vst [vmem:[#allocation2] sm:$0xff] %v3582_v11  ;;  %1369 = vst.msk [vmem:[#allocation2 + $0x20] sm:$0xff] %vm500_vm3, %v1361_v57  ;;  %v4031_v44 = vsub.f32 %v3377_v12, %v2879_v29  ;;  %v4034_v33 = vld [vmem:[#allocation20_spill] sm:$0xff] }
 0x341   : > { %v1376_v8 = vld [vmem:[#allocation2 + $0x18] sm:$0xff]  ;;  %1493 = vst [vmem:[#allocation2] sm:$0x1] %v3584_v63  ;;  %v1346_v60 = vpop.permute.xlu0 %1345  ;;  %v1436_v11 = vsel %vm274_vm1, %v1428_v24, %v1424_v46  ;;  %v1508_v63 = vmul.f32 %v1504_v47, %v1500_v27  ;;  %v4037_v57 = vsub.f32 %v3414_v59, %v2913_v41  ;;  %v1492_v27 = vadd.f32 %v1488_v25, %v1472_v36  ;;  %v4039_v59 = vld [vmem:[#allocation24_spill] sm:$0xff] }
 0x342   : > { %v1790_v14 = vadd.f32 %v1398_v4, %v4031_v44  ;;  %v1384_v56 = vmul.f32 0.11111111, %v1376_v8  ;;  %1456 = vst [vmem:[#allocation2 + $0x18] sm:$0xff] %v1448_v19  ;;  %1372 = vst.msk [vmem:[#allocation2 + $0x38] sm:$0xff] %vm500_vm3, %v1364_v61  ;;  %v1397_v62 = vsub.f32 %v1381_v26, %v3063_v9  ;;  %v1363_v42 = vadd.f32 %v1346_v60, %v3468_v51  ;;  %v4040_v26 = vld [vmem:[#allocation29_spill] sm:$0xff]  ;;  %v4043_v44 = vld [vmem:[#allocation28_spill] sm:$0xff] }
 0x343   : > { %1530 = vst [vmem:[#allocation2 + $0x1f] sm:$0x1] %v1526_v13  ;;  %v1375_v29 = vld [vmem:[#allocation2 + $0x10] sm:$0xff]  ;;  %v1432_v19 = vsel %vm274_vm1, %v1424_v46, %v1428_v24  ;;  %v1443_v51 = vadd.f32 %v1420_v43, %v3617_v28  ;;  %v1452_v16 = vadd.f32 %v1444_v38, %v1436_v11  ;;  %v1528_v5 = vadd.f32 %v1524_v39, %v1508_v63  ;;  %v4052_v25 = vld [vmem:[#allocation39_spill] sm:$0xff] }
 0x344   : > { %v1798_v15 = vadd.f32 0.0009, %v1790_v14  ;;  %v1400_v12 = vsub.f32 %v1384_v56, %v3083_v50  ;;  %v1789_v3 = vadd.f32 %v1397_v62, %v4032_v31  ;;  %v1383_v20 = vmul.f32 0.11111111, %v1375_v29  ;;  %1455 = vst [vmem:[#allocation2 + $0x10] sm:$0xff] %v3632_v49  ;;  %1371 = vst.msk [vmem:[#allocation2 + $0x30] sm:$0xff] %vm500_vm3, %v1363_v42 }
 0x345   : > { %v1378_v9 = vld [vmem:[#allocation2 + $0x28] sm:$0xff]  ;;  %1494 = vst [vmem:[#allocation2 + $0x10] sm:$0x1] %v3634_v30  ;;  %v1781_v49 = vadd.f32 0.0001, %v3081_v52  ;;  %v1451_v18 = vadd.f32 %v1443_v51, %v1432_v19  ;;  %v4038_v4 = vsub.f32 %v3420_v53, %v2965_v32  ;;  %v4042_v43 = vld [vmem:[#allocation34_spill] sm:$0xff]  ;;  %v4044_v14 = vsub.f32 %v3432_v37, %v4043_v44 }
 0x346   : > { %v3694_v35 = vmul.f32 %v1798_v15, %v3577_v40  ;;  %v1792_v50 = vadd.f32 %v1400_v12, %v4033_v1  ;;  %v1386_v22 = vmul.f32 0.11111111, %v1378_v9  ;;  %1458 = vst [vmem:[#allocation2 + $0x28] sm:$0xff] %v1450_v0  ;;  %v3700_v54 = vld [vmem:[#allocation2 + $0x8] sm:$0xff]  ;;  %v1797_v28 = vadd.f32 0.0009, %v1789_v3 }
 0x347   : > { %v1399_v13 = vsub.f32 %v1383_v20, %v4034_v33  ;;  %1531 = vst [vmem:[#allocation2 + $0x2f] sm:$0x1] %v1527_v34  ;;  %1543 = vrot.lane.b32.xlu1 %v3700_v54, %s2256_s20  ;;  %v4035_v40 = vld [vmem:[#allocation21_spill] sm:$0xff]  ;;  %v1377_v2 = vld [vmem:[#allocation2 + $0x20] sm:$0xff]  ;;  %v4045_v62 = vld [vmem:[#allocation42_spill] sm:$0xff] }
 0x348   : > { %v1784_v30 = vadd.f32 0.0001, %v4035_v40  ;;  %v1800_v46 = vadd.f32 0.0009, %v1792_v50  ;;  %v1402_v24 = vsub.f32 %v1386_v22, %v4036_v58  ;;  %v3708_v55 = vmul.f32 %v1797_v28, %v1781_v49  ;;  %1457 = vst [vmem:[#allocation2 + $0x20] sm:$0xff] %v1449_v6  ;;  %v3713_v7 = vld [vmem:[#allocation2] sm:$0xff] }
 0x349   : > { %v1791_v52 = vadd.f32 %v1399_v13, %v4037_v57  ;;  %v1385_v48 = vmul.f32 0.11111111, %v1377_v2  ;;  %v1380_v17 = vld [vmem:[#allocation2 + $0x38] sm:$0xff]  ;;  %1495 = vst [vmem:[#allocation2 + $0x20] sm:$0x1] %v3659_v23  ;;  %1541 = vrot.lane.b32.xlu0 %v3713_v7, %s2256_s20  ;;  %v4041_v23 = vld [vmem:[#allocation30_spill] sm:$0xff]  ;;  %2088 = vrcp.f32 %v3694_v35 }
 0x34a   : > { %v3715_v45 = vmul.f32 %v1800_v46, %v1784_v30  ;;  %v1794_v0 = vadd.f32 %v1402_v24, %v4038_v4  ;;  %v1388_v47 = vmul.f32 0.11111111, %v1380_v17  ;;  %1460 = vst [vmem:[#allocation2 + $0x38] sm:$0xff] %v1452_v16  ;;  %v3723_v41 = vld [vmem:[#allocation2 + $0x18] sm:$0xff]  ;;  %v1783_v6 = vadd.f32 0.0001, %v4039_v59 }
 0x34b   : > { %v1799_v61 = vadd.f32 0.0009, %v1791_v52  ;;  %v1401_v8 = vsub.f32 %v1385_v48, %v4040_v26  ;;  %1532 = vst [vmem:[#allocation2 + $0x3f] sm:$0x1] %v1528_v5  ;;  %1547 = vrot.lane.b32.xlu1 %v3723_v41, %s2256_s20  ;;  %v1786_v32 = vadd.f32 0.0001, %v4041_v23  ;;  %2090 = vrcp.f32 %v3708_v55 }
 0x34c   : > { %v1802_v53 = vadd.f32 0.0009, %v1794_v0  ;;  %v1379_v34 = vld [vmem:[#allocation2 + $0x30] sm:$0xff]  ;;  %v1404_v21 = vsub.f32 %v1388_v47, %v4042_v43  ;;  %v4046_v42 = vld [vmem:[#allocation33_spill] sm:$0xff]  ;;  %v4048_v29 = vld [vmem:[#allocation35_spill] sm:$0xff]  ;;  %v1598_v30 = vmul.f32 2.0, %v3700_v54  ;;  %2092 = vrcp.f32 %v3715_v45 }
 0x34d   : > { %v3731_v10 = vmul.f32 %v1799_v61, %v1783_v6  ;;  %v1793_v56 = vadd.f32 %v1401_v8, %v4044_v14  ;;  %v1387_v60 = vmul.f32 0.11111111, %v1379_v34  ;;  %1459 = vst [vmem:[#allocation2 + $0x30] sm:$0xff] %v1451_v18  ;;  %v3736_v11 = vld [vmem:[#allocation2 + $0x10] sm:$0xff]  ;;  %v4047_v63 = vsub.f32 %v4045_v62, %v4046_v42  ;;  %v4049_v19 = vld [vmem:[#allocation40_spill] sm:$0xff]  ;;  %v4051_v51 = vld [vmem:[#allocation43_spill] sm:$0xff] }
 0x34e   : > { %v3738_v38 = vmul.f32 %v1802_v53, %v1786_v32  ;;  %1496 = vst [vmem:[#allocation2 + $0x30] sm:$0x1] %v1492_v27  ;;  %1545 = vrot.lane.b32.xlu0 %v3736_v11, %s2256_s20  ;;  %v3745_v15 = vld [vmem:[#allocation2 + $0x28] sm:$0xff]  ;;  %v1785_v12 = vadd.f32 0.0001, %v4048_v29  ;;  %v4050_v31 = vld [vmem:[#allocation36_spill] sm:$0xff]  ;;  %v4053_v1 = vsub.f32 %v4051_v51, %v4052_v25 }
 0x34f   : > { %v1796_v39 = vadd.f32 %v1404_v21, %v4047_v63  ;;  %v1801_v37 = vadd.f32 0.0009, %v1793_v56  ;;  %v1403_v36 = vsub.f32 %v1387_v60, %v4049_v19  ;;  %1551 = vrot.lane.b32.xlu1 %v3745_v15, %s2256_s20  ;;  %v1788_v3 = vadd.f32 0.0001, %v4050_v31  ;;  %v4054_v28 = vld [vmem:[#allocation41_spill] sm:$0xff] }
 0x350   : > { %v3757_v22 = vld [vmem:[#allocation2 + $0x20] sm:$0xff]  ;;  %v1787_v33 = vadd.f32 0.0001, %v4054_v28  ;;  %v1597_v46 = vmul.f32 2.0, %v3713_v7  ;;  %v1600_v2 = vmul.f32 2.0, %v3723_v41  ;;  %v1599_v58 = vmul.f32 2.0, %v3736_v11 }
 0x351   : > { %v1804_v20 = vadd.f32 0.0009, %v1796_v39  ;;  %v3752_v9 = vmul.f32 %v1801_v37, %v1785_v12  ;;  %v1795_v50 = vadd.f32 %v1403_v36, %v4053_v1  ;;  %v1602_v24 = vmul.f32 2.0, %v3745_v15 }
 0x352   : > { %1549 = vrot.lane.b32.xlu0 %v3757_v22, %s2256_s20  ;;  %v3763_v49 = vld [vmem:[#allocation2 + $0x38] sm:$0xff]  ;;  %v1601_v57 = vmul.f32 2.0, %v3757_v22  ;;  %2094 = vrcp.f32 %v3731_v10 }
 0x353   : > { %v3759_v16 = vmul.f32 %v1804_v20, %v1788_v3  ;;  %v1803_v13 = vadd.f32 0.0009, %v1795_v50  ;;  %1555 = vrot.lane.b32.xlu1 %v3763_v49, %s2256_s20  ;;  %v1604_v52 = vmul.f32 2.0, %v3763_v49  ;;  %2096 = vrcp.f32 %v3738_v38 }
 0x354   : > { %2098 = vrcp.f32 %v3752_v9 }
 0x355   : > { %v3768_v5 = vmul.f32 %v1803_v13, %v1787_v33  ;;  %v3770_v40 = vld [vmem:[#allocation2 + $0x30] sm:$0xff]  ;;  %2100 = vrcp.f32 %v3759_v16 }
 0x356   : > { %1553 = vrot.lane.b32.xlu0 %v3770_v40, %s2256_s20  ;;  %v1603_v48 = vmul.f32 2.0, %v3770_v40 }
 0x357   : > { %1559 = vrot.lane.b32.xlu1 %v3700_v54, %s2257_s5  ;;  %2102 = vrcp.f32 %v3768_v5 }
 0x35a   : > { %1557 = vrot.lane.b32.xlu0 %v3713_v7, %s2257_s5 }
 0x35b   : > { %1563 = vrot.lane.b32.xlu1 %v3723_v41, %s2257_s5 }
 0x35e   : > { %1561 = vrot.lane.b32.xlu0 %v3736_v11, %s2257_s5 }
 0x35f   : > { %1567 = vrot.lane.b32.xlu1 %v3745_v15, %s2257_s5 }
 0x362   : > { %1565 = vrot.lane.b32.xlu0 %v3757_v22, %s2257_s5 }
 0x363   : > { %1571 = vrot.lane.b32.xlu1 %v3763_v49, %s2257_s5 }
 0x366   : > { %1569 = vrot.lane.b32.xlu0 %v3770_v40, %s2257_s5 }
 0x367   : > { %1615 = vrot.lane.b32.xlu1 %v1598_v30, %s2257_s5 }
 0x36a   : > { %1613 = vrot.lane.b32.xlu0 %v1597_v46, %s2257_s5 }
 0x36b   : > { %1619 = vrot.lane.b32.xlu1 %v1600_v2, %s2257_s5 }
 0x36e   : > { %1617 = vrot.lane.b32.xlu0 %v1599_v58, %s2257_s5 }
 0x36f   : > { %1623 = vrot.lane.b32.xlu1 %v1602_v24, %s2257_s5 }
 0x372   : > { %1621 = vrot.lane.b32.xlu0 %v1601_v57, %s2257_s5 }
 0x373   : > { %1627 = vrot.lane.b32.xlu1 %v1604_v52, %s2257_s5 }
 0x376   : > { %1625 = vrot.lane.b32.xlu0 %v1603_v48, %s2257_s5 }
 0x377   : > { %1655 = vrot.lane.b32.xlu1 %v1598_v30, %s2256_s20 }
 0x37a   : > { %1653 = vrot.lane.b32.xlu0 %v1597_v46, %s2256_s20 }
 0x37b   : > { %1659 = vrot.lane.b32.xlu1 %v1600_v2, %s2256_s20 }
 0x37e   : > { %1657 = vrot.lane.b32.xlu0 %v1599_v58, %s2256_s20 }
 0x37f   : > { %1663 = vrot.lane.b32.xlu1 %v1602_v24, %s2256_s20 }
 0x382   : > { %1661 = vrot.lane.b32.xlu0 %v1601_v57, %s2256_s20 }
 0x383   : > { %1667 = vrot.lane.b32.xlu1 %v1604_v52, %s2256_s20 }
 0x386   : > { %1665 = vrot.lane.b32.xlu0 %v1603_v48, %s2256_s20 }
 0x3b9   : > { %v1544_v18 = vpop.permute.xlu1 %1543 }
 0x3ba   : > { %v1574_v6 = vadd.f32 %v1544_v18, %v3700_v54 }
 0x3bb   : > { %v1542_v17 = vpop.permute.xlu0 %1541 }
 0x3bc   : > { %v1573_v23 = vadd.f32 %v1542_v17, %v3713_v7 }
 0x3bd   : > { %v1548_v4 = vpop.permute.xlu1 %1547 }
 0x3be   : > { %v1576_v32 = vadd.f32 %v1548_v4, %v3723_v41 }
 0x3c0   : > { %v1546_v0 = vpop.permute.xlu0 %1545 }
 0x3c1   : > { %v1552_v27 = vpop.permute.xlu1 %1551  ;;  %v1575_v44 = vadd.f32 %v1546_v0, %v3736_v11 }
 0x3c2   : > { %v1578_v14 = vadd.f32 %v1552_v27, %v3745_v15 }
 0x3c4   : > { %v1550_v47 = vpop.permute.xlu0 %1549 }
 0x3c5   : > { %v1556_v59 = vpop.permute.xlu1 %1555  ;;  %v1577_v63 = vadd.f32 %v1550_v47, %v3757_v22  ;;  %v2089_v47 = vpop.eup %2088 }
 0x3c6   : > { %v1580_v39 = vadd.f32 %v1556_v59, %v3763_v49 }
 0x3c8   : > { %v1554_v61 = vpop.permute.xlu0 %1553 }
 0x3c9   : > { %v1560_v26 = vpop.permute.xlu1 %1559  ;;  %v1579_v36 = vadd.f32 %v1554_v61, %v3770_v40 }
 0x3ca   : > { %v1582_v8 = vadd.f32 %v1574_v6, %v1560_v26  ;;  %v2091_v6 = vpop.eup %2090 }
 0x3cb   : > { %v2093_v61 = vpop.eup %2092 }
 0x3cc   : > { %v1558_v53 = vpop.permute.xlu0 %1557  ;;  %1590 = vst [vmem:[#allocation2 + $0x8] sm:$0xff] %v1582_v8  ;;  %v2095_v26 = vpop.eup %2094  ;;  %v1822_v8 = vmul.f32 %v2089_v47, %v3694_v35  ;;  %v4057_v35 = vld [vmem:[#allocation19_spill] sm:$0xff] }
 0x3cd   : > { %v1581_v34 = vadd.f32 %v1573_v23, %v1558_v53  ;;  %v1564_v43 = vpop.permute.xlu1 %1563  ;;  %v1821_v53 = vmul.f32 %v2091_v6, %v3708_v55  ;;  %v1823_v55 = vmul.f32 %v2095_v26, %v3731_v10 }
 0x3ce   : > { %v1584_v21 = vadd.f32 %v1576_v32, %v1564_v43 }
 0x3cf   : > { %1589 = vst [vmem:[#allocation2] sm:$0xff] %v1581_v34  ;;  %v4055_v34 = vld [vmem:[#allocation15_spill] sm:$0xff] }
 0x3d0   : > { %v1562_v56 = vpop.permute.xlu0 %1561  ;;  %1592 = vst [vmem:[#allocation2 + $0x18] sm:$0xff] %v1584_v21  ;;  %v3857_v43 = vadd.f32 0.0001, %v4055_v34  ;;  %v4056_v21 = vld [vmem:[#allocation13_spill] sm:$0xff] }
 0x3d1   : > { %v1583_v60 = vadd.f32 %v1575_v44, %v1562_v56  ;;  %v1568_v62 = vpop.permute.xlu1 %1567  ;;  %v1742_v44 = vadd.f32 0.0001, %v4056_v21 }
 0x3d2   : > { %v1586_v42 = vadd.f32 %v1578_v14, %v1568_v62  ;;  %v1824_v14 = vmul.f32 %v2093_v61, %v3715_v45  ;;  %v3863_v62 = vadd.f32 0.0001, %v4057_v35  ;;  %v1830_v45 = vsub.f32 2.0, %v1822_v8  ;;  %v4066_v35 = vld [vmem:[#allocation18_spill] sm:$0xff] }
 0x3d3   : > { %1591 = vst [vmem:[#allocation2 + $0x10] sm:$0xff] %v1583_v60 }
 0x3d4   : > { %v1566_v29 = vpop.permute.xlu0 %1565  ;;  %1594 = vst [vmem:[#allocation2 + $0x28] sm:$0xff] %v1586_v42 }
 0x3d5   : > { %v1585_v12 = vadd.f32 %v1577_v63, %v1566_v29  ;;  %v1572_v37 = vpop.permute.xlu1 %1571 }
 0x3d6   : > { %v1588_v19 = vadd.f32 %v1580_v39, %v1572_v37  ;;  %v4059_v39 = vld [vmem:[#allocation23_spill] sm:$0xff] }
 0x3d7   : > { %1593 = vst [vmem:[#allocation2 + $0x20] sm:$0xff] %v1585_v12  ;;  %v3871_v29 = vadd.f32 0.0001, %v4059_v39  ;;  %v4067_v39 = vld [vmem:[#allocation22_spill] sm:$0xff] }
 0x3d8   : > { %v1570_v31 = vpop.permute.xlu0 %1569  ;;  %1596 = vst [vmem:[#allocation2 + $0x38] sm:$0xff] %v1588_v19 }
 0x3d9   : > { %v1587_v3 = vadd.f32 %v1579_v36, %v1570_v31  ;;  %v1616_v20 = vpop.permute.xlu1 %1615  ;;  %v4060_v36 = vld [vmem:[#allocation27_spill] sm:$0xff] }
 0x3da   : > { %v1638_v51 = vadd.f32 %v1616_v20, %v3700_v54  ;;  %v3876_v31 = vadd.f32 0.0001, %v4060_v36 }
 0x3db   : > { %1595 = vst [vmem:[#allocation2 + $0x30] sm:$0xff] %v1587_v3  ;;  %v1829_v3 = vsub.f32 2.0, %v1821_v53 }
 0x3dc   : > { %v1614_v25 = vpop.permute.xlu0 %1613  ;;  %1646 = vst.msk [vmem:[#allocation2 + $0x8] sm:$0xff] %vm459_vm2, %v1638_v51  ;;  %v4061_v51 = vld [vmem:[#allocation12_spill] sm:$0xff] }
 0x3dd   : > { %v1637_v1 = vadd.f32 %v1614_v25, %v3713_v7  ;;  %v1620_v50 = vpop.permute.xlu1 %1619 }
 0x3de   : > { %v1640_v28 = vadd.f32 %v1620_v50, %v3723_v41  ;;  %v4062_v50 = vld [vmem:[#allocation32_spill] sm:$0xff] }
 0x3df   : > { %1645 = vst.msk [vmem:[#allocation2] sm:$0xff] %vm459_vm2, %v1637_v1 }
 0x3e0   : > { %v1618_v33 = vpop.permute.xlu0 %1617  ;;  %1648 = vst.msk [vmem:[#allocation2 + $0x18] sm:$0xff] %vm459_vm2, %v1640_v28  ;;  %v3883_v28 = vadd.f32 0.0001, %v4062_v50 }
 0x3e1   : > { %v1639_v13 = vadd.f32 %v1618_v33, %v3736_v11  ;;  %v1624_v30 = vpop.permute.xlu1 %1623  ;;  %v1832_v33 = vsub.f32 2.0, %v1824_v14 }
 0x3e2   : > { %v1642_v46 = vadd.f32 %v1624_v30, %v3745_v15  ;;  %v4063_v30 = vld [vmem:[#allocation38_spill] sm:$0xff] }
 0x3e3   : > { %1647 = vst.msk [vmem:[#allocation2 + $0x10] sm:$0xff] %vm459_vm2, %v1639_v13 }
 0x3e4   : > { %v1622_v2 = vpop.permute.xlu0 %1621  ;;  %1650 = vst.msk [vmem:[#allocation2 + $0x28] sm:$0xff] %vm459_vm2, %v1642_v46  ;;  %v3888_v46 = vadd.f32 0.0001, %v4063_v30 }
 0x3e5   : > { %v1641_v58 = vadd.f32 %v1622_v2, %v3757_v22  ;;  %v1628_v24 = vpop.permute.xlu1 %1627  ;;  %v1831_v2 = vsub.f32 2.0, %v1823_v55 }
 0x3e6   : > { %v1644_v57 = vadd.f32 %v1628_v24, %v3763_v49 }
 0x3e7   : > { %1649 = vst.msk [vmem:[#allocation2 + $0x20] sm:$0xff] %vm459_vm2, %v1641_v58  ;;  %v1839_v34 = vmul.f32 %v2095_v26, %v1831_v2 }
 0x3e8   : > { %v1626_v52 = vpop.permute.xlu0 %1625  ;;  %1652 = vst.msk [vmem:[#allocation2 + $0x38] sm:$0xff] %vm459_vm2, %v1644_v57 }
 0x3e9   : > { %v1643_v48 = vadd.f32 %v1626_v52, %v3770_v40  ;;  %v1656_v18 = vpop.permute.xlu1 %1655 }
 0x3ea   : > { %v1678_v17 = vadd.f32 %v1656_v18, %v3700_v54 }
 0x3eb   : > { %1651 = vst.msk [vmem:[#allocation2 + $0x30] sm:$0xff] %vm459_vm2, %v1643_v48  ;;  %v4064_v48 = vld [vmem:[#allocation14_spill] sm:$0xff] }
 0x3ec   : > { %v1654_v4 = vpop.permute.xlu0 %1653  ;;  %1686 = vst.msk [vmem:[#allocation2 + $0x8] sm:$0xff] %vm500_vm3, %v1678_v17 }
 0x3ed   : > { %v1677_v0 = vadd.f32 %v1654_v4, %v3713_v7  ;;  %v1660_v27 = vpop.permute.xlu1 %1659  ;;  %v2097_v7 = vpop.eup %2096  ;;  %v1837_v4 = vmul.f32 %v2091_v6, %v1829_v3 }
 0x3ee   : > { %v1680_v59 = vadd.f32 %v1660_v27, %v3723_v41  ;;  %v2099_v60 = vpop.eup %2098  ;;  %v1826_v12 = vmul.f32 %v2097_v7, %v3738_v38 }
 0x3ef   : > { %1685 = vst.msk [vmem:[#allocation2] sm:$0xff] %vm500_vm3, %v1677_v0  ;;  %v3880_v1 = vpop.eup %2100  ;;  %v1825_v38 = vmul.f32 %v2099_v60, %v3752_v9 }
 0x3f0   : > { %v1658_v54 = vpop.permute.xlu0 %1657  ;;  %1688 = vst.msk [vmem:[#allocation2 + $0x18] sm:$0xff] %vm500_vm3, %v1680_v59  ;;  %v1834_v52 = vsub.f32 2.0, %v1826_v12  ;;  %v3893_v9 = vpop.eup %2102  ;;  %v1828_v0 = vmul.f32 %v3880_v1, %v3759_v16 }
 0x3f1   : > { %v1679_v23 = vadd.f32 %v1658_v54, %v3736_v11  ;;  %v1664_v32 = vpop.permute.xlu1 %1663  ;;  %v4058_v11 = vld [vmem:[#allocation17_spill] sm:$0xff]  ;;  %v4065_v54 = vld [vmem:[#allocation16_spill] sm:$0xff]  ;;  %v1827_v6 = vmul.f32 %v3893_v9, %v3768_v5 }
 0x3f2   : > { %v1682_v41 = vadd.f32 %v1664_v32, %v3745_v15  ;;  %v3866_v42 = vadd.f32 0.0001, %v4058_v11  ;;  %v1833_v32 = vsub.f32 2.0, %v1825_v38  ;;  %v1836_v55 = vsub.f32 2.0, %v1828_v0 }
 0x3f3   : > { %v1694_v56 = vld [vmem:[#allocation2 + $0x8] sm:$0xff]  ;;  %1687 = vst.msk [vmem:[#allocation2 + $0x10] sm:$0xff] %vm500_vm3, %v1679_v23  ;;  %v1840_v23 = vmul.f32 %v2093_v61, %v1832_v33 }
 0x3f4   : > { %v1702_v15 = vmul.f32 0.11111111, %v1694_v56  ;;  %v1662_v63 = vpop.permute.xlu0 %1661  ;;  %1690 = vst.msk [vmem:[#allocation2 + $0x28] sm:$0xff] %vm500_vm3, %v1682_v41  ;;  %v1842_v56 = vmul.f32 %v2097_v7, %v1834_v52  ;;  %v1841_v12 = vmul.f32 %v2099_v60, %v1833_v32  ;;  %v4069_v60 = vld [vmem:[#allocation31_spill] sm:$0xff] }
 0x3f5   : > { %v1681_v37 = vadd.f32 %v1662_v63, %v3757_v22  ;;  %v1668_v19 = vpop.permute.xlu1 %1667 }
 0x3f6   : > { %v1693_v20 = vld [vmem:[#allocation2] sm:$0xff]  ;;  %v1718_v10 = vsub.f32 %v1702_v15, %v4061_v51  ;;  %v1684_v25 = vadd.f32 %v1668_v19, %v3763_v49  ;;  %v1838_v49 = vmul.f32 %v2089_v47, %v1830_v45 }
 0x3f7   : > { %v1701_v13 = vmul.f32 0.11111111, %v1693_v20  ;;  %v1696_v22 = vld [vmem:[#allocation2 + $0x18] sm:$0xff]  ;;  %1689 = vst.msk [vmem:[#allocation2 + $0x20] sm:$0xff] %vm500_vm3, %v1681_v37  ;;  %v1835_v20 = vsub.f32 2.0, %v1827_v6 }
 0x3f8   : > { %v1750_v58 = vmul.f32 2.0, %v1718_v10  ;;  %v1704_v24 = vmul.f32 0.11111111, %v1696_v22  ;;  %v1666_v57 = vpop.permute.xlu0 %1665  ;;  %1692 = vst.msk [vmem:[#allocation2 + $0x38] sm:$0xff] %vm500_vm3, %v1684_v25  ;;  %v4068_v25 = vld [vmem:[#allocation26_spill] sm:$0xff] }
 0x3f9   : > { %v1717_v18 = vsub.f32 %v1701_v13, %v4064_v48  ;;  %v1683_v17 = vadd.f32 %v1666_v57, %v3770_v40 }
 0x3fa   : > { %v1758_v27 = vadd.f32 0.0009, %v1750_v58  ;;  %v1695_v59 = vld [vmem:[#allocation2 + $0x10] sm:$0xff]  ;;  %v1720_v8 = vsub.f32 %v1704_v24, %v4065_v54 }
 0x3fb   : > { %v1749_v53 = vmul.f32 2.0, %v1717_v18  ;;  %v1703_v41 = vmul.f32 0.11111111, %v1695_v59  ;;  %v1698_v47 = vld [vmem:[#allocation2 + $0x28] sm:$0xff]  ;;  %1691 = vst.msk [vmem:[#allocation2 + $0x30] sm:$0xff] %vm500_vm3, %v1683_v17 }
 0x3fc   : > { %v1766_v21 = vmul.f32 %v1758_v27, %v1742_v44  ;;  %v1752_v40 = vmul.f32 2.0, %v1720_v8  ;;  %v1706_v14 = vmul.f32 0.11111111, %v1698_v47 }
 0x3fd   : > { %v1757_v16 = vadd.f32 0.0009, %v1749_v53  ;;  %v1719_v11 = vsub.f32 %v1703_v41, %v4066_v35  ;;  %v1844_v41 = vmul.f32 %v3880_v1, %v1836_v55  ;;  %v1843_v1 = vmul.f32 %v3893_v9, %v1835_v20 }
 0x3fe   : > { %v1846_v15 = vmul.f32 %v1838_v49, %v1766_v21  ;;  %v1760_v61 = vadd.f32 0.0009, %v1752_v40  ;;  %v1697_v63 = vld [vmem:[#allocation2 + $0x20] sm:$0xff]  ;;  %v1722_v45 = vsub.f32 %v1706_v14, %v4067_v39 }
 0x3ff   : > { %v1765_v37 = vmul.f32 %v1757_v16, %v3857_v43  ;;  %v1751_v26 = vmul.f32 2.0, %v1719_v11  ;;  %v1705_v44 = vmul.f32 0.11111111, %v1697_v63  ;;  %v1700_v19 = vld [vmem:[#allocation2 + $0x38] sm:$0xff] }
 0x400   : > { %v1854_v36 = vsub.f32 1.0, %v1846_v15  ;;  %v1768_v7 = vmul.f32 %v1760_v61, %v3866_v42  ;;  %v1754_v3 = vmul.f32 2.0, %v1722_v45  ;;  %v1708_v5 = vmul.f32 0.11111111, %v1700_v19 }
 0x401   : > { %v1845_v51 = vmul.f32 %v1837_v4, %v1765_v37  ;;  %v1759_v10 = vadd.f32 0.0009, %v1751_v26  ;;  %v1721_v50 = vsub.f32 %v1705_v44, %v4068_v25  ;;  %v4070_v4 = vld [vmem:[#allocation37_spill] sm:$0xff] }
 0x402   : > { %v1862_v33 = vmul.f32 0.5, %v1854_v36  ;;  %v1848_v38 = vmul.f32 %v1840_v23, %v1768_v7  ;;  %v1762_v13 = vadd.f32 0.0009, %v1754_v3  ;;  %v1699_v22 = vld [vmem:[#allocation2 + $0x30] sm:$0xff]  ;;  %v1724_v30 = vsub.f32 %v1708_v5, %v4069_v60 }
 0x403   : > { %v1853_v43 = vsub.f32 1.0, %v1845_v51  ;;  %v1767_v2 = vmul.f32 %v1759_v10, %v3863_v62  ;;  %v1753_v58 = vmul.f32 2.0, %v1721_v50  ;;  %v1707_v24 = vmul.f32 0.11111111, %v1699_v22 }
 0x404   : > { %v1870_v57 = vmax.f32 %v1862_v33, 0.0  ;;  %v1856_v42 = vsub.f32 1.0, %v1848_v38  ;;  %v1770_v49 = vmul.f32 %v1762_v13, %v3871_v29  ;;  %v1756_v52 = vmul.f32 2.0, %v1724_v30 }
 0x405   : > { %v1861_v48 = vmul.f32 0.5, %v1853_v43  ;;  %v1847_v18 = vmul.f32 %v1839_v34, %v1767_v2  ;;  %v1761_v17 = vadd.f32 0.0009, %v1753_v58  ;;  %v1723_v0 = vsub.f32 %v1707_v24, %v4070_v4 }
 0x406   : > { %v1878_v27 = vmin.f32 %v1870_v57, 1.0  ;;  %v1864_v59 = vmul.f32 0.5, %v1856_v42  ;;  %v1850_v54 = vmul.f32 %v1842_v56, %v1770_v49  ;;  %v1764_v8 = vadd.f32 0.0009, %v1756_v52 }
 0x407   : > { %v1869_v23 = vmax.f32 %v1861_v48, 0.0  ;;  %v1855_v32 = vsub.f32 1.0, %v1847_v18  ;;  %v1769_v62 = vmul.f32 %v1761_v17, %v3876_v31  ;;  %v1755_v53 = vmul.f32 2.0, %v1723_v0 }
 0x408   : > { %v1872_v47 = vmax.f32 %v1864_v59, 0.0  ;;  %v1858_v29 = vsub.f32 1.0, %v1850_v54  ;;  %v1772_v21 = vmul.f32 %v1764_v8, %v3883_v28  ;;  %1886 = vst [vmem:[%s3914_s6 + $0x8] sm:$0xff] %v1878_v27 }
 0x409   : > { %v1877_v34 = vmin.f32 %v1869_v23, 1.0  ;;  %v1863_v40 = vmul.f32 0.5, %v1855_v32  ;;  %v1849_v14 = vmul.f32 %v1841_v12, %v1769_v62  ;;  %v1763_v56 = vadd.f32 0.0009, %v1755_v53 }
 0x40a   : > { %v1880_v6 = vmin.f32 %v1872_v47, 1.0  ;;  %v1866_v16 = vmul.f32 0.5, %v1858_v29  ;;  %v1852_v31 = vmul.f32 %v1844_v41, %v1772_v21 }
 0x40b   : > { %v1871_v35 = vmax.f32 %v1863_v40, 0.0  ;;  %v1857_v11 = vsub.f32 1.0, %v1849_v14  ;;  %v1771_v28 = vmul.f32 %v1763_v56, %v3888_v46  ;;  %1885 = vst [vmem:[%s3914_s6] sm:$0xff] %v1877_v34 }
 0x40c   : > { %v1874_v55 = vmax.f32 %v1866_v16, 0.0  ;;  %v1860_v15 = vsub.f32 1.0, %v1852_v31  ;;  %1888 = vst [vmem:[%s3914_s6 + $0x18] sm:$0xff] %v1880_v6 }
 0x40d   : > { %v1879_v61 = vmin.f32 %v1871_v35, 1.0  ;;  %v1865_v63 = vmul.f32 0.5, %v1857_v11  ;;  %v1851_v39 = vmul.f32 %v1843_v1, %v1771_v28 }
 0x40e   : > { %v1882_v45 = vmin.f32 %v1874_v55, 1.0  ;;  %v1868_v12 = vmul.f32 0.5, %v1860_v15 }
 0x40f   : > { %v1873_v37 = vmax.f32 %v1865_v63, 0.0  ;;  %v1859_v9 = vsub.f32 1.0, %v1851_v39  ;;  %1887 = vst [vmem:[%s3914_s6 + $0x10] sm:$0xff] %v1879_v61 }
 0x410   : > { %v1876_v26 = vmax.f32 %v1868_v12, 0.0  ;;  %1890 = vst [vmem:[%s3914_s6 + $0x28] sm:$0xff] %v1882_v45 }
 0x411   : > { %v1881_v46 = vmin.f32 %v1873_v37, 1.0  ;;  %v1867_v44 = vmul.f32 0.5, %v1859_v9 }
 0x412   : > { %v1884_v19 = vmin.f32 %v1876_v26, 1.0 }
 0x413   : > { %v1875_v36 = vmax.f32 %v1867_v44, 0.0  ;;  %1889 = vst [vmem:[%s3914_s6 + $0x20] sm:$0xff] %v1881_v46 }
 0x414   : > { %1892 = vst [vmem:[%s3914_s6 + $0x38] sm:$0xff] %v1884_v19 }
 0x415   : > { %v1883_v7 = vmin.f32 %v1875_v36, 1.0 }
 0x417   : > { %1891 = vst [vmem:[%s3914_s6 + $0x30] sm:$0xff] %v1883_v7 }
 0x418   : > { %2193 = shalt.err (!%p2190_p11)
}
 0x419   : > { %s2194_s16 = scalar_lea.hbm %s3930_s26, 1024  ;;  %s2198_s19 = scalar_lea.hbm %s3979_s2, 2048 }
 0x41a   : > { %p2195_p3 = scmp.ne.s32.totalorder %s3930_s26, %s2194_s16  ;;  %p2199_p2 = scmp.lt.u32.totalorder %s3930_s26, %s3979_s2 }
 0x41b   : > { %p2200_p4 = scmp.lt.u32.totalorder %s2198_s19, %s2194_s16  ;;  %p2202_p13 = scmp.lt.u32.totalorder %s2194_s16, %s3930_s26 }
 0x41c   : > { %p2196_p8 = pnand %p2195_p3, %p4071_p1 }
 0x41d   : > { %p2201_p6 = por %p2200_p4, %p2199_p2 }
 0x41e   : > { %p2197_p0 = pneg %p2196_p8 }
 0x41f   : > { %p2203_p12 = por %p2202_p13, %p2201_p6 }
 0x421   : > { %p2204_p10 = pnand %p2203_p12, %p2197_p0 }
 0x423   : > { %2207 = shalt.err (!%p2204_p10)
}
 0x424   : > { %s2259_s20 = smov 128   ;;  %s2260_s5 = smov 8  }
 0x425   : > { %2035 = dma.vmem_to_hbm [thread:$0]  (%p4071_p1), %s3932_s17, 1024, %s3930_s26, %s1894_s27, %s2259_s20, %s2259_s20, %s2260_s5  }
 0x426 PF: > { %s1923_s6 = sand.u32 1, %s2238_s9   ;;  %p4072_p5 = scmp.ne.s32.totalorder %s3995_s22, 0 }
 0x427   : > { %p4073_p7 = scmp.ge.s32.totalorder %s2250_s12, 2  ;;  %s1924_s14 = scalar_lea.sflag [#allocation5], %s1923_s6 }
 0x429   : > { %p2045_p9 = pnand %p4073_p7, %p4072_p5 }
 0x42b   : > { %2233 = dma.done.wait (!%p2045_p9), %s1924_s14, 1024  }
 0x42c   : > { %2235 = vsyncadd (!%p2045_p9), %s1924_s14, 4294966272  ;;  %p18_p11 = scmp.ge.s32.totalorder %s2301_s15, 4   ;;  %s4074_s9 = smov %s2242_s10 }
 0x42d   : > { %s4075_s10 = smov %s2246_s11  ;;  %s4076_s11 = smov %s2313_s18 }
 0x42e   : > { %s4077_s12 = smov %s2301_s15  ;;  %20 = sbr.rel (!%p18_p11) target bundleno = 7 (0x7), region = 86 }
 0x435   :  { %1929 = vsyncpa [#allocation4], 1 }
 0x436   :  { %1931 = vsyncpa [#allocation4 + $0x1], 1 }
 0x437   :  { %1932 = vsyncpa [#allocation7], 1 }
 0x438   :  { %1934 = vsyncpa [#allocation7 + $0x1], 1 }
 0x439   :  { %1935 = vsyncpa [#allocation5], 1 }
 0x43a   :  { %1937 = vsyncpa [#allocation5 + $0x1], 1 }

</bundles_post_ra>
